<compile_context>
chip_gen: v5e
topology: v5e:2x2
jax: 0.10.0
libtpu: 0.0.40
codegen_flags: <defaults>
</compile_context>

<pallas_src>
import jax
import jax.numpy as jnp
from jax.experimental import pallas as pl
from jax.experimental.pallas import tpu as pltpu


_INV_SQRT2 = 0.70710678118654752440


def _round_up(x, m):
    return (x + m - 1) // m * m


def _cdiv(a, b):
    return -(-a // b)


def _gelu_exact(x):
    # PyTorch nn.GELU() default = exact erf formulation (dtype-preserving).
    c = jnp.asarray(_INV_SQRT2, dtype=x.dtype)
    return x * 0.5 * (1.0 + jax.lax.erf(x * c))


# -----------------------------------------------------------------------------
# Kernel factory: one batch tile per grid step, all weights VMEM-resident,
# bf16 MXU inputs with f32 accumulation, lane-dense (1, TB) output row.
# -----------------------------------------------------------------------------
def _make_kernel(view_num, elementwise_dtype):
    def kernel(*refs):
        xs = refs[0:view_num]                       # (TB, in_dim_v) f32, streamed
        ws = refs[view_num:2 * view_num]            # (in_dim_v, F) bf16
        bs = refs[2 * view_num:3 * view_num]        # (1, F) f32
        wfs = refs[3 * view_num:4 * view_num]       # (F, F) bf16 (fusion split)
        bf_ref, wc1_ref, bc1_ref, wc2_ref, bc2_ref, out_ref = refs[4 * view_num:]

        cdt = ws[0].dtype                           # matmul input dtype (bf16)

        # Per-view encoders + fusion accumulation:
        #   concat(f_0..f_V) @ W_f == sum_v f_v @ W_f[v]
        acc = None
        for v in range(view_num):
            xv = xs[v][...].astype(cdt)             # in-kernel bf16 cast (VPU)
            pre = (jnp.dot(xv, ws[v][...], preferred_element_type=jnp.float32)
                   + bs[v][...])
            fv = _gelu_exact(pre.astype(elementwise_dtype))
            contrib = jnp.dot(fv.astype(cdt), wfs[v][...],
                              preferred_element_type=jnp.float32)
            acc = contrib if acc is None else acc + contrib
        h = _gelu_exact((acc + bf_ref[...]).astype(elementwise_dtype))

        # Classification head: Linear(F,128)+GELU, Linear(128,1)+Sigmoid.
        c = _gelu_exact(
            (jnp.dot(h.astype(cdt), wc1_ref[...],
                     preferred_element_type=jnp.float32)
             + bc1_ref[...]).astype(elementwise_dtype))

        # Final layer as wc2_row (1,H) contracted with c (TB,H) along H,
        # producing a lane-dense (1, TB) logits row (no (TB,1) column store).
        logits = jax.lax.dot_general(
            wc2_ref[...], c.astype(cdt),
            dimension_numbers=(((1,), (1,)), ((), ())),
            preferred_element_type=jnp.float32) + bc2_ref[0, 0]
        out_ref[...] = jax.nn.sigmoid(logits)

    return kernel


# -----------------------------------------------------------------------------
# Host-side parameter packing (done once): bf16 weights, f32 biases,
# fusion weight split per view, wc2 stored as a (1, hid) row.
# -----------------------------------------------------------------------------
def pack_params(params, *, compute_dtype=jnp.bfloat16):
    view_num = len(params["w"])
    feature_dim = params["w"][0].shape[1]
    hid = params["wc1"].shape[1]
    return dict(
        w=[w.astype(compute_dtype) for w in params["w"]],
        b=[b.reshape(1, feature_dim).astype(jnp.float32) for b in params["b"]],
        wf=[params["wf"][v * feature_dim:(v + 1) * feature_dim, :]
            .astype(compute_dtype) for v in range(view_num)],
        bf=params["bf"].reshape(1, feature_dim).astype(jnp.float32),
        wc1=params["wc1"].astype(compute_dtype),
        bc1=params["bc1"].reshape(1, hid).astype(jnp.float32),
        wc2_row=params["wc2"].reshape(1, hid).astype(compute_dtype),
        bc2=params["bc2"].reshape(1, 1).astype(jnp.float32),
        view_num=view_num, feature_dim=feature_dim, hid=hid,
    )


# -----------------------------------------------------------------------------
# Wrapper: batch-gridded pallas_call, weights resident, activations streamed.
# -----------------------------------------------------------------------------
def dilcr_forward(xs, packed, *, tile_b=None, elementwise_dtype=jnp.float32):
    view_num = packed["view_num"]
    assert len(xs) == view_num
    b = xs[0].shape[0]
    in_dims = [int(x.shape[1]) for x in xs]

    # Batch tile: multiple of 128 rows, cap 512 (DMA efficiency ~85%+ of HBM
    # roofline), and guarantee >= 2 grid steps so both v7x TensorCores work.
    if tile_b is None:
        tile_b = min(512, max(128, _round_up(_cdiv(b, 2), 128)))
    n_tiles = max(2, _cdiv(b, tile_b))
    b_pad = n_tiles * tile_b

    xs_p = []
    for x in xs:
        x = x.astype(jnp.float32)
        if b_pad != b:
            x = jnp.pad(x, ((0, b_pad - b), (0, 0)))
        xs_p.append(x)

    def resident(arr):
        # Full-array block, constant index map -> stays in VMEM across the grid.
        return pl.BlockSpec(arr.shape, lambda i: (0, 0))

    in_specs = (
        [pl.BlockSpec((tile_b, in_dims[v]), lambda i: (i, 0))   # streamed views
         for v in range(view_num)]
        + [resident(packed["w"][v]) for v in range(view_num)]   # encoder weights
        + [resident(packed["b"][v]) for v in range(view_num)]   # encoder biases
        + [resident(packed["wf"][v]) for v in range(view_num)]  # fusion weights
        + [resident(packed["bf"]),                              # fusion bias
           resident(packed["wc1"]), resident(packed["bc1"]),    # head layer 1
           resident(packed["wc2_row"]),                         # head layer 2 row
           pl.BlockSpec(memory_space=pltpu.MemorySpace.SMEM)]   # head bias scalar
    )

    out = pl.pallas_call(
        _make_kernel(view_num, elementwise_dtype),
        out_shape=jax.ShapeDtypeStruct((1, b_pad), jnp.float32),
        grid=(n_tiles,),
        in_specs=in_specs,
        out_specs=pl.BlockSpec((1, tile_b), lambda i: (0, i)),   # lane-dense row
        compiler_params=pltpu.CompilerParams(
            dimension_semantics=("parallel",),      # megacore split on v7x
            vmem_limit_bytes=32 * 1024 * 1024,      # safe on v5e/v6e/v7x
        ),
    )(*xs_p, *packed["w"], *packed["b"], *packed["wf"],
      packed["bf"], packed["wc1"], packed["bc1"],
      packed["wc2_row"], packed["bc2"])

    return out[0, :b].reshape(b, 1)


# -----------------------------------------------------------------------------
# Synthetic params + pure-JAX f32 reference mirroring the PyTorch module.
# -----------------------------------------------------------------------------
def make_params(key, in_dim, feature_dim, hid=128):
    keys = jax.random.split(key, 12)
    k = iter(keys)

    def lin(kw, di, do):
        return 0.05 * jax.random.normal(kw, (di, do), jnp.float32)

    params = {"w": [], "b": []}
    for v in range(len(in_dim)):
        params["w"].append(lin(next(k), in_dim[v], feature_dim))
        params["b"].append(
            0.01 * jax.random.normal(next(k), (1, feature_dim), jnp.float32))
    params["wf"] = lin(next(k), len(in_dim) * feature_dim, feature_dim)
    params["bf"] = 0.01 * jax.random.normal(next(k), (1, feature_dim), jnp.float32)
    params["wc1"] = lin(next(k), feature_dim, hid)
    params["bc1"] = 0.01 * jax.random.normal(next(k), (1, hid), jnp.float32)
    params["wc2"] = lin(next(k), hid, 1)
    params["bc2"] = 0.01 * jax.random.normal(next(k), (1, 1), jnp.float32)
    return params


def dilcr_reference(xs, params):
    gelu = lambda t: jax.nn.gelu(t, approximate=False)
    feats = [gelu(x @ w + b)
             for x, w, b in zip(xs, params["w"], params["b"])]
    cat = jnp.concatenate(feats, axis=1)
    h = gelu(cat @ params["wf"] + params["bf"])
    c = gelu(h @ params["wc1"] + params["bc1"])
    return jax.nn.sigmoid(c @ params["wc2"] + params["bc2"])


if __name__ == "__main__":
    # Small shapes consistent with the module: 3 views with per-view input dims,
    # feature_dim, classification hidden = 128, output = 1.
    batch = 8
    in_dim = [32, 48, 64]
    feature_dim = 64

    root = jax.random.PRNGKey(0)
    kx0, kx1, kx2, kp = jax.random.split(root, 4)
    xs = (
        jax.random.normal(kx0, (batch, in_dim[0]), jnp.float32),
        jax.random.normal(kx1, (batch, in_dim[1]), jnp.float32),
        jax.random.normal(kx2, (batch, in_dim[2]), jnp.float32),
    )
    params = make_params(kp, in_dim, feature_dim)
    packed = pack_params(params)

    # Default: exact-erf GELU in f32 (best match to PyTorch; right choice on
    # v5e).  On v6e/v7x, pass elementwise_dtype=jnp.bfloat16 for faster VPU/EUP.
    pred = dilcr_forward(xs, packed)
    pred = jax.block_until_ready(pred)

    ref = dilcr_reference(xs, params)
    assert pred.shape == (batch, 1), pred.shape
    max_err = float(jnp.max(jnp.abs(pred - ref)))
    # bf16 matmul inputs (f32 accumulation) vs f32 reference -> loosened tol.
    assert max_err < 2e-2, f"max abs err {max_err}"

    print("KERNEL_OK")
</pallas_src>

<mosaic_0001>
module attributes {stable_mosaic.version = 11 : i64} {
  func.func @kernel(%arg0: i32, %arg1: memref<128x32xf32, #tpu.memory_space<vmem>>, %arg2: memref<128x48xf32, #tpu.memory_space<vmem>>, %arg3: memref<128x64xf32, #tpu.memory_space<vmem>>, %arg4: memref<32x64xbf16, #tpu.memory_space<vmem>>, %arg5: memref<48x64xbf16, #tpu.memory_space<vmem>>, %arg6: memref<64x64xbf16, #tpu.memory_space<vmem>>, %arg7: memref<1x64xf32, #tpu.memory_space<vmem>>, %arg8: memref<1x64xf32, #tpu.memory_space<vmem>>, %arg9: memref<1x64xf32, #tpu.memory_space<vmem>>, %arg10: memref<64x64xbf16, #tpu.memory_space<vmem>>, %arg11: memref<64x64xbf16, #tpu.memory_space<vmem>>, %arg12: memref<64x64xbf16, #tpu.memory_space<vmem>>, %arg13: memref<1x64xf32, #tpu.memory_space<vmem>>, %arg14: memref<64x128xbf16, #tpu.memory_space<vmem>>, %arg15: memref<1x128xf32, #tpu.memory_space<vmem>>, %arg16: memref<1x128xbf16, #tpu.memory_space<vmem>>, %arg17: memref<1x1xf32, #tpu.memory_space<smem>>, %arg18: memref<1x128xf32, #tpu.memory_space<vmem>>) attributes {dimension_semantics = [#tpu.dimension_semantics<parallel>], iteration_bounds = array<i64: 2>, scalar_prefetch = 0 : i64, scratch_operands = 0 : i64, tpu.core_type = #tpu.core_type<tc>, window_params = [{transform_indices = @transform_0, window_bounds = array<i64: 128, 32>}, {transform_indices = @transform_1, window_bounds = array<i64: 128, 48>}, {transform_indices = @transform_2, window_bounds = array<i64: 128, 64>}, {pipeline_mode = #tpu.pipeline_mode<synchronous>, transform_indices = @transform_3, window_bounds = array<i64: 32, 64>}, {pipeline_mode = #tpu.pipeline_mode<synchronous>, transform_indices = @transform_4, window_bounds = array<i64: 48, 64>}, {pipeline_mode = #tpu.pipeline_mode<synchronous>, transform_indices = @transform_5, window_bounds = array<i64: 64, 64>}, {pipeline_mode = #tpu.pipeline_mode<synchronous>, transform_indices = @transform_6, window_bounds = array<i64: 1, 64>}, {pipeline_mode = #tpu.pipeline_mode<synchronous>, transform_indices = @transform_7, window_bounds = array<i64: 1, 64>}, {pipeline_mode = #tpu.pipeline_mode<synchronous>, transform_indices = @transform_8, window_bounds = array<i64: 1, 64>}, {pipeline_mode = #tpu.pipeline_mode<synchronous>, transform_indices = @transform_9, window_bounds = array<i64: 64, 64>}, {pipeline_mode = #tpu.pipeline_mode<synchronous>, transform_indices = @transform_10, window_bounds = array<i64: 64, 64>}, {pipeline_mode = #tpu.pipeline_mode<synchronous>, transform_indices = @transform_11, window_bounds = array<i64: 64, 64>}, {pipeline_mode = #tpu.pipeline_mode<synchronous>, transform_indices = @transform_12, window_bounds = array<i64: 1, 64>}, {pipeline_mode = #tpu.pipeline_mode<synchronous>, transform_indices = @transform_13, window_bounds = array<i64: 64, 128>}, {pipeline_mode = #tpu.pipeline_mode<synchronous>, transform_indices = @transform_14, window_bounds = array<i64: 1, 128>}, {pipeline_mode = #tpu.pipeline_mode<synchronous>, transform_indices = @transform_15, window_bounds = array<i64: 1, 128>}, {transform_indices = @transform_16, window_bounds = array<i64: 1, 1>}, {transform_indices = @transform_17, window_bounds = array<i64: 1, 128>}]} {
    %c0 = arith.constant 0 : index
    %c0_0 = arith.constant 0 : index
    %0 = vector.load %arg1[%c0, %c0_0] : memref<128x32xf32, #tpu.memory_space<vmem>>, vector<128x32xf32>
    %1 = arith.truncf %0 : vector<128x32xf32> to vector<128x32xbf16>
    %c0_1 = arith.constant 0 : index
    %c0_2 = arith.constant 0 : index
    %2 = vector.load %arg4[%c0_1, %c0_2] : memref<32x64xbf16, #tpu.memory_space<vmem>>, vector<32x64xbf16>
    %cst = arith.constant dense<0.000000e+00> : vector<128x64xf32>
    %3 = tpu.matmul %1, %2, %cst {dimension_numbers = #tpu.dot_dimension_numbers<[1], [0], [0], [1], [0, 0, 1, 1], [], []>} : vector<128x32xbf16>, vector<32x64xbf16>, vector<128x64xf32> -> vector<128x64xf32>
    %c0_3 = arith.constant 0 : index
    %c0_4 = arith.constant 0 : index
    %4 = vector.load %arg7[%c0_3, %c0_4] : memref<1x64xf32, #tpu.memory_space<vmem>>, vector<1x64xf32>
    %5 = vector.broadcast %4 : vector<1x64xf32> to vector<128x64xf32>
    %6 = arith.addf %3, %5 : vector<128x64xf32>
    %cst_5 = arith.constant 5.000000e-01 : f32
    %7 = vector.broadcast %cst_5 : f32 to vector<128x64xf32>
    %8 = arith.mulf %6, %7 : vector<128x64xf32>
    %cst_6 = arith.constant 0.707106769 : f32
    %9 = vector.broadcast %cst_6 : f32 to vector<128x64xf32>
    %10 = arith.mulf %6, %9 : vector<128x64xf32>
    %11 = math.erf %10 : vector<128x64xf32>
    %cst_7 = arith.constant 1.000000e+00 : f32
    %12 = vector.broadcast %cst_7 : f32 to vector<128x64xf32>
    %13 = arith.addf %12, %11 : vector<128x64xf32>
    %14 = arith.mulf %8, %13 : vector<128x64xf32>
    %15 = arith.truncf %14 : vector<128x64xf32> to vector<128x64xbf16>
    %c0_8 = arith.constant 0 : index
    %c0_9 = arith.constant 0 : index
    %16 = vector.load %arg10[%c0_8, %c0_9] : memref<64x64xbf16, #tpu.memory_space<vmem>>, vector<64x64xbf16>
    %cst_10 = arith.constant dense<0.000000e+00> : vector<128x64xf32>
    %17 = tpu.matmul %15, %16, %cst_10 {dimension_numbers = #tpu.dot_dimension_numbers<[1], [0], [0], [1], [0, 0, 1, 1], [], []>} : vector<128x64xbf16>, vector<64x64xbf16>, vector<128x64xf32> -> vector<128x64xf32>
    %c0_11 = arith.constant 0 : index
    %c0_12 = arith.constant 0 : index
    %18 = vector.load %arg2[%c0_11, %c0_12] : memref<128x48xf32, #tpu.memory_space<vmem>>, vector<128x48xf32>
    %19 = arith.truncf %18 : vector<128x48xf32> to vector<128x48xbf16>
    %c0_13 = arith.constant 0 : index
    %c0_14 = arith.constant 0 : index
    %20 = vector.load %arg5[%c0_13, %c0_14] : memref<48x64xbf16, #tpu.memory_space<vmem>>, vector<48x64xbf16>
    %cst_15 = arith.constant dense<0.000000e+00> : vector<128x64xf32>
    %21 = tpu.matmul %19, %20, %cst_15 {dimension_numbers = #tpu.dot_dimension_numbers<[1], [0], [0], [1], [0, 0, 1, 1], [], []>} : vector<128x48xbf16>, vector<48x64xbf16>, vector<128x64xf32> -> vector<128x64xf32>
    %c0_16 = arith.constant 0 : index
    %c0_17 = arith.constant 0 : index
    %22 = vector.load %arg8[%c0_16, %c0_17] : memref<1x64xf32, #tpu.memory_space<vmem>>, vector<1x64xf32>
    %23 = vector.broadcast %22 : vector<1x64xf32> to vector<128x64xf32>
    %24 = arith.addf %21, %23 : vector<128x64xf32>
    %cst_18 = arith.constant 5.000000e-01 : f32
    %25 = vector.broadcast %cst_18 : f32 to vector<128x64xf32>
    %26 = arith.mulf %24, %25 : vector<128x64xf32>
    %cst_19 = arith.constant 0.707106769 : f32
    %27 = vector.broadcast %cst_19 : f32 to vector<128x64xf32>
    %28 = arith.mulf %24, %27 : vector<128x64xf32>
    %29 = math.erf %28 : vector<128x64xf32>
    %cst_20 = arith.constant 1.000000e+00 : f32
    %30 = vector.broadcast %cst_20 : f32 to vector<128x64xf32>
    %31 = arith.addf %30, %29 : vector<128x64xf32>
    %32 = arith.mulf %26, %31 : vector<128x64xf32>
    %33 = arith.truncf %32 : vector<128x64xf32> to vector<128x64xbf16>
    %c0_21 = arith.constant 0 : index
    %c0_22 = arith.constant 0 : index
    %34 = vector.load %arg11[%c0_21, %c0_22] : memref<64x64xbf16, #tpu.memory_space<vmem>>, vector<64x64xbf16>
    %cst_23 = arith.constant dense<0.000000e+00> : vector<128x64xf32>
    %35 = tpu.matmul %33, %34, %cst_23 {dimension_numbers = #tpu.dot_dimension_numbers<[1], [0], [0], [1], [0, 0, 1, 1], [], []>} : vector<128x64xbf16>, vector<64x64xbf16>, vector<128x64xf32> -> vector<128x64xf32>
    %36 = arith.addf %17, %35 : vector<128x64xf32>
    %c0_24 = arith.constant 0 : index
    %c0_25 = arith.constant 0 : index
    %37 = vector.load %arg3[%c0_24, %c0_25] : memref<128x64xf32, #tpu.memory_space<vmem>>, vector<128x64xf32>
    %38 = arith.truncf %37 : vector<128x64xf32> to vector<128x64xbf16>
    %c0_26 = arith.constant 0 : index
    %c0_27 = arith.constant 0 : index
    %39 = vector.load %arg6[%c0_26, %c0_27] : memref<64x64xbf16, #tpu.memory_space<vmem>>, vector<64x64xbf16>
    %cst_28 = arith.constant dense<0.000000e+00> : vector<128x64xf32>
    %40 = tpu.matmul %38, %39, %cst_28 {dimension_numbers = #tpu.dot_dimension_numbers<[1], [0], [0], [1], [0, 0, 1, 1], [], []>} : vector<128x64xbf16>, vector<64x64xbf16>, vector<128x64xf32> -> vector<128x64xf32>
    %c0_29 = arith.constant 0 : index
    %c0_30 = arith.constant 0 : index
    %41 = vector.load %arg9[%c0_29, %c0_30] : memref<1x64xf32, #tpu.memory_space<vmem>>, vector<1x64xf32>
    %42 = vector.broadcast %41 : vector<1x64xf32> to vector<128x64xf32>
    %43 = arith.addf %40, %42 : vector<128x64xf32>
    %cst_31 = arith.constant 5.000000e-01 : f32
    %44 = vector.broadcast %cst_31 : f32 to vector<128x64xf32>
    %45 = arith.mulf %43, %44 : vector<128x64xf32>
    %cst_32 = arith.constant 0.707106769 : f32
    %46 = vector.broadcast %cst_32 : f32 to vector<128x64xf32>
    %47 = arith.mulf %43, %46 : vector<128x64xf32>
    %48 = math.erf %47 : vector<128x64xf32>
    %cst_33 = arith.constant 1.000000e+00 : f32
    %49 = vector.broadcast %cst_33 : f32 to vector<128x64xf32>
    %50 = arith.addf %49, %48 : vector<128x64xf32>
    %51 = arith.mulf %45, %50 : vector<128x64xf32>
    %52 = arith.truncf %51 : vector<128x64xf32> to vector<128x64xbf16>
    %c0_34 = arith.constant 0 : index
    %c0_35 = arith.constant 0 : index
    %53 = vector.load %arg12[%c0_34, %c0_35] : memref<64x64xbf16, #tpu.memory_space<vmem>>, vector<64x64xbf16>
    %cst_36 = arith.constant dense<0.000000e+00> : vector<128x64xf32>
    %54 = tpu.matmul %52, %53, %cst_36 {dimension_numbers = #tpu.dot_dimension_numbers<[1], [0], [0], [1], [0, 0, 1, 1], [], []>} : vector<128x64xbf16>, vector<64x64xbf16>, vector<128x64xf32> -> vector<128x64xf32>
    %55 = arith.addf %36, %54 : vector<128x64xf32>
    %c0_37 = arith.constant 0 : index
    %c0_38 = arith.constant 0 : index
    %56 = vector.load %arg13[%c0_37, %c0_38] : memref<1x64xf32, #tpu.memory_space<vmem>>, vector<1x64xf32>
    %57 = vector.broadcast %56 : vector<1x64xf32> to vector<128x64xf32>
    %58 = arith.addf %55, %57 : vector<128x64xf32>
    %cst_39 = arith.constant 5.000000e-01 : f32
    %59 = vector.broadcast %cst_39 : f32 to vector<128x64xf32>
    %60 = arith.mulf %58, %59 : vector<128x64xf32>
    %cst_40 = arith.constant 0.707106769 : f32
    %61 = vector.broadcast %cst_40 : f32 to vector<128x64xf32>
    %62 = arith.mulf %58, %61 : vector<128x64xf32>
    %63 = math.erf %62 : vector<128x64xf32>
    %cst_41 = arith.constant 1.000000e+00 : f32
    %64 = vector.broadcast %cst_41 : f32 to vector<128x64xf32>
    %65 = arith.addf %64, %63 : vector<128x64xf32>
    %66 = arith.mulf %60, %65 : vector<128x64xf32>
    %67 = arith.truncf %66 : vector<128x64xf32> to vector<128x64xbf16>
    %c0_42 = arith.constant 0 : index
    %c0_43 = arith.constant 0 : index
    %68 = vector.load %arg14[%c0_42, %c0_43] : memref<64x128xbf16, #tpu.memory_space<vmem>>, vector<64x128xbf16>
    %cst_44 = arith.constant dense<0.000000e+00> : vector<128x128xf32>
    %69 = tpu.matmul %67, %68, %cst_44 {dimension_numbers = #tpu.dot_dimension_numbers<[1], [0], [0], [1], [0, 0, 1, 1], [], []>} : vector<128x64xbf16>, vector<64x128xbf16>, vector<128x128xf32> -> vector<128x128xf32>
    %c0_45 = arith.constant 0 : index
    %c0_46 = arith.constant 0 : index
    %70 = vector.load %arg15[%c0_45, %c0_46] : memref<1x128xf32, #tpu.memory_space<vmem>>, vector<1x128xf32>
    %71 = vector.broadcast %70 : vector<1x128xf32> to vector<128x128xf32>
    %72 = arith.addf %69, %71 : vector<128x128xf32>
    %cst_47 = arith.constant 5.000000e-01 : f32
    %73 = vector.broadcast %cst_47 : f32 to vector<128x128xf32>
    %74 = arith.mulf %72, %73 : vector<128x128xf32>
    %cst_48 = arith.constant 0.707106769 : f32
    %75 = vector.broadcast %cst_48 : f32 to vector<128x128xf32>
    %76 = arith.mulf %72, %75 : vector<128x128xf32>
    %77 = math.erf %76 : vector<128x128xf32>
    %cst_49 = arith.constant 1.000000e+00 : f32
    %78 = vector.broadcast %cst_49 : f32 to vector<128x128xf32>
    %79 = arith.addf %78, %77 : vector<128x128xf32>
    %80 = arith.mulf %74, %79 : vector<128x128xf32>
    %c0_50 = arith.constant 0 : index
    %c0_51 = arith.constant 0 : index
    %81 = vector.load %arg16[%c0_50, %c0_51] : memref<1x128xbf16, #tpu.memory_space<vmem>>, vector<1x128xbf16>
    %82 = arith.truncf %80 : vector<128x128xf32> to vector<128x128xbf16>
    %cst_52 = arith.constant dense<0.000000e+00> : vector<1x128xf32>
    %83 = tpu.matmul %81, %82, %cst_52 {dimension_numbers = #tpu.dot_dimension_numbers<[1], [1], [0], [0], [0, 0, 1, 0], [], []>} : vector<1x128xbf16>, vector<128x128xbf16>, vector<1x128xf32> -> vector<1x128xf32>
    %c0_53 = arith.constant 0 : index
    %c0_54 = arith.constant 0 : index
    %84 = memref.load %arg17[%c0_53, %c0_54] : memref<1x1xf32, #tpu.memory_space<smem>>
    %85 = vector.broadcast %84 : f32 to vector<1x128xf32>
    %86 = arith.addf %83, %85 : vector<1x128xf32>
    %87 = arith.negf %86 : vector<1x128xf32>
    %88 = math.exp %87 : vector<1x128xf32>
    %cst_55 = arith.constant 1.000000e+00 : f32
    %89 = vector.broadcast %cst_55 : f32 to vector<1x128xf32>
    %90 = arith.addf %89, %88 : vector<1x128xf32>
    %91 = arith.divf %89, %90 : vector<1x128xf32>
    %c0_56 = arith.constant 0 : index
    %c0_57 = arith.constant 0 : index
    %92 = vector.load %arg18[%c0_56, %c0_57] : memref<1x128xf32, #tpu.memory_space<vmem>>, vector<1x128xf32>
    tpu.vector_store %arg18[%c0_56, %c0_57], %91 {strides = array<i32>} : memref<1x128xf32, #tpu.memory_space<vmem>>, vector<1x128xf32>,
    return
  }
  func.func @transform_0(%arg0: i32) -> (i32, i32) {
    %c0_i32 = arith.constant 0 : i32
    %c0_i32_0 = arith.constant 0 : i32
    return %arg0, %c0_i32 : i32, i32
  }
  func.func @transform_1(%arg0: i32) -> (i32, i32) {
    %c0_i32 = arith.constant 0 : i32
    %c0_i32_0 = arith.constant 0 : i32
    return %arg0, %c0_i32 : i32, i32
  }
  func.func @transform_2(%arg0: i32) -> (i32, i32) {
    %c0_i32 = arith.constant 0 : i32
    %c0_i32_0 = arith.constant 0 : i32
    return %arg0, %c0_i32 : i32, i32
  }
  func.func @transform_3(%arg0: i32) -> (i32, i32) {
    %c0_i32 = arith.constant 0 : i32
    %c0_i32_0 = arith.constant 0 : i32
    %c0_i32_1 = arith.constant 0 : i32
    return %c0_i32, %c0_i32_0 : i32, i32
  }
  func.func @transform_4(%arg0: i32) -> (i32, i32) {
    %c0_i32 = arith.constant 0 : i32
    %c0_i32_0 = arith.constant 0 : i32
    %c0_i32_1 = arith.constant 0 : i32
    return %c0_i32, %c0_i32_0 : i32, i32
  }
  func.func @transform_5(%arg0: i32) -> (i32, i32) {
    %c0_i32 = arith.constant 0 : i32
    %c0_i32_0 = arith.constant 0 : i32
    %c0_i32_1 = arith.constant 0 : i32
    return %c0_i32, %c0_i32_0 : i32, i32
  }
  func.func @transform_6(%arg0: i32) -> (i32, i32) {
    %c0_i32 = arith.constant 0 : i32
    %c0_i32_0 = arith.constant 0 : i32
    %c0_i32_1 = arith.constant 0 : i32
    return %c0_i32, %c0_i32_0 : i32, i32
  }
  func.func @transform_7(%arg0: i32) -> (i32, i32) {
    %c0_i32 = arith.constant 0 : i32
    %c0_i32_0 = arith.constant 0 : i32
    %c0_i32_1 = arith.constant 0 : i32
    return %c0_i32, %c0_i32_0 : i32, i32
  }
  func.func @transform_8(%arg0: i32) -> (i32, i32) {
    %c0_i32 = arith.constant 0 : i32
    %c0_i32_0 = arith.constant 0 : i32
    %c0_i32_1 = arith.constant 0 : i32
    return %c0_i32, %c0_i32_0 : i32, i32
  }
  func.func @transform_9(%arg0: i32) -> (i32, i32) {
    %c0_i32 = arith.constant 0 : i32
    %c0_i32_0 = arith.constant 0 : i32
    %c0_i32_1 = arith.constant 0 : i32
    return %c0_i32, %c0_i32_0 : i32, i32
  }
  func.func @transform_10(%arg0: i32) -> (i32, i32) {
    %c0_i32 = arith.constant 0 : i32
    %c0_i32_0 = arith.constant 0 : i32
    %c0_i32_1 = arith.constant 0 : i32
    return %c0_i32, %c0_i32_0 : i32, i32
  }
  func.func @transform_11(%arg0: i32) -> (i32, i32) {
    %c0_i32 = arith.constant 0 : i32
    %c0_i32_0 = arith.constant 0 : i32
    %c0_i32_1 = arith.constant 0 : i32
    return %c0_i32, %c0_i32_0 : i32, i32
  }
  func.func @transform_12(%arg0: i32) -> (i32, i32) {
    %c0_i32 = arith.constant 0 : i32
    %c0_i32_0 = arith.constant 0 : i32
    %c0_i32_1 = arith.constant 0 : i32
    return %c0_i32, %c0_i32_0 : i32, i32
  }
  func.func @transform_13(%arg0: i32) -> (i32, i32) {
    %c0_i32 = arith.constant 0 : i32
    %c0_i32_0 = arith.constant 0 : i32
    %c0_i32_1 = arith.constant 0 : i32
    return %c0_i32, %c0_i32_0 : i32, i32
  }
  func.func @transform_14(%arg0: i32) -> (i32, i32) {
    %c0_i32 = arith.constant 0 : i32
    %c0_i32_0 = arith.constant 0 : i32
    %c0_i32_1 = arith.constant 0 : i32
    return %c0_i32, %c0_i32_0 : i32, i32
  }
  func.func @transform_15(%arg0: i32) -> (i32, i32) {
    %c0_i32 = arith.constant 0 : i32
    %c0_i32_0 = arith.constant 0 : i32
    %c0_i32_1 = arith.constant 0 : i32
    return %c0_i32, %c0_i32_0 : i32, i32
  }
  func.func @transform_16(%arg0: i32) -> (i32, i32) {
    %c0_i32 = arith.constant 0 : i32
    %c0_i32_0 = arith.constant 0 : i32
    %c0_i32_1 = arith.constant 0 : i32
    return %c0_i32, %c0_i32_0 : i32, i32
  }
  func.func @transform_17(%arg0: i32) -> (i32, i32) {
    %c0_i32 = arith.constant 0 : i32
    %c0_i32_0 = arith.constant 0 : i32
    return %c0_i32, %arg0 : i32, i32
  }
}

</mosaic_0001>

<bundles_post_ra>
// kernel: tpu_custom_call.1
= control target key start
LH: loop header
LB: loop body
LE: loop exit
PB: predicated region body
PF: predicated region fallthrough
CT: control target
= control target key end

     0   :  { %s9799_s0 = inlined_call_operand.vmem [shape: f32[256,32], index: 0, kind: input, shape index: {}]   ;;  %s9800_s1 = inlined_call_operand.vmem [shape: f32[256,48], index: 1, kind: input, shape index: {}]   ;;  %s9801_s2 = inlined_call_operand.vmem [shape: f32[256,64], index: 2, kind: input, shape index: {}]   ;;  %s9802_s3 = inlined_call_operand.vmem [shape: bf16[32,64], index: 3, kind: input, shape index: {}]   ;;  %s9803_s4 = inlined_call_operand.vmem [shape: bf16[48,64], index: 4, kind: input, shape index: {}]   ;;  %s9804_s5 = inlined_call_operand.vmem [shape: bf16[64,64], index: 5, kind: input, shape index: {}]   ;;  %s9805_s6 = inlined_call_operand.vmem [shape: f32[1,64], index: 6, kind: input, shape index: {}]   ;;  %s9806_s7 = inlined_call_operand.vmem [shape: f32[1,64], index: 7, kind: input, shape index: {}]   ;;  %s9807_s8 = inlined_call_operand.vmem [shape: f32[1,64], index: 8, kind: input, shape index: {}]   ;;  %s9808_s9 = inlined_call_operand.vmem [shape: bf16[64,64], index: 9, kind: input, shape index: {}]   ;;  %s9809_s10 = inlined_call_operand.vmem [shape: bf16[64,64], index: 10, kind: input, shape index: {}]   ;;  %s9810_s11 = inlined_call_operand.vmem [shape: bf16[64,64], index: 11, kind: input, shape index: {}]   ;;  %s9811_s12 = inlined_call_operand.vmem [shape: f32[1,64], index: 12, kind: input, shape index: {}]   ;;  %s9812_s13 = inlined_call_operand.vmem [shape: bf16[64,128], index: 13, kind: input, shape index: {}]   ;;  %s9813_s14 = inlined_call_operand.vmem [shape: f32[1,128], index: 14, kind: input, shape index: {}]   ;;  %s9814_s15 = inlined_call_operand.vmem [shape: bf16[1,128], index: 15, kind: input, shape index: {}]   ;;  %s9815_s16 = inlined_call_operand.<no memory space> [shape: f32[1,1], index: 16, kind: input, shape index: {}]   ;;  %s9816_s17 = inlined_call_operand.hbm [shape: f32[1,256], index: 17, kind: output, shape index: {}]  }
   0x1   :  { %9833 = sst [smem:[#allocation27_spill]] %s9799_s0 }
   0x2   :  { %9834 = sst [smem:[#allocation28_spill]] %s9800_s1 }
   0x3   :  { %9835 = sst [smem:[#allocation29_spill]] %s9802_s3 }
   0x4   :  { %22 = sst [smem:[#allocation2]] %s9815_s16 }
   0x5   :  { %23 = vsyncpa [#allocation4], 0 }
   0x6   :  { %25 = vsyncpa [#allocation4 + $0x1], 0  ;;  %s5773_s26 = smov 0   ;;  %s5775_s27 = smov 0  }
   0x7   :  { %s5777_s28 = smov 0   ;;  %s5779_s29 = smov 0  }
   0x8 LB: > { %9836 = sst [smem:[#allocation6_spill]] %s5674_s28  ;;  %s5794_s16 = sadd.s32 4294967295, %s5678_s29   ;;  %s5678_s29 = sphi %s5779_s29, %s10046_s29   ;;  %s5674_s28 = sphi %s5777_s28, %s10048_s28   ;;  %s5670_s27 = sphi %s5775_s27, %s10050_s27   ;;  %s5666_s26 = sphi %s5773_s26, %s10049_s26  }
   0x9   : > { %s5120_s0 = sadd.s32 4294967294, %s5678_s29   ;;  %s5798_s30 = sadd.s32 1, %s5678_s29  }
   0xa   : > { %9837 = sst [smem:[#allocation7_spill]] %s5798_s30  ;;  %s410_s18 = sadd.s32 1, %s5674_s28 }
   0xb   : > { %s407_s19 = ssub.s32 %s5678_s29, %s5798_s30  ;;  %p420_p0 = scmp.ne.s32.totalorder %s5674_s28, %s5670_s27 }
   0xc   : > { %p408_p1 = scmp.eq.s32.totalorder %s407_s19, 0  ;;  %p421_p2 = scmp.eq.s32.totalorder %s5794_s16, 1 }
   0xd   : > { %p426_p3 = scmp.ne.s32.totalorder %s5670_s27, %s5666_s26  ;;  %p427_p4 = scmp.eq.s32.totalorder %s5120_s0, 1 }
   0xe   : > { %s5809_s1 = scalar_select %p408_p1, %s5674_s28, %s410_s18  }
   0xf   : > { %p5811_p5 = por %p421_p2, %p420_p0  ;;  %p5815_p6 = por %p427_p4, %p426_p3 }
  0x10   : > { %9838 = sst [smem:[#allocation8_spill]] %s5809_s1  ;;  %p5123_p7 = scmp.ge.s32.totalorder %s5678_s29, 1 }
  0x11   : > { %p514_p8 = scmp.lt.s32.totalorder %s5678_s29, 3 }
  0x13   : > { %p515_p9 = pnand %p5123_p7, %p514_p8 }
  0x15   : > { %518 = sbr.rel (%p515_p9) target bundleno = 1373 (0x55d), region = 88 }
  0x1a   : > { %s9841_s3 = sld [smem:[#allocation29_spill]]  ;;  %v5377_v1 = vld [vmem:[%s9803_s4 + $0x10] sm:$0xff]  ;;  %s5124_s0 = sshll.u32 %s5794_s16, 4  ;;  %v5376_v3 = vld [vmem:[%s9803_s4 + $0x8] sm:$0xff]  ;;  %v5375_v4 = vld [vmem:[%s9803_s4] sm:$0xff]  ;;  %vm638_vm0 = vcmask 261120  }
  0x1b   : > { %p576_p10 = scmp.lt.s32.totalorder %s5124_s0, 31  ;;  %1514 = vmatpush.bf16.msra.mxu1 %v5377_v1  ;;  %s9842_s25 = sld [smem:[#allocation27_spill]]  ;;  %vm1484_vm1 = vcmask 392192   ;;  %v5385_v35 = vld [vmem:[%s9804_s5 + $0x18] sm:$0xff]  ;;  %v5384_v42 = vld [vmem:[%s9804_s5 + $0x10] sm:$0xff]  ;;  %v5383_v43 = vld [vmem:[%s9804_s5 + $0x8] sm:$0xff] }
  0x1c   : > { %s9843_s30 = sld [smem:[#allocation28_spill]]  ;;  %v5382_v46 = vld [vmem:[%s9804_s5] sm:$0xff]  ;;  %vm2302_vm2 = vcmask 523264  }
  0x1d   : > { %s10052_s0 = smov (!%p576_p10, %s5124_s0), 31 }
  0x1e   : > { %s5834_s22 = sshll.u32 %s10052_s0, 3 }
  0x1f   : > { %1515 = vmatpush.bf16.msra.mxu1 %v5376_v3  ;;  %s5915_s23 = scalar_lea.vmem %s9801_s2, %s5834_s22 }
  0x20   : > { %v5370_v0 = vld [vmem:[%s9841_s3 + $0x8] sm:$0xff]  ;;  %v5369_v2 = vld [vmem:[%s9841_s3] sm:$0xff]  ;;  %v2475_v60 = vld [vmem:[%s5915_s23 + $0x10] sm:$0xff] }
  0x21   : > { %669 = vmatpush.bf16.msra.mxu0 %v5370_v0  ;;  %5394 = vmatpush.bf16.msra.mxu3 %v5370_v0  ;;  %s5840_s18 = scalar_lea.vmem %s9842_s25, %s5834_s22  ;;  %v2473_v57 = vld [vmem:[%s5915_s23] sm:$0xff]  ;;  %v2474_v58 = vld [vmem:[%s5915_s23 + $0x8] sm:$0xff]  ;;  %v2476_v61 = vld [vmem:[%s5915_s23 + $0x18] sm:$0xff]  ;;  %s5037_s25 = scalar_lea.hbm %s9816_s17, %s5794_s16 }
  0x22   : > { %s5849_s0 = scalar_lea.vmem %s9843_s30, %s5834_s22  ;;  %v594_v5 = vld [vmem:[%s5840_s18] sm:$0xff]  ;;  %v595_v6 = vld [vmem:[%s5840_s18 + $0x8] sm:$0xff]  ;;  %v608_v11 = vld [vmem:[%s5840_s18 + $0x70] sm:$0xff]  ;;  %v2489_v59 = vpack.c.bf16 %v2474_v58, %v2473_v57  ;;  %v2490_v62 = vpack.c.bf16 %v2476_v61, %v2475_v60  ;;  %s4993_s22 = sld [smem:[#allocation2]] }
  0x23   : > { %v1432_v7 = vld [vmem:[%s5849_s0] sm:$0xff]  ;;  %v610_v8 = vpack.c.bf16 %v595_v6, %v594_v5  ;;  %v1433_v9 = vld [vmem:[%s5849_s0 + $0x8] sm:$0xff]  ;;  %1516 = vmatpush.bf16.msra.mxu1 %v5375_v4  ;;  %v609_v12 = vld [vmem:[%s5840_s18 + $0x78] sm:$0xff]  ;;  %s5041_s28 = sshll.u32 %s5037_s25, 4  ;;  %s5042_s28 = int_to_ptr.hbm [resolvable:$true] %s5041_s28 }
  0x24   : > { %v1448_v10 = vpack.c.bf16 %v1433_v9, %v1432_v7  ;;  %v617_v13 = vpack.c.bf16 %v609_v12, %v608_v11  ;;  %v596_v14 = vld [vmem:[%s5840_s18 + $0x10] sm:$0xff]  ;;  %v597_v15 = vld [vmem:[%s5840_s18 + $0x18] sm:$0xff]  ;;  %v598_v23 = vld [vmem:[%s5840_s18 + $0x20] sm:$0xff]  ;;  %s5630_s16 = sshra.s32 %s5042_s28, 4  ;;  %s5631_s16 = int_to_ptr.hbm [resolvable:$true] %s5630_s16 }
  0x25   : > { %670 = vmatpush.bf16.msra.mxu0 %v5369_v2  ;;  %5395 = vmatpush.bf16.msra.mxu3 %v5369_v2  ;;  %v611_v16 = vpack.c.bf16 %v597_v15, %v596_v14  ;;  %v1434_v17 = vld [vmem:[%s5849_s0 + $0x10] sm:$0xff]  ;;  %v1435_v18 = vld [vmem:[%s5849_s0 + $0x18] sm:$0xff]  ;;  %v599_v24 = vld [vmem:[%s5840_s18 + $0x28] sm:$0xff]  ;;  %s5632_s3 = scalar_lea.hbm %s5631_s16, 1  ;;  %p5637_p0 = scmp.lt.s32.totalorder %s5631_s16, %s9816_s17 }
  0x26   : > { %5174 = vmatmul.msk.bf16.vlgmr.msra.gmra.mxu1 %vm1484_vm1, %v1448_v10  ;;  %v1449_v19 = vpack.c.bf16 %v1435_v18, %v1434_v17  ;;  %v1446_v20 = vld [vmem:[%s5849_s0 + $0x70] sm:$0xff]  ;;  %v1447_v21 = vld [vmem:[%s5849_s0 + $0x78] sm:$0xff]  ;;  %v612_v25 = vpack.c.bf16 %v599_v24, %v598_v23  ;;  %v1436_v26 = vld [vmem:[%s5849_s0 + $0x20] sm:$0xff]  ;;  %p5633_p11 = scmp.ne.s32.totalorder %s5631_s16, %s5632_s3 }
  0x27   : > { %v1455_v22 = vpack.c.bf16 %v1447_v21, %v1446_v20  ;;  %v1437_v27 = vld [vmem:[%s5849_s0 + $0x28] sm:$0xff]  ;;  %v600_v29 = vld [vmem:[%s5840_s18 + $0x30] sm:$0xff]  ;;  %v601_v30 = vld [vmem:[%s5840_s18 + $0x38] sm:$0xff] }
  0x28   : > { %5138 = vmatmul.msk.bf16.vlgmr.msra.gmra.mxu0 %vm638_vm0, %v610_v8  ;;  %5145 = vmatmul.msk.bf16.vlgmr.msra.gmra.mxu3 %vm638_vm0, %v617_v13  ;;  %v1450_v28 = vpack.c.bf16 %v1437_v27, %v1436_v26  ;;  %v613_v31 = vpack.c.bf16 %v601_v30, %v600_v29  ;;  %v1438_v32 = vld [vmem:[%s5849_s0 + $0x30] sm:$0xff]  ;;  %v1439_v33 = vld [vmem:[%s5849_s0 + $0x38] sm:$0xff]  ;;  %v602_v36 = vld [vmem:[%s5840_s18 + $0x40] sm:$0xff]  ;;  %p5634_p12 = pnand %p5633_p11, %p5811_p5 }
  0x29   : > { %5396 = vmatpush.bf16.msrb.mxu3 %v5377_v1  ;;  %v1451_v34 = vpack.c.bf16 %v1439_v33, %v1438_v32  ;;  %2561 = vmatpush.bf16.msrb.mxu0 %v5385_v35  ;;  %v603_v37 = vld [vmem:[%s5840_s18 + $0x48] sm:$0xff]  ;;  %v1440_v39 = vld [vmem:[%s5849_s0 + $0x40] sm:$0xff]  ;;  %v604_v44 = vld [vmem:[%s5840_s18 + $0x50] sm:$0xff] }
  0x2a   : > { %v614_v38 = vpack.c.bf16 %v603_v37, %v602_v36  ;;  %v1441_v40 = vld [vmem:[%s5849_s0 + $0x48] sm:$0xff]  ;;  %v605_v45 = vld [vmem:[%s5840_s18 + $0x58] sm:$0xff]  ;;  %v1442_v48 = vld [vmem:[%s5849_s0 + $0x50] sm:$0xff]  ;;  %p5635_p13 = pneg %p5634_p12 }
  0x2b   : > { %v1452_v41 = vpack.c.bf16 %v1441_v40, %v1440_v39  ;;  %v615_v47 = vpack.c.bf16 %v605_v45, %v604_v44  ;;  %v1443_v49 = vld [vmem:[%s5849_s0 + $0x58] sm:$0xff]  ;;  %v606_v51 = vld [vmem:[%s5840_s18 + $0x60] sm:$0xff]  ;;  %v607_v52 = vld [vmem:[%s5840_s18 + $0x68] sm:$0xff]  ;;  %s573_s18 = sand.u32 1, %s5670_s27  }
  0x2c   : > { %v1453_v50 = vpack.c.bf16 %v1443_v49, %v1442_v48  ;;  %v616_v53 = vpack.c.bf16 %v607_v52, %v606_v51  ;;  %v1444_v54 = vld [vmem:[%s5849_s0 + $0x60] sm:$0xff]  ;;  %v1445_v55 = vld [vmem:[%s5849_s0 + $0x68] sm:$0xff]  ;;  %s574_s19 = scalar_lea.vmem [#allocation3], %s573_s18  ;;  %s5029_s1 = scalar_lea.sflag [#allocation4], %s573_s18 }
  0x2d   : > { %5397 = vmatpush.bf16.msrb.mxu3 %v5376_v3  ;;  %2562 = vmatpush.bf16.msrb.mxu0 %v5384_v42  ;;  %v1454_v56 = vpack.c.bf16 %v1445_v55, %v1444_v54  ;;  %v2477_v63 = vld [vmem:[%s5915_s23 + $0x20] sm:$0xff]  ;;  %v2478_v0 = vld [vmem:[%s5915_s23 + $0x28] sm:$0xff]  ;;  %v2479_v54 = vld [vmem:[%s5915_s23 + $0x30] sm:$0xff]  ;;  %s5636_s0 = scalar_lea.hbm %s9816_s17, 2 }
  0x2e   : > { %v2491_v1 = vpack.c.bf16 %v2478_v0, %v2477_v63  ;;  %v5929_v3 = vld [vmem:[%s9805_s6] ss:$0 sm:$0xff]  ;;  %v2480_v55 = vld [vmem:[%s5915_s23 + $0x38] sm:$0xff]  ;;  %p5638_p1 = scmp.lt.s32.totalorder %s5636_s0, %s5632_s3 }
  0x30   : > { %p5639_p2 = por %p5638_p1, %p5637_p0 }
  0x31   : > { %5398 = vmatpush.bf16.msrb.mxu3 %v5375_v4  ;;  %2563 = vmatpush.bf16.msrb.mxu0 %v5383_v43  ;;  %v5934_v4 = vld [vmem:[%s9806_s7] ss:$0 sm:$0xff] }
  0x32   : > { %p5640_p3 = pnand %p5639_p2, %p5635_p13 }
  0x35   : > { %2564 = vmatpush.bf16.msrb.mxu0 %v5382_v46 }
  0x36   : > { %5175 = vmatmul.msk.bf16.gmra.mxu1 %vm1484_vm1, %v1449_v19 }
  0x38   : > { %5139 = vmatmul.msk.bf16.gmra.mxu0 %vm638_vm0, %v611_v16  ;;  %5181 = vmatmul.msk.bf16.vlgmr.msrb.gmra.mxu3 %vm1484_vm1, %v1455_v22 }
  0x46   : > { %5176 = vmatmul.msk.bf16.gmra.mxu1 %vm1484_vm1, %v1450_v28 }
  0x48   : > { %5140 = vmatmul.msk.bf16.gmra.mxu0 %vm638_vm0, %v612_v25 }
  0x56   : > { %5177 = vmatmul.msk.bf16.gmra.mxu1 %vm1484_vm1, %v1451_v34 }
  0x58   : > { %5141 = vmatmul.msk.bf16.gmra.mxu0 %vm638_vm0, %v613_v31 }
  0x66   : > { %5178 = vmatmul.msk.bf16.gmra.mxu1 %vm1484_vm1, %v1452_v41 }
  0x68   : > { %5142 = vmatmul.msk.bf16.gmra.mxu0 %vm638_vm0, %v614_v38 }
  0x76   : > { %5179 = vmatmul.msk.bf16.gmra.mxu1 %vm1484_vm1, %v1453_v50 }
  0x78   : > { %5143 = vmatmul.msk.bf16.gmra.mxu0 %vm638_vm0, %v615_v47 }
  0x86   : > { %5180 = vmatmul.msk.bf16.gmra.mxu1 %vm1484_vm1, %v1454_v56 }
  0x88   : > { %5144 = vmatmul.msk.bf16.gmra.mxu0 %vm638_vm0, %v616_v53 }
  0x98   : > { %5262 = vmatmul.msk.bf16.vlgmr.msrb.gmra.mxu0 %vm2302_vm2, %v2489_v59 }
  0xa3   : > { %v1518_v5 = vpop.f32.mrf.mxu1 }
  0xa4   : > { %v5940_v7 = vadd.f32 %v5934_v4, %v1518_v5 }
  0xa5   : > { %v672_v2 = vpop.f32.mrf.mxu0 }
  0xa6   : > { %v5937_v6 = vadd.f32 %v5929_v3, %v672_v2  ;;  %v5946_v10 = vmul.f32 0.70710677, %v5940_v7 }
  0xa8   : > { %5263 = vmatmul.msk.bf16.gmra.mxu0 %vm2302_vm2, %v2490_v62  ;;  %v5943_v9 = vmul.f32 0.70710677, %v5937_v6  ;;  %v1590_v13 = vmul.f32 %v5946_v10, %v5946_v10  ;;  %v2492_v62 = vpack.c.bf16 %v2480_v55, %v2479_v54 }
  0xaa   : > { %v744_v12 = vmul.f32 %v5943_v9, %v5943_v9  ;;  %v5960_v16 = vmin.f32 %v1590_v13, 16.0 }
  0xab   : > { %v1520_v18 = vpop.f32.mrf.mxu1 }
  0xac   : > { %v5958_v15 = vmin.f32 %v744_v12, 16.0  ;;  %v1603_v20 = vmul.f32 3.8918573e-05, %v5960_v16  ;;  %v5969_v22 = vadd.f32 %v5934_v4, %v1520_v18  ;;  %v1592_v44 = vmul.f32 2.1237322e-06, %v5960_v16 }
  0xad   : > { %v674_v8 = vpop.f32.mrf.mxu0 }
  0xae   : > { %v5949_v11 = vadd.f32 %v5929_v3, %v674_v8  ;;  %v757_v19 = vmul.f32 3.8918573e-05, %v5958_v15  ;;  %v1604_v24 = vadd.f32 0.001143296, %v1603_v20  ;;  %v5973_v26 = vmul.f32 0.70710677, %v5969_v22 }
  0xaf   : > { %v746_v32 = vmul.f32 2.1237322e-06, %v5958_v15  ;;  %v1593_v51 = vadd.f32 0.00028619796, %v1592_v44 }
  0xb0   : > { %v5956_v14 = vmul.f32 0.70710677, %v5949_v11  ;;  %v758_v23 = vadd.f32 0.001143296, %v757_v19  ;;  %v1605_v28 = vmul.f32 %v1604_v24, %v5960_v16  ;;  %v1630_v30 = vmul.f32 %v5973_v26, %v5973_v26 }
  0xb1   : > { %v747_v38 = vadd.f32 0.00028619796, %v746_v32  ;;  %v1594_v61 = vmul.f32 %v1593_v51, %v5960_v16 }
  0xb2   : > { %v784_v17 = vmul.f32 %v5956_v14, %v5956_v14  ;;  %v759_v27 = vmul.f32 %v758_v23, %v5958_v15  ;;  %v1606_v34 = vadd.f32 0.014752088, %v1605_v28  ;;  %v5981_v36 = vmin.f32 %v1630_v30, 16.0 }
  0xb3   : > { %v748_v45 = vmul.f32 %v747_v38, %v5958_v15  ;;  %v1523_v57 = vpop.f32.mrf.mxu1 }
  0xb4   : > { %v5966_v21 = vmin.f32 %v784_v17, 16.0  ;;  %v760_v33 = vadd.f32 0.014752088, %v759_v27  ;;  %v1607_v40 = vmul.f32 %v1606_v34, %v5960_v16  ;;  %v1643_v42 = vmul.f32 3.8918573e-05, %v5981_v36 }
  0xb5   : > { %v677_v31 = vpop.f32.mrf.mxu0  ;;  %v749_v52 = vadd.f32 0.0036580483, %v748_v45  ;;  %v1595_v17 = vadd.f32 0.0036580483, %v1594_v61 }
  0xb6   : > { %v797_v25 = vmul.f32 3.8918573e-05, %v5966_v21  ;;  %v5984_v37 = vadd.f32 %v5929_v3, %v677_v31  ;;  %v761_v39 = vmul.f32 %v760_v33, %v5958_v15  ;;  %v1608_v47 = vadd.f32 0.112945676, %v1607_v40 }
  0xb7   : > { %v1644_v49 = vadd.f32 0.001143296, %v1643_v42  ;;  %v750_v63 = vmul.f32 %v749_v52, %v5958_v15  ;;  %v786_v5 = vmul.f32 2.1237322e-06, %v5966_v21  ;;  %v1596_v31 = vmul.f32 %v1595_v17, %v5960_v16 }
  0xb8   : > { %5264 = vmatmul.msk.bf16.gmra.mxu0 %vm2302_vm2, %v2491_v1  ;;  %v798_v29 = vadd.f32 0.001143296, %v797_v25  ;;  %v5990_v43 = vmul.f32 0.70710677, %v5984_v37  ;;  %v762_v46 = vadd.f32 0.112945676, %v761_v39  ;;  %v1609_v56 = vmul.f32 %v1608_v47, %v5960_v16 }
  0xb9   : > { %v1645_v59 = vmul.f32 %v1644_v49, %v5981_v36  ;;  %v6007_v1 = vadd.f32 %v5934_v4, %v1523_v57  ;;  %v751_v18 = vadd.f32 0.05243302, %v750_v63  ;;  %v787_v24 = vadd.f32 0.00028619796, %v786_v5 }
  0xba   : > { %v799_v35 = vmul.f32 %v798_v29, %v5966_v21  ;;  %v824_v50 = vmul.f32 %v5990_v43, %v5990_v43  ;;  %v763_v53 = vmul.f32 %v762_v46, %v5958_v15  ;;  %v1610_v2 = vadd.f32 0.4994258, %v1609_v56 }
  0xbb   : > { %v1646_v12 = vadd.f32 0.014752088, %v1645_v59  ;;  %v6015_v20 = vmul.f32 0.70710677, %v6007_v1  ;;  %v1632_v25 = vmul.f32 2.1237322e-06, %v5981_v36  ;;  %v752_v32 = vmul.f32 %v751_v18, %v5958_v15  ;;  %v1525_v61 = vpop.f32.mrf.mxu1 }
  0xbc   : > { %v800_v41 = vadd.f32 0.014752088, %v799_v35  ;;  %v6002_v60 = vmin.f32 %v824_v50, 16.0  ;;  %v764_v0 = vadd.f32 0.4994258, %v763_v53  ;;  %v1611_v23 = vmul.f32 %v1610_v2, %v5960_v16 }
  0xbd   : > { %v679_v27 = vpop.f32.mrf.mxu0  ;;  %v1647_v29 = vmul.f32 %v1646_v12, %v5981_v36  ;;  %v1670_v34 = vmul.f32 %v6015_v20, %v6015_v20  ;;  %v788_v39 = vmul.f32 %v787_v24, %v5966_v21  ;;  %v1633_v40 = vadd.f32 0.00028619796, %v1632_v25 }
  0xbe   : > { %v801_v48 = vmul.f32 %v800_v41, %v5966_v21  ;;  %v837_v13 = vmul.f32 3.8918573e-05, %v6002_v60  ;;  %v765_v19 = vmul.f32 %v764_v0, %v5958_v15  ;;  %v6027_v35 = vadd.f32 %v5929_v3, %v679_v27 }
  0xbf   : > { %v6029_v38 = vadd.f32 1.0, %v1611_v23  ;;  %v1648_v42 = vadd.f32 0.112945676, %v1647_v29  ;;  %v1597_v45 = vadd.f32 0.05243302, %v1596_v31  ;;  %v6035_v47 = vmin.f32 %v1670_v34, 16.0 }
  0xc0   : > { %v802_v58 = vadd.f32 0.112945676, %v801_v48  ;;  %v838_v30 = vadd.f32 0.001143296, %v837_v13  ;;  %v6022_v33 = vadd.f32 1.0, %v765_v19  ;;  %v1634_v50 = vmul.f32 %v1633_v40, %v5981_v36 }
  0xc1   : > { %v753_v46 = vadd.f32 0.18741608, %v752_v32  ;;  %v6038_v48 = vmul.f32 0.70710677, %v6027_v35  ;;  %v789_v49 = vadd.f32 0.0036580483, %v788_v39  ;;  %v1649_v52 = vmul.f32 %v1648_v42, %v5981_v36 }
  0xc2   : > { %v803_v8 = vmul.f32 %v802_v58, %v5966_v21  ;;  %v839_v44 = vmul.f32 %v838_v30, %v6002_v60  ;;  %5447 = vrcp.f32 %v6022_v33  ;;  %v1598_v54 = vmul.f32 %v1597_v45, %v5960_v16 }
  0xc3   : > { %5449 = vrcp.f32 %v6029_v38  ;;  %v754_v55 = vmul.f32 %v753_v46, %v5958_v15  ;;  %v1683_v56 = vmul.f32 3.8918573e-05, %v6035_v47  ;;  %v864_v57 = vmul.f32 %v6038_v48, %v6038_v48 }
  0xc4   : > { %v804_v28 = vadd.f32 0.4994258, %v803_v8  ;;  %v840_v53 = vadd.f32 0.014752088, %v839_v44  ;;  %v790_v58 = vmul.f32 %v789_v49, %v5966_v21  ;;  %v1635_v59 = vadd.f32 0.0036580483, %v1634_v50 }
  0xc5   : > { %v1650_v63 = vadd.f32 0.4994258, %v1649_v52  ;;  %v1599_v5 = vadd.f32 0.18741608, %v1598_v54  ;;  %v755_v15 = vadd.f32 1.1283791, %v754_v55  ;;  %v6060_v13 = vadd.f32 %v5934_v4, %v1525_v61 }
  0xc6   : > { %v805_v41 = vmul.f32 %v804_v28, %v5966_v21  ;;  %v841_v0 = vmul.f32 %v840_v53, %v6002_v60  ;;  %v1684_v8 = vadd.f32 0.001143296, %v1683_v56  ;;  %v6057_v12 = vmin.f32 %v864_v57, 16.0 }
  0xc7   : > { %v6063_v17 = vmul.f32 0.5, %v5937_v6  ;;  %v791_v19 = vadd.f32 0.05243302, %v790_v58  ;;  %v1636_v23 = vmul.f32 %v1635_v59, %v5981_v36  ;;  %v6069_v24 = vmul.f32 0.5, %v5940_v7 }
  0xc8   : > { %5265 = vmatmul.msk.bf16.gmra.mxu0 %vm2302_vm2, %v2492_v62  ;;  %v6042_v51 = vadd.f32 1.0, %v805_v41  ;;  %v6051_v62 = vpop.eup %5447  ;;  %v1651_v27 = vmul.f32 %v1650_v63, %v5981_v36  ;;  %v842_v28 = vadd.f32 0.112945676, %v841_v0  ;;  %v1600_v29 = vmul.f32 %v1599_v5, %v5960_v16 }
  0xc9   : > { %v6055_v2 = vpop.eup %5449  ;;  %v768_v18 = vmul.f32 %v6051_v62, %v6022_v33  ;;  %v6076_v6 = vmul.f32 0.5, %v5949_v11  ;;  %v6079_v30 = vmul.f32 0.5, %v5969_v22  ;;  %v6082_v31 = vmul.f32 0.5, %v5984_v37  ;;  %v682_v37 = vpop.f32.mrf.mxu0 }
  0xca   : > { %5451 = vrcp.f32 %v6042_v51  ;;  %v1614_v25 = vmul.f32 %v6055_v2, %v6029_v38  ;;  %v6087_v7 = vmul.f32 %v755_v15, %v5943_v9  ;;  %v1685_v34 = vmul.f32 %v1684_v8, %v6035_v47 }
  0xcb   : > { %v877_v39 = vmul.f32 3.8918573e-05, %v6057_v12  ;;  %v6092_v16 = vmul.f32 0.70710677, %v6060_v13  ;;  %v769_v11 = vsub.f32 1.0, %v768_v18  ;;  %v778_v40 = vand.u32 2147483648, %v6022_v33 }
  0xcc   : > { %v792_v22 = vmul.f32 %v791_v19, %v5966_v21  ;;  %v1637_v41 = vadd.f32 0.05243302, %v1636_v23  ;;  %v1615_v42 = vsub.f32 1.0, %v1614_v25  ;;  %v6096_v44 = vadd.f32 1.0, %v1651_v27 }
  0xcd   : > { %v826_v9 = vmul.f32 2.1237322e-06, %v6002_v60  ;;  %v843_v45 = vmul.f32 %v842_v28, %v6002_v60  ;;  %vm772_vm3 = vweird.f32 %v6022_v33  ;;  %v776_v46 = vand.u32 2147483647, %v6022_v33 }
  0xce   : > { %v1601_v49 = vadd.f32 1.1283791, %v1600_v29  ;;  %v1686_v52 = vadd.f32 0.014752088, %v1685_v34  ;;  %v878_v53 = vadd.f32 0.001143296, %v877_v39  ;;  %v1710_v54 = vmul.f32 %v6092_v16, %v6092_v16 }
  0xcf   : > { %v6107_v55 = vadd.f32 %v5929_v3, %v682_v37  ;;  %v770_v56 = vmul.f32 %v6051_v62, %v769_v11  ;;  %v779_v57 = vor.u32 1.1754944e-38, %v778_v40  ;;  %v793_v58 = vadd.f32 0.18741608, %v792_v22 }
  0xd0   : > { %v6084_v32 = vpop.eup %5451  ;;  %v1638_v59 = vmul.f32 %v1637_v41, %v5981_v36  ;;  %v1616_v61 = vmul.f32 %v6055_v2, %v1615_v42  ;;  %5453 = vrcp.f32 %v6096_v44  ;;  %v827_v63 = vadd.f32 0.00028619796, %v826_v9 }
  0xd1   : > { %v808_v50 = vmul.f32 %v6084_v32, %v6042_v51  ;;  %v844_v0 = vadd.f32 0.4994258, %v843_v45  ;;  %v6114_v5 = vmul.f32 %v1601_v49, %v5946_v10  ;;  %v1622_v15 = vand.u32 2147483647, %v6029_v38 }
  0xd2   : > { %v1624_v8 = vand.u32 2147483648, %v6029_v38  ;;  %vm6118_vm4 = vcmp.eq.f32.partialorder %v776_v46, 8.507059e+37  ;;  %v1687_v23 = vmul.f32 %v1686_v52, %v6035_v47  ;;  %v879_v25 = vmul.f32 %v878_v53, %v6057_v12 }
  0xd3   : > { %v809_v18 = vsub.f32 1.0, %v808_v50  ;;  %v6124_v27 = vmin.f32 %v1710_v54, 16.0  ;;  %v6127_v28 = vmul.f32 0.70710677, %v6107_v55  ;;  %v771_v10 = vadd.f32 %v6051_v62, %v770_v56 }
  0xd4   : > { %vm773_vm5 = vweird.f32 %v6051_v62  ;;  %v794_v29 = vmul.f32 %v793_v58, %v5966_v21  ;;  %v1639_v34 = vadd.f32 0.18741608, %v1638_v59  ;;  %v1617_v39 = vadd.f32 %v6055_v2, %v1616_v61 }
  0xd5   : > { %vm1619_vm6 = vweird.f32 %v6055_v2  ;;  %v828_v11 = vmul.f32 %v827_v63, %v6002_v60  ;;  %v845_v40 = vmul.f32 %v844_v0, %v6002_v60  ;;  %vm1618_vm7 = vweird.f32 %v6029_v38  ;;  %vm6146_vm9 = vmor %vm772_vm3, %vm773_vm5  ;;  %v1528_v0 = vpop.f32.mrf.mxu1 }
  0xd6   : > { %vm6137_vm8 = vcmp.eq.f32.partialorder %v1622_v15, 8.507059e+37  ;;  %v1625_v41 = vor.u32 1.1754944e-38, %v1624_v8  ;;  %v810_v37 = vmul.f32 %v6084_v32, %v809_v18  ;;  %v6142_v42 = vpop.eup %5453  ;;  %v1688_v9 = vadd.f32 0.112945676, %v1687_v23  ;;  %vm6156_vm10 = vmor %vm1618_vm7, %vm1619_vm6 }
  0xd7   : > { %v880_v45 = vadd.f32 0.014752088, %v879_v25  ;;  %v1723_v46 = vmul.f32 3.8918573e-05, %v6124_v27  ;;  %v904_v38 = vmul.f32 %v6127_v28, %v6127_v28  ;;  %v775_v49 = vsel %vm6146_vm9, %v6051_v62, %v771_v10 }
  0xd8   : > { %v795_v33 = vadd.f32 1.1283791, %v794_v29  ;;  %v1640_v52 = vmul.f32 %v1639_v34, %v5981_v36  ;;  %v6162_v53 = vmul.f32 0.5, %v6007_v1  ;;  %v1621_v54 = vsel %vm6156_vm10, %v6055_v2, %v1617_v39 }
  0xd9   : > { %v829_v56 = vadd.f32 0.0036580483, %v828_v11  ;;  %v6167_v58 = vadd.f32 1.0, %v845_v40  ;;  %v1672_v59 = vmul.f32 2.1237322e-06, %v6035_v47  ;;  %v811_v62 = vadd.f32 %v6084_v32, %v810_v37 }
  0xda   : > { %vm812_vm11 = vweird.f32 %v6042_v51  ;;  %vm813_vm12 = vweird.f32 %v6084_v32  ;;  %v1654_v36 = vmul.f32 %v6142_v42, %v6096_v44  ;;  %v1689_v1 = vmul.f32 %v1688_v9, %v6035_v47 }
  0xdb   : > { %v881_v61 = vmul.f32 %v880_v45, %v6057_v12  ;;  %v1724_v63 = vadd.f32 0.001143296, %v1723_v46  ;;  %v6177_v2 = vmin.f32 %v904_v38, 16.0  ;;  %v780_v15 = vsel %vm6118_vm4, %v779_v57, %v775_v49  ;;  %vm6185_vm13 = vmor %vm812_vm11, %vm813_vm12 }
  0xdc   : > { %v1626_v8 = vsel %vm6137_vm8, %v1625_v41, %v1621_v54  ;;  %v816_v18 = vand.u32 2147483647, %v6042_v51  ;;  %v818_v23 = vand.u32 2147483648, %v6042_v51  ;;  %v830_v10 = vmul.f32 %v829_v56, %v6002_v60 }
  0xdd   : > { %5455 = vrcp.f32 %v6167_v58  ;;  %v1673_v29 = vadd.f32 0.00028619796, %v1672_v59  ;;  %v866_v34 = vmul.f32 2.1237322e-06, %v6057_v12  ;;  %v796_v57 = vmul.f32 %v795_v33, %v5956_v14 }
  0xde   : > { %v815_v19 = vsel %vm6185_vm13, %v6084_v32, %v811_v62  ;;  %v1655_v39 = vsub.f32 1.0, %v1654_v36  ;;  %v6197_v51 = vadd.f32 %v5934_v4, %v1528_v0  ;;  %v1690_v11 = vadd.f32 0.4994258, %v1689_v1 }
  0xdf   : > { %v882_v40 = vadd.f32 0.112945676, %v881_v61  ;;  %v1725_v22 = vmul.f32 %v1724_v63, %v6124_v27  ;;  %v917_v41 = vmul.f32 3.8918573e-05, %v6177_v2  ;;  %v781_v37 = vmul.f32 %v780_v15, %v6087_v7 }
  0xe0   : > { %v1627_v21 = vmul.f32 %v1626_v8, %v6114_v5  ;;  %v819_v9 = vor.u32 1.1754944e-38, %v818_v23  ;;  %v1641_v14 = vadd.f32 1.1283791, %v1640_v52  ;;  %vm817_vm14 = vcmp.eq.f32.partialorder %v816_v18, 8.507059e+37  ;;  %v5381_v23 = vld [vmem:[%s9809_s10 + $0x18] sm:$0xff] }
  0xe1   : > { %v831_v45 = vadd.f32 0.05243302, %v830_v10  ;;  %v1674_v32 = vmul.f32 %v1673_v29, %v6035_v47  ;;  %v867_v46 = vadd.f32 0.00028619796, %v866_v34  ;;  %v1656_v49 = vmul.f32 %v6142_v42, %v1655_v39  ;;  %2331 = vmatpush.bf16.msra.mxu2 %v5381_v23  ;;  %5399 = vmatpush.bf16.msra.mxu3 %v5381_v23 }
  0xe2   : > { %v820_v38 = vsel %vm817_vm14, %v819_v9, %v815_v19  ;;  %vm1658_vm15 = vweird.f32 %v6096_v44  ;;  %v6207_v50 = vmul.f32 0.70710677, %v6197_v51  ;;  %v1691_v7 = vmul.f32 %v1690_v11, %v6035_v47 }
  0xe3   : > { %v6209_v33 = vpop.eup %5455  ;;  %v883_v5 = vmul.f32 %v882_v40, %v6057_v12  ;;  %v1726_v52 = vadd.f32 0.014752088, %v1725_v22  ;;  %v918_v54 = vadd.f32 0.001143296, %v917_v41  ;;  %v5146_v56 = vclamps-f32 %v781_v37, 1.0 }
  0xe4   : > { %v5182_v59 = vclamps-f32 %v1627_v21, 1.0  ;;  %vm1659_vm0 = vweird.f32 %v6142_v42  ;;  %v1664_v62 = vand.u32 2147483648, %v6096_v44  ;;  %v821_v36 = vmul.f32 %v820_v38, %v796_v57 }
  0xe5   : > { %v832_v1 = vmul.f32 %v831_v45, %v6002_v60  ;;  %v1675_v61 = vadd.f32 0.0036580483, %v1674_v32  ;;  %v868_v63 = vmul.f32 %v867_v46, %v6057_v12  ;;  %v1657_v0 = vadd.f32 %v6142_v42, %v1656_v49  ;;  %vm6235_vm1 = vmor %vm1658_vm15, %vm1659_vm0 }
  0xe6   : > { %v848_v15 = vmul.f32 %v6209_v33, %v6167_v58  ;;  %v1712_v8 = vmul.f32 2.1237322e-06, %v6124_v27  ;;  %v1750_v18 = vmul.f32 %v6207_v50, %v6207_v50  ;;  %v6226_v25 = vadd.f32 1.0, %v1691_v7 }
  0xe7   : > { %v884_v10 = vadd.f32 0.4994258, %v883_v5  ;;  %v1727_v29 = vmul.f32 %v1726_v52, %v6124_v27  ;;  %v919_v34 = vmul.f32 %v918_v54, %v6177_v2  ;;  %v1384_v57 = vadd.f32 1.0, %v5146_v56 }
  0xe8   : > { %v2230_v19 = vadd.f32 1.0, %v5182_v59  ;;  %v1662_v39 = vand.u32 2147483647, %v6096_v44  ;;  %v1665_v11 = vor.u32 1.1754944e-38, %v1664_v62  ;;  %v5147_v40 = vclamps-f32 %v821_v36, 1.0  ;;  %v684_v62 = vpop.f32.mrf.mxu0 }
  0xe9   : > { %v833_v41 = vadd.f32 0.18741608, %v832_v1  ;;  %v1676_v37 = vmul.f32 %v1675_v61, %v6035_v47  ;;  %v869_v21 = vadd.f32 0.0036580483, %v868_v63  ;;  %v1661_v9 = vsel %vm6235_vm1, %v6142_v42, %v1657_v0  ;;  %v1530_v0 = vpop.f32.mrf.mxu1 }
  0xea   : > { %v849_v45 = vsub.f32 1.0, %v848_v15  ;;  %v1713_v32 = vadd.f32 0.00028619796, %v1712_v8  ;;  %v6243_v46 = vmin.f32 %v1750_v18, 16.0  ;;  %5457 = vrcp.f32 %v6226_v25  ;;  %v2481_v15 = vld [vmem:[%s5915_s23 + $0x40] sm:$0xff]  ;;  %v2482_v8 = vld [vmem:[%s5915_s23 + $0x48] sm:$0xff] }
  0xeb   : > { %v885_v44 = vmul.f32 %v884_v10, %v6057_v12  ;;  %v1728_v38 = vadd.f32 0.112945676, %v1727_v29  ;;  %v920_v49 = vadd.f32 0.014752088, %v919_v34  ;;  %v6248_v7 = vmul.f32 %v1384_v57, %v6063_v17 }
  0xec   : > { %v6251_v5 = vmul.f32 %v2230_v19, %v6069_v24  ;;  %v1642_v52 = vmul.f32 %v1641_v14, %v5973_v26  ;;  %vm1663_vm3 = vcmp.eq.f32.partialorder %v1662_v39, 8.507059e+37  ;;  %v1677_v54 = vadd.f32 0.05243302, %v1676_v37  ;;  %v5380_v26 = vld [vmem:[%s9809_s10 + $0x10] sm:$0xff] }
  0xed   : > { %9856 = vst [vmem:[#allocation9_spill] sm:$0xff] %v6248_v7  ;;  %v1666_v42 = vsel %vm1663_vm3, %v1665_v11, %v1661_v9  ;;  %v6255_v56 = vmul.f32 0.5, %v6027_v35  ;;  %v870_v59 = vmul.f32 %v869_v21, %v6057_v12  ;;  %v1385_v36 = vadd.f32 1.0, %v5147_v40  ;;  %2332 = vmatpush.bf16.msra.mxu2 %v5380_v26  ;;  %5400 = vmatpush.bf16.msra.mxu3 %v5380_v26 }
  0xee   : > { %v834_v17 = vmul.f32 %v833_v41, %v6002_v60  ;;  %v1714_v1 = vmul.f32 %v1713_v32, %v6124_v27  ;;  %v1763_v24 = vmul.f32 3.8918573e-05, %v6243_v46  ;;  %v850_v14 = vmul.f32 %v6209_v33, %v849_v45 }
  0xef   : > { %v6265_v61 = vadd.f32 1.0, %v885_v44  ;;  %v1729_v35 = vmul.f32 %v1728_v38, %v6124_v27  ;;  %v921_v63 = vmul.f32 %v920_v49, %v6177_v2  ;;  %v1667_v60 = vmul.f32 %v1666_v42, %v1642_v52 }
  0xf0   : > { %vm852_vm4 = vweird.f32 %v6167_v58  ;;  %v858_v18 = vand.u32 2147483648, %v6167_v58  ;;  %v6274_v23 = vadd.f32 %v5929_v3, %v684_v62  ;;  %v6276_v10 = vpop.eup %5457  ;;  %vm853_vm5 = vweird.f32 %v6209_v33 }
  0xf1   : > { %v1678_v29 = vmul.f32 %v1677_v54, %v6035_v47  ;;  %v871_v34 = vadd.f32 0.05243302, %v870_v59  ;;  %v906_v57 = vmul.f32 2.1237322e-06, %v6177_v2  ;;  %v1715_v19 = vadd.f32 0.0036580483, %v1714_v1  ;;  %vm6300_vm6 = vmor %vm852_vm4, %vm853_vm5 }
  0xf2   : > { %v1764_v39 = vadd.f32 0.001143296, %v1763_v24  ;;  %v6282_v11 = vadd.f32 %v5934_v4, %v1530_v0  ;;  %v2493_v40 = vpack.c.bf16 %v2482_v8, %v2481_v15  ;;  %v851_v22 = vadd.f32 %v6209_v33, %v850_v14 }
  0xf3   : > { %5459 = vrcp.f32 %v6265_v61  ;;  %v1730_v41 = vadd.f32 0.4994258, %v1729_v35  ;;  %v922_v37 = vadd.f32 0.112945676, %v921_v63  ;;  %v5183_v21 = vclamps-f32 %v1667_v60, 1.0 }
  0xf4   : > { %v835_v9 = vadd.f32 1.1283791, %v834_v17  ;;  %v1694_v45 = vmul.f32 %v6276_v10, %v6226_v25  ;;  %v6289_v32 = vmul.f32 0.70710677, %v6274_v23  ;;  %5266 = vmatmul.msk.bf16.gmra.mxu0 %vm2302_vm2, %v2493_v40  ;;  %v6293_v44 = vmul.f32 %v1385_v36, %v6076_v6 }
  0xf5   : > { %v856_v38 = vand.u32 2147483647, %v6167_v58  ;;  %v1679_v49 = vadd.f32 0.18741608, %v1678_v29  ;;  %v907_v52 = vadd.f32 0.00028619796, %v906_v57  ;;  %v1716_v59 = vmul.f32 %v1715_v19, %v6124_v27 }
  0xf6   : > { %9857 = vst [vmem:[#allocation10_spill] sm:$0xff] %v6293_v44  ;;  %v859_v54 = vor.u32 1.1754944e-38, %v858_v18  ;;  %v1765_v62 = vmul.f32 %v1764_v39, %v6243_v46  ;;  %v6307_v6 = vmul.f32 0.70710677, %v6282_v11  ;;  %v855_v36 = vsel %vm6300_vm6, %v6209_v33, %v851_v22 }
  0xf7   : > { %v872_v17 = vmul.f32 %v871_v34, %v6057_v12  ;;  %v1731_v58 = vmul.f32 %v1730_v41, %v6124_v27  ;;  %v923_v1 = vmul.f32 %v922_v37, %v6177_v2  ;;  %v2231_v24 = vadd.f32 1.0, %v5183_v21 }
  0xf8   : > { %v1695_v26 = vsub.f32 1.0, %v1694_v45  ;;  %v6316_v14 = vmul.f32 0.5, %v6060_v13  ;;  %v944_v35 = vmul.f32 %v6289_v32, %v6289_v32  ;;  %v836_v0 = vmul.f32 %v835_v9, %v5990_v43 }
  0xf9   : > { %v6320_v63 = vpop.eup %5459  ;;  %vm857_vm7 = vcmp.eq.f32.partialorder %v856_v38, 8.507059e+37  ;;  %v1680_v33 = vmul.f32 %v1679_v49, %v6035_v47  ;;  %v908_v15 = vmul.f32 %v907_v52, %v6177_v2  ;;  %v1717_v60 = vadd.f32 0.05243302, %v1716_v59 }
  0xfa   : > { %v860_v8 = vsel %vm857_vm7, %v859_v54, %v855_v36  ;;  %v1766_v18 = vadd.f32 0.014752088, %v1765_v62  ;;  %v1790_v29 = vmul.f32 %v6307_v6, %v6307_v6  ;;  %v873_v34 = vadd.f32 0.18741608, %v872_v17  ;;  %v5379_v62 = vld [vmem:[%s9809_s10 + $0x8] sm:$0xff] }
  0xfb   : > { %v6329_v57 = vadd.f32 1.0, %v1731_v58  ;;  %v924_v19 = vadd.f32 0.4994258, %v923_v1  ;;  %v6332_v43 = vmul.f32 %v2231_v24, %v6079_v30  ;;  %v1696_v47 = vmul.f32 %v6276_v10, %v1695_v26  ;;  %2333 = vmatpush.bf16.msra.mxu2 %v5379_v62  ;;  %5401 = vmatpush.bf16.msra.mxu3 %v5379_v62 }
  0xfc   : > { %v888_v39 = vmul.f32 %v6320_v63, %v6265_v61  ;;  %v6337_v40 = vmin.f32 %v944_v35, 16.0  ;;  %v861_v22 = vmul.f32 %v860_v8, %v836_v0  ;;  %v1681_v41 = vadd.f32 1.1283791, %v1680_v33  ;;  %v687_v35 = vpop.f32.mrf.mxu0 }
  0xfd   : > { %v1702_v37 = vand.u32 2147483647, %v6226_v25  ;;  %v909_v21 = vadd.f32 0.0036580483, %v908_v15  ;;  %v1718_v9 = vmul.f32 %v1717_v60, %v6124_v27  ;;  %v6342_v45 = vmul.f32 0.5, %v6107_v55 }
  0xfe   : > { %v1767_v30 = vmul.f32 %v1766_v18, %v6243_v46  ;;  %v6345_v38 = vmin.f32 %v1790_v29, 16.0  ;;  %v1704_v49 = vand.u32 2147483648, %v6226_v25  ;;  %v874_v52 = vmul.f32 %v873_v34, %v6057_v12 }
  0xff   : > { %5461 = vrcp.f32 %v6329_v57  ;;  %v925_v42 = vmul.f32 %v924_v19, %v6177_v2  ;;  %v1697_v54 = vadd.f32 %v6276_v10, %v1696_v47  ;;  %vm1699_vm8 = vweird.f32 %v6276_v10 }
 0x100   : > { %v889_v59 = vsub.f32 1.0, %v888_v39  ;;  %v957_v55 = vmul.f32 3.8918573e-05, %v6337_v40  ;;  %v5148_v36 = vclamps-f32 %v861_v22, 1.0  ;;  %v1682_v17 = vmul.f32 %v1681_v41, %v6015_v20 }
 0x101   : > { %vm6358_vm9 = vcmp.eq.f32.partialorder %v1702_v37, 8.507059e+37  ;;  %v910_v58 = vmul.f32 %v909_v21, %v6177_v2  ;;  %vm1698_vm10 = vweird.f32 %v6226_v25  ;;  %v1719_v1 = vadd.f32 0.18741608, %v1718_v9 }
 0x102   : > { %v1768_v24 = vadd.f32 0.112945676, %v1767_v30  ;;  %v1803_v26 = vmul.f32 3.8918573e-05, %v6345_v38  ;;  %vm6367_vm11 = vmor %vm1698_vm10, %vm1699_vm8  ;;  %v1705_v20 = vor.u32 1.1754944e-38, %v1704_v49  ;;  %v6371_v15 = vadd.f32 1.0, %v925_v42 }
 0x103   : > { %v875_v33 = vadd.f32 1.1283791, %v874_v52  ;;  %v1752_v8 = vmul.f32 2.1237322e-06, %v6243_v46  ;;  %v1701_v25 = vsel %vm6367_vm11, %v6276_v10, %v1697_v54  ;;  %v890_v60 = vmul.f32 %v6320_v63, %v889_v59 }
 0x104   : > { %v6379_v18 = vmul.f32 0.5, %v6197_v51  ;;  %v958_v29 = vadd.f32 0.001143296, %v957_v55  ;;  %v1386_v19 = vadd.f32 1.0, %v5148_v36  ;;  %v896_v47 = vand.u32 2147483647, %v6265_v61 }
 0x105   : > { %v6381_v34 = vpop.eup %5461  ;;  %v911_v39 = vadd.f32 0.05243302, %v910_v58  ;;  %v6385_v22 = vadd.f32 %v5929_v3, %v687_v35  ;;  %v898_v41 = vand.u32 2147483648, %v6265_v61  ;;  %v1720_v37 = vmul.f32 %v1719_v1, %v6124_v27  ;;  %v1533_v58 = vpop.f32.mrf.mxu1 }
 0x106   : > { %v1769_v10 = vmul.f32 %v1768_v24, %v6243_v46  ;;  %v1804_v21 = vadd.f32 0.001143296, %v1803_v26  ;;  %v1706_v51 = vsel %vm6358_vm9, %v1705_v20, %v1701_v25  ;;  %vm893_vm12 = vweird.f32 %v6320_v63 }
 0x107   : > { %5463 = vrcp.f32 %v6371_v15  ;;  %v1753_v9 = vadd.f32 0.00028619796, %v1752_v8  ;;  %v891_v30 = vadd.f32 %v6320_v63, %v890_v60  ;;  %v1734_v49 = vmul.f32 %v6381_v34, %v6329_v57 }
 0x108   : > { %v946_v52 = vmul.f32 2.1237322e-06, %v6337_v40  ;;  %v959_v27 = vmul.f32 %v958_v29, %v6337_v40  ;;  %v876_v42 = vmul.f32 %v875_v33, %v6038_v48  ;;  %vm892_vm13 = vweird.f32 %v6265_v61 }
 0x109   : > { %v912_v54 = vmul.f32 %v911_v39, %v6177_v2  ;;  %v6403_v59 = vmul.f32 0.70710677, %v6385_v22  ;;  %v1707_v55 = vmul.f32 %v1706_v51, %v1682_v17  ;;  %v1721_v62 = vadd.f32 1.1283791, %v1720_v37  ;;  %vm6411_vm14 = vmor %vm892_vm13, %vm893_vm12  ;;  %v5378_v51 = vld [vmem:[%s9809_s10] sm:$0xff] }
 0x10a   : > { %v1770_v36 = vadd.f32 0.4994258, %v1769_v10  ;;  %v1805_v12 = vmul.f32 %v1804_v21, %v6345_v38  ;;  %v6407_v1 = vmul.f32 %v1386_v19, %v6082_v31  ;;  %vm6415_vm15 = vcmp.eq.f32.partialorder %v896_v47, 8.507059e+37  ;;  %2334 = vmatpush.bf16.msra.mxu2 %v5378_v51  ;;  %5402 = vmatpush.bf16.msra.mxu3 %v5378_v51 }
 0x10b   : > { %v899_v24 = vor.u32 1.1754944e-38, %v898_v41  ;;  %v1754_v17 = vmul.f32 %v1753_v9, %v6243_v46  ;;  %v895_v26 = vsel %vm6411_vm14, %v6320_v63, %v891_v30  ;;  %v1735_v35 = vsub.f32 1.0, %v1734_v49  ;;  %v707_v49 = vpop.f32.mrf.mxu3 }
 0x10c   : > { %9864 = vst [vmem:[#allocation11_spill] sm:$0xff] %v6407_v1  ;;  %v947_v31 = vadd.f32 0.00028619796, %v946_v52  ;;  %v960_v0 = vadd.f32 0.014752088, %v959_v27  ;;  %v6426_v8 = vmul.f32 0.5, %v6274_v23  ;;  %v984_v25 = vmul.f32 %v6403_v59, %v6403_v59 }
 0x10d   : > { %v6423_v20 = vpop.eup %5463  ;;  %v913_v33 = vadd.f32 0.18741608, %v912_v54  ;;  %v6431_v60 = vadd.f32 %v5934_v4, %v1533_v58  ;;  %v5184_v29 = vclamps-f32 %v1707_v55, 1.0  ;;  %v6434_v19 = vmul.f32 %v1721_v62, %v6092_v16 }
 0x10e   : > { %9869 = vst [vmem:[#allocation12_spill] sm:$0xff] %v6426_v8  ;;  %v1771_v63 = vmul.f32 %v1770_v36, %v6243_v46  ;;  %v1806_v47 = vadd.f32 0.014752088, %v1805_v12  ;;  %v900_v39 = vsel %vm6415_vm15, %v899_v24, %v895_v26  ;;  %vm1738_vm0 = vweird.f32 %v6329_v57 }
 0x10f   : > { %v1742_v23 = vand.u32 2147483647, %v6329_v57  ;;  %v1755_v41 = vadd.f32 0.0036580483, %v1754_v17  ;;  %v1736_v37 = vmul.f32 %v6381_v34, %v1735_v35  ;;  %v928_v10 = vmul.f32 %v6423_v20, %v6371_v15 }
 0x110   : > { %v948_v21 = vmul.f32 %v947_v31, %v6337_v40  ;;  %v961_v16 = vmul.f32 %v960_v0, %v6337_v40  ;;  %v1744_v9 = vand.u32 2147483648, %v6329_v57  ;;  %v914_v30 = vmul.f32 %v913_v33, %v6177_v2 }
 0x111   : > { %v6451_v52 = vmin.f32 %v984_v25, 16.0  ;;  %v6454_v27 = vmul.f32 0.70710677, %v6431_v60  ;;  %v2232_v54 = vadd.f32 1.0, %v5184_v29  ;;  %v6456_v55 = vadd.f32 1.0, %v1771_v63  ;;  %v689_v29 = vpop.f32.mrf.mxu0 }
 0x112   : > { %v1807_v62 = vmul.f32 %v1806_v47, %v6345_v38  ;;  %v6460_v36 = vadd.f32 %v5929_v3, %v707_v49  ;;  %v901_v12 = vmul.f32 %v900_v39, %v876_v42  ;;  %vm1739_vm1 = vweird.f32 %v6381_v34 }
 0x113   : > { %v1756_v2 = vmul.f32 %v1755_v41, %v6243_v46  ;;  %v1792_v58 = vmul.f32 2.1237322e-06, %v6345_v38  ;;  %v1737_v48 = vadd.f32 %v6381_v34, %v1736_v37  ;;  %v929_v61 = vsub.f32 1.0, %v928_v10  ;;  %vm6484_vm4 = vmor %vm1738_vm0, %vm1739_vm1 }
 0x114   : > { %9870 = vst [vmem:[#allocation13_spill] sm:$0xff] %v6460_v36  ;;  %v949_v24 = vadd.f32 0.0036580483, %v948_v21  ;;  %v962_v17 = vadd.f32 0.112945676, %v961_v16  ;;  %vm6466_vm3 = vcmp.eq.f32.partialorder %v1742_v23, 8.507059e+37  ;;  %v1830_v42 = vmul.f32 %v6454_v27, %v6454_v27 }
 0x115   : > { %v915_v35 = vadd.f32 1.1283791, %v914_v30  ;;  %v997_v31 = vmul.f32 3.8918573e-05, %v6451_v52  ;;  %v1745_v0 = vor.u32 1.1754944e-38, %v1744_v9  ;;  %5465 = vrcp.f32 %v6456_v55 }
 0x116   : > { %v1808_v33 = vadd.f32 0.112945676, %v1807_v62  ;;  %v6475_v25 = vmul.f32 0.70710677, %v6460_v36  ;;  %v6478_v63 = vmul.f32 %v2232_v54, %v6162_v53  ;;  %v5149_v47 = vclamps-f32 %v901_v12, 1.0 }
 0x117   : > { %v1757_v23 = vadd.f32 0.05243302, %v1756_v2  ;;  %v1793_v41 = vadd.f32 0.00028619796, %v1792_v58  ;;  %v1741_v37 = vsel %vm6484_vm4, %v6381_v34, %v1737_v48  ;;  %v930_v10 = vmul.f32 %v6423_v20, %v929_v61  ;;  %v1535_v61 = vpop.f32.mrf.mxu1 }
 0x118   : > { %9873 = vst [vmem:[#allocation14_spill] sm:$0xff] %v6475_v25  ;;  %v950_v53 = vmul.f32 %v949_v24, %v6337_v40  ;;  %v963_v21 = vmul.f32 %v962_v17, %v6337_v40  ;;  %v6495_v16 = vmul.f32 %v915_v35, %v6127_v28  ;;  %v998_v57 = vadd.f32 0.001143296, %v997_v31 }
 0x119   : > { %v6497_v51 = vmin.f32 %v1830_v42, 16.0  ;;  %v6500_v9 = vadd.f32 %v5929_v3, %v689_v29  ;;  %vm932_vm5 = vweird.f32 %v6371_v15  ;;  %v936_v30 = vand.u32 2147483647, %v6371_v15 }
 0x11a   : > { %v1809_v34 = vmul.f32 %v1808_v33, %v6345_v38  ;;  %v1304_v49 = vmul.f32 %v6475_v25, %v6475_v25  ;;  %v1746_v54 = vsel %vm6466_vm3, %v1745_v0, %v1741_v37  ;;  %v938_v28 = vand.u32 2147483648, %v6371_v15 }
 0x11b   : > { %v1758_v62 = vmul.f32 %v1757_v23, %v6243_v46  ;;  %v1794_v12 = vmul.f32 %v1793_v41, %v6345_v38  ;;  %v6512_v3 = vpop.eup %5465  ;;  %v931_v2 = vadd.f32 %v6423_v20, %v930_v10  ;;  %vm933_vm6 = vweird.f32 %v6423_v20 }
 0x11c   : > { %v951_v58 = vadd.f32 0.05243302, %v950_v53  ;;  %v964_v48 = vadd.f32 0.4994258, %v963_v21  ;;  %v1387_v24 = vadd.f32 1.0, %v5149_v47  ;;  %v999_v17 = vmul.f32 %v998_v57, %v6451_v52  ;;  %vm6530_vm8 = vmor %vm932_vm5, %vm933_vm6 }
 0x11d   : > { %v1843_v26 = vmul.f32 3.8918573e-05, %v6497_v51  ;;  %v6519_v35 = vmul.f32 0.70710677, %v6500_v9  ;;  %v1747_v31 = vmul.f32 %v1746_v54, %v6434_v19  ;;  %vm6522_vm7 = vcmp.eq.f32.partialorder %v936_v30, 8.507059e+37 }
 0x11e   : > { %v1810_v0 = vadd.f32 0.4994258, %v1809_v34  ;;  %v6526_v33 = vmin.f32 %v1304_v49, 16.0  ;;  %v1759_v47 = vadd.f32 0.18741608, %v1758_v62  ;;  %v1774_v39 = vmul.f32 %v6512_v3, %v6456_v55 }
 0x11f   : > { %v1795_v23 = vadd.f32 0.0036580483, %v1794_v12  ;;  %v6537_v19 = vadd.f32 %v5934_v4, %v1535_v61  ;;  %v935_v41 = vsel %vm6530_vm8, %v6423_v20, %v931_v2  ;;  %v939_v37 = vor.u32 1.1754944e-38, %v938_v28 }
 0x120   : > { %v952_v10 = vmul.f32 %v951_v58, %v6337_v40  ;;  %v965_v15 = vmul.f32 %v964_v48, %v6337_v40  ;;  %v1306_v53 = vmul.f32 2.1237322e-06, %v6526_v33  ;;  %v1000_v21 = vadd.f32 0.014752088, %v999_v17 }
 0x121   : > { %v1844_v57 = vadd.f32 0.001143296, %v1843_v26  ;;  %v1024_v30 = vmul.f32 %v6519_v35, %v6519_v35  ;;  %v5185_v34 = vclamps-f32 %v1747_v31, 1.0  ;;  %v6548_v4 = vmul.f32 0.5, %v6282_v11 }
 0x122   : > { %v1811_v49 = vmul.f32 %v1810_v0, %v6345_v38  ;;  %v1317_v20 = vmul.f32 3.8918573e-05, %v6526_v33  ;;  %v1760_v54 = vmul.f32 %v1759_v47, %v6243_v46  ;;  %v1775_v28 = vsub.f32 1.0, %v1774_v39  ;;  %v2483_v47 = vld [vmem:[%s5915_s23 + $0x50] sm:$0xff]  ;;  %v2484_v39 = vld [vmem:[%s5915_s23 + $0x58] sm:$0xff] }
 0x123   : > { %v1796_v62 = vmul.f32 %v1795_v23, %v6345_v38  ;;  %v6555_v12 = vmul.f32 0.70710677, %v6537_v19  ;;  %v940_v2 = vsel %vm6522_vm7, %v939_v37, %v935_v41  ;;  %v953_v58 = vadd.f32 0.18741608, %v952_v10 }
 0x124   : > { %v6559_v11 = vadd.f32 1.0, %v965_v15  ;;  %v986_v48 = vmul.f32 2.1237322e-06, %v6451_v52  ;;  %v1307_v61 = vadd.f32 0.00028619796, %v1306_v53  ;;  %v1001_v17 = vmul.f32 %v1000_v21, %v6451_v52 }
 0x125   : > { %v1845_v46 = vmul.f32 %v1844_v57, %v6497_v51  ;;  %v6564_v26 = vmin.f32 %v1024_v30, 16.0  ;;  %v6567_v31 = vmul.f32 %v1387_v24, %v6255_v56  ;;  %v2233_v0 = vadd.f32 1.0, %v5185_v34 }
 0x126   : > { %v6569_v29 = vadd.f32 1.0, %v1811_v49  ;;  %v1318_v42 = vadd.f32 0.001143296, %v1317_v20  ;;  %v1761_v23 = vadd.f32 1.1283791, %v1760_v54  ;;  %v1776_v41 = vmul.f32 %v6512_v3, %v1775_v28 }
 0x127   : > { %9880 = vst [vmem:[#allocation15_spill] sm:$0xff] %v6567_v31  ;;  %v1797_v37 = vadd.f32 0.05243302, %v1796_v62  ;;  %v1870_v10 = vmul.f32 %v6555_v12, %v6555_v12  ;;  %v941_v15 = vmul.f32 %v940_v2, %v6495_v16  ;;  %v954_v53 = vmul.f32 %v953_v58, %v6337_v40 }
 0x128   : > { %5467 = vrcp.f32 %v6559_v11  ;;  %v987_v56 = vadd.f32 0.00028619796, %v986_v48  ;;  %v1002_v24 = vadd.f32 0.112945676, %v1001_v17  ;;  %v1846_v21 = vadd.f32 0.014752088, %v1845_v46  ;;  %v709_v17 = vpop.f32.mrf.mxu3 }
 0x129   : > { %v1037_v57 = vmul.f32 3.8918573e-05, %v6564_v26  ;;  %v2494_v30 = vpack.c.bf16 %v2484_v39, %v2483_v47  ;;  %vm1778_vm9 = vweird.f32 %v6456_v55  ;;  %5469 = vrcp.f32 %v6569_v29 }
 0x12a   : > { %v1308_v34 = vmul.f32 %v1307_v61, %v6526_v33  ;;  %v1319_v49 = vmul.f32 %v1318_v42, %v6526_v33  ;;  %v1777_v16 = vadd.f32 %v6512_v3, %v1776_v41  ;;  %vm1779_vm10 = vweird.f32 %v6512_v3 }
 0x12b   : > { %v1798_v40 = vmul.f32 %v1797_v37, %v6345_v38  ;;  %v6587_v20 = vmin.f32 %v1870_v10, 16.0  ;;  %5267 = vmatmul.msk.bf16.gmra.mxu0 %vm2302_vm2, %v2494_v30  ;;  %v5150_v54 = vclamps-f32 %v941_v15, 1.0  ;;  %v1782_v28 = vand.u32 2147483647, %v6456_v55  ;;  %vm6604_vm11 = vmor %vm1778_vm9, %vm1779_vm10 }
 0x12c   : > { %v1784_v62 = vand.u32 2147483648, %v6456_v55  ;;  %v955_v2 = vadd.f32 1.1283791, %v954_v53  ;;  %v988_v58 = vmul.f32 %v987_v56, %v6451_v52  ;;  %v1003_v48 = vmul.f32 %v1002_v24, %v6451_v52 }
 0x12d   : > { %v1847_v61 = vmul.f32 %v1846_v21, %v6497_v51  ;;  %v1038_v46 = vadd.f32 0.001143296, %v1037_v57  ;;  %v6598_v47 = vmul.f32 %v2233_v0, %v6316_v14  ;;  %v1309_v41 = vadd.f32 0.0036580483, %v1308_v34 }
 0x12e   : > { %v6595_v42 = vpop.eup %5467  ;;  %v1320_v37 = vadd.f32 0.014752088, %v1319_v49  ;;  %v6609_v10 = vmul.f32 0.5, %v6385_v22  ;;  %v1762_v15 = vmul.f32 %v1761_v23, %v6207_v50  ;;  %v1781_v14 = vsel %vm6604_vm11, %v6512_v3, %v1777_v16 }
 0x12f   : > { %v1799_v0 = vadd.f32 0.18741608, %v1798_v40  ;;  %v1883_v53 = vmul.f32 3.8918573e-05, %v6587_v20  ;;  %v6616_v56 = vpop.eup %5469  ;;  %v1388_v55 = vadd.f32 1.0, %v5150_v54  ;;  %vm1783_vm12 = vcmp.eq.f32.partialorder %v1782_v28, 8.507059e+37 }
 0x130   : > { %v1785_v24 = vor.u32 1.1754944e-38, %v1784_v62  ;;  %v6619_v21 = vmul.f32 %v955_v2, %v6289_v32  ;;  %v989_v57 = vadd.f32 0.0036580483, %v988_v58  ;;  %v1004_v22 = vadd.f32 0.4994258, %v1003_v48  ;;  %v1553_v13 = vpop.f32.mrf.mxu3 }
 0x131   : > { %v1848_v30 = vadd.f32 0.112945676, %v1847_v61  ;;  %v1039_v50 = vmul.f32 %v1038_v46, %v6564_v26  ;;  %v978_v34 = vand.u32 2147483648, %v6559_v11  ;;  %v1310_v3 = vmul.f32 %v1309_v41, %v6526_v33  ;;  %v6638_v58 = vld [vmem:[%s9805_s6] ss:$0 sm:$0xff] }
 0x132   : > { %v1786_v23 = vsel %vm1783_vm12, %v1785_v24, %v1781_v14  ;;  %v1321_v49 = vmul.f32 %v1320_v37, %v6526_v33  ;;  %v968_v16 = vmul.f32 %v6595_v42, %v6559_v11  ;;  %v1800_v40 = vmul.f32 %v1799_v0, %v6345_v38 }
 0x133   : > { %v1814_v32 = vmul.f32 %v6616_v56, %v6569_v29  ;;  %v1884_v54 = vadd.f32 0.001143296, %v1883_v53  ;;  %v6631_v28 = vmul.f32 %v1388_v55, %v6342_v45  ;;  %v976_v62 = vand.u32 2147483647, %v6559_v11 }
 0x134   : > { %v1832_v2 = vmul.f32 2.1237322e-06, %v6497_v51  ;;  %v6641_v48 = vadd.f32 %v6638_v58, %v709_v17  ;;  %v990_v38 = vmul.f32 %v989_v57, %v6451_v52  ;;  %v1005_v61 = vmul.f32 %v1004_v22, %v6451_v52  ;;  %v692_v17 = vpop.f32.mrf.mxu0 }
 0x135   : > { %9883 = vst [vmem:[#allocation16_spill] sm:$0xff] %v6631_v28  ;;  %v1849_v46 = vmul.f32 %v1848_v30, %v6497_v51  ;;  %v1040_v45 = vadd.f32 0.014752088, %v1039_v50  ;;  %v1787_v39 = vmul.f32 %v1786_v23, %v1762_v15  ;;  %v6646_v41 = vor.u32 1.1754944e-38, %v978_v34  ;;  %v6658_v15 = vld [vmem:[%s9806_s7] ss:$0 sm:$0xff] }
 0x136   : > { %9884 = vst [vmem:[#allocation17_spill] sm:$0xff] %v6641_v48  ;;  %v1311_v37 = vadd.f32 0.05243302, %v1310_v3  ;;  %v1322_v14 = vadd.f32 0.112945676, %v1321_v49  ;;  %v969_v0 = vsub.f32 1.0, %v968_v16  ;;  %v1885_v24 = vmul.f32 %v1884_v54, %v6587_v20 }
 0x137   : > { %v1801_v53 = vadd.f32 1.1283791, %v1800_v40  ;;  %v1815_v55 = vsub.f32 1.0, %v1814_v32  ;;  %v6650_v36 = vmul.f32 0.5, %v6431_v60  ;;  %v1833_v57 = vadd.f32 0.00028619796, %v1832_v2 }
 0x138   : > { %v6653_v22 = vmul.f32 0.70710677, %v6641_v48  ;;  %v6661_v30 = vadd.f32 %v6658_v15, %v1553_v13  ;;  %vm973_vm13 = vweird.f32 %v6595_v42  ;;  %v991_v50 = vadd.f32 0.05243302, %v990_v38 }
 0x139   : > { %v6664_v23 = vadd.f32 1.0, %v1005_v61  ;;  %v1850_v34 = vadd.f32 0.4994258, %v1849_v46  ;;  %v1041_v60 = vmul.f32 %v1040_v45, %v6564_v26  ;;  %v5186_v3 = vclamps-f32 %v1787_v39, 1.0 }
 0x13a   : > { %9885 = vst [vmem:[#allocation18_spill] sm:$0xff] %v6653_v22  ;;  %v1312_v49 = vmul.f32 %v1311_v37, %v6526_v33  ;;  %v1323_v16 = vmul.f32 %v1322_v14, %v6526_v33  ;;  %v6670_v40 = vadd.f32 %v6638_v58, %v692_v17  ;;  %v970_v32 = vmul.f32 %v6595_v42, %v969_v0 }
 0x13b   : > { %vm972_vm14 = vweird.f32 %v6559_v11  ;;  %v1816_v13 = vmul.f32 %v6616_v56, %v1815_v55  ;;  %v1886_v54 = vadd.f32 0.014752088, %v1885_v24  ;;  %v2262_v2 = vpack.c.bf16 %v6332_v43, %v6251_v5 }
 0x13c   : > { %v1802_v38 = vmul.f32 %v1801_v53, %v6307_v6  ;;  %v1834_v61 = vmul.f32 %v1833_v57, %v6497_v51  ;;  %v1344_v46 = vmul.f32 %v6653_v22, %v6653_v22  ;;  %v6682_v45 = vmul.f32 0.70710677, %v6661_v30  ;;  %vm6732_vm5 = vmor %vm972_vm14, %vm973_vm13 }
 0x13d   : > { %v992_v39 = vmul.f32 %v991_v50, %v6451_v52  ;;  %5471 = vrcp.f32 %v6664_v23  ;;  %v1851_v37 = vmul.f32 %v1850_v34, %v6497_v51  ;;  %v1042_v14 = vadd.f32 0.112945676, %v1041_v60  ;;  %5214 = vmatmul.msk.bf16.vlgmr.msra.gmra.mxu2 %vm2302_vm2, %v2262_v2 }
 0x13e   : > { %vm1818_vm15 = vweird.f32 %v6569_v29  ;;  %v1822_v5 = vand.u32 2147483647, %v6569_v29  ;;  %v1324_v6 = vadd.f32 0.4994258, %v1323_v16  ;;  %v6691_v43 = vmul.f32 0.70710677, %v6670_v40 }
 0x13f   : > { %vm6693_vm0 = vcmp.eq.f32.partialorder %v976_v62, 8.507059e+37  ;;  %v1817_v53 = vadd.f32 %v6616_v56, %v1816_v13  ;;  %vm1819_vm1 = vweird.f32 %v6616_v56  ;;  %v1026_v55 = vmul.f32 2.1237322e-06, %v6564_v26 }
 0x140   : > { %v1887_v24 = vmul.f32 %v1886_v54, %v6587_v20  ;;  %v1824_v17 = vand.u32 2147483648, %v6569_v29  ;;  %v1835_v57 = vadd.f32 0.0036580483, %v1834_v61  ;;  %v6702_v50 = vmin.f32 %v1344_v46, 16.0  ;;  %vm6712_vm3 = vmor %vm1818_vm15, %vm1819_vm1 }
 0x141   : > { %v2150_v34 = vmul.f32 %v6682_v45, %v6682_v45  ;;  %v971_v62 = vadd.f32 %v6595_v42, %v970_v32  ;;  %v993_v60 = vadd.f32 0.18741608, %v992_v39  ;;  %v6707_v16 = vadd.f32 1.0, %v1851_v37 }
 0x142   : > { %9888 = vst [vmem:[#allocation19_spill] sm:$0xff] %v6702_v50  ;;  %v1043_v13 = vmul.f32 %v1042_v14, %v6564_v26  ;;  %v2234_v2 = vadd.f32 1.0, %v5186_v3  ;;  %vm6716_vm4 = vcmp.eq.f32.partialorder %v1822_v5, 8.507059e+37  ;;  %v1313_v46 = vadd.f32 0.18741608, %v1312_v49 }
 0x143   : > { %v1064_v32 = vmul.f32 %v6691_v43, %v6691_v43  ;;  %v6722_v39 = vpop.eup %5471  ;;  %v1821_v3 = vsel %vm6712_vm3, %v6616_v56, %v1817_v53  ;;  %v1325_v29 = vmul.f32 %v1324_v6, %v6526_v33  ;;  %v1027_v37 = vadd.f32 0.00028619796, %v1026_v55  ;;  %v1538_v56 = vpop.f32.mrf.mxu1 }
 0x144   : > { %v1888_v14 = vadd.f32 0.112945676, %v1887_v24  ;;  %v1825_v49 = vor.u32 1.1754944e-38, %v1824_v17  ;;  %v1836_v48 = vmul.f32 %v1835_v57, %v6497_v51  ;;  %v1357_v22 = vmul.f32 3.8918573e-05, %v6702_v50 }
 0x145   : > { %v6738_v28 = vmin.f32 %v2150_v34, 16.0  ;;  %v975_v6 = vsel %vm6732_vm5, %v6595_v42, %v971_v62  ;;  %v994_v53 = vmul.f32 %v993_v60, %v6451_v52  ;;  %5473 = vrcp.f32 %v6707_v16 }
 0x146   : > { %v1044_v11 = vadd.f32 0.4994258, %v1043_v13  ;;  %v6746_v55 = vmul.f32 %v2234_v2, %v6379_v18  ;;  %v1826_v24 = vsel %vm6716_vm4, %v1825_v49, %v1821_v3  ;;  %v1008_v17 = vmul.f32 %v6722_v39, %v6664_v23 }
 0x147   : > { %v6752_v57 = vmin.f32 %v1064_v32, 16.0  ;;  %v6754_v34 = vadd.f32 1.0, %v1325_v29  ;;  %v1028_v42 = vmul.f32 %v1027_v37, %v6564_v26  ;;  %v1889_v52 = vmul.f32 %v1888_v14, %v6587_v20 }
 0x148   : > { %v6759_v62 = vadd.f32 %v6658_v15, %v1538_v56  ;;  %v980_v18 = vsel %vm6693_vm0, %v6646_v41, %v975_v6  ;;  %v1837_v60 = vadd.f32 0.05243302, %v1836_v48  ;;  %v1358_v13 = vadd.f32 0.001143296, %v1357_v22 }
 0x149   : > { %9895 = vst [vmem:[#allocation20_spill] sm:$0xff] %v6754_v34  ;;  %v2163_v2 = vmul.f32 3.8918573e-05, %v6738_v28  ;;  %v1827_v54 = vmul.f32 %v1826_v24, %v1802_v38  ;;  %v995_v61 = vadd.f32 1.1283791, %v994_v53  ;;  %v1045_v32 = vmul.f32 %v1044_v11, %v6564_v26 }
 0x14a   : > { %v1872_v3 = vmul.f32 2.1237322e-06, %v6587_v20  ;;  %v6768_v29 = vmul.f32 %v1313_v46, %v6526_v33  ;;  %v1009_v37 = vsub.f32 1.0, %v1008_v17  ;;  %v1346_v14 = vmul.f32 2.1237322e-06, %v6702_v50 }
 0x14b   : > { %v1077_v5 = vmul.f32 3.8918573e-05, %v6752_v57  ;;  %v6772_v0 = vpop.eup %5473  ;;  %v6775_v48 = vmul.f32 %v980_v18, %v6619_v21  ;;  %v1029_v41 = vadd.f32 0.0036580483, %v1028_v42  ;;  %v1890_v22 = vadd.f32 0.4994258, %v1889_v52 }
 0x14c   : > { %9896 = vst [vmem:[#allocation21_spill] sm:$0xff] %v6768_v29  ;;  %v6778_v38 = vmul.f32 0.70710677, %v6759_v62  ;;  %5475 = vrcp.f32 %v6754_v34  ;;  %v1838_v33 = vmul.f32 %v1837_v60, %v6497_v51  ;;  %v1359_v46 = vmul.f32 %v1358_v13, %v6702_v50 }
 0x14d   : > { %v2164_v49 = vadd.f32 0.001143296, %v2163_v2  ;;  %v5187_v56 = vclamps-f32 %v1827_v54, 1.0  ;;  %v6784_v6 = vmul.f32 0.5, %v6500_v9  ;;  %v6786_v53 = vadd.f32 1.0, %v1045_v32 }
 0x14e   : > { %v1873_v21 = vadd.f32 0.00028619796, %v1872_v3  ;;  %v6789_v11 = vmul.f32 %v995_v61, %v6403_v59  ;;  %v1010_v24 = vmul.f32 %v6722_v39, %v1009_v37  ;;  %v1854_v17 = vmul.f32 %v6772_v0, %v6707_v16 }
 0x14f   : > { %v1078_v42 = vadd.f32 0.001143296, %v1077_v5  ;;  %v1347_v52 = vadd.f32 0.00028619796, %v1346_v14  ;;  %v1030_v18 = vmul.f32 %v1029_v41, %v6564_v26  ;;  %v1891_v60 = vmul.f32 %v1890_v22, %v6587_v20 }
 0x150   : > { %v1910_v9 = vmul.f32 %v6778_v38, %v6778_v38  ;;  %vm1012_vm6 = vweird.f32 %v6664_v23  ;;  %v1839_v13 = vadd.f32 0.18741608, %v1838_v33  ;;  %v1360_v2 = vadd.f32 0.014752088, %v1359_v46 }
 0x151   : > { %v2165_v59 = vmul.f32 %v2164_v49, %v6738_v28  ;;  %v1016_v54 = vand.u32 2147483647, %v6664_v23  ;;  %v1018_v61 = vand.u32 2147483648, %v6664_v23  ;;  %5477 = vrcp.f32 %v6786_v53  ;;  %v1555_v49 = vpop.f32.mrf.mxu3 }
 0x152   : > { %v1874_v32 = vmul.f32 %v1873_v21, %v6587_v20  ;;  %v6804_v3 = vpop.eup %5475  ;;  %v1011_v37 = vadd.f32 %v6722_v39, %v1010_v24  ;;  %vm1013_vm7 = vweird.f32 %v6722_v39  ;;  %v1855_v14 = vsub.f32 1.0, %v1854_v17 }
 0x153   : > { %9897 = vst [vmem:[#allocation22_spill] sm:$0xff] %v6804_v3  ;;  %v1079_v5 = vmul.f32 %v1078_v42, %v6752_v57  ;;  %v2235_v41 = vadd.f32 1.0, %v5187_v56  ;;  %v1031_v22 = vadd.f32 0.05243302, %v1030_v18  ;;  %v6809_v33 = vadd.f32 1.0, %v1891_v60  ;;  %vm6820_vm8 = vmor %vm1012_vm6, %vm1013_vm7 }
 0x154   : > { %v6811_v46 = vmin.f32 %v1910_v9, 16.0  ;;  %v1840_v8 = vmul.f32 %v1839_v13, %v6497_v51  ;;  %v6815_v21 = vmul.f32 %v1347_v52, %v6702_v50  ;;  %v1361_v25 = vmul.f32 %v1360_v2, %v6702_v50 }
 0x155   : > { %v2166_v24 = vadd.f32 0.014752088, %v2165_v59  ;;  %vm6824_vm9 = vcmp.eq.f32.partialorder %v1016_v54, 8.507059e+37  ;;  %v1019_v42 = vor.u32 1.1754944e-38, %v1018_v61  ;;  %v1875_v18 = vadd.f32 0.0036580483, %v1874_v32 }
 0x156   : > { %9898 = vst [vmem:[#allocation23_spill] sm:$0xff] %v6815_v21  ;;  %v2152_v51 = vmul.f32 2.1237322e-06, %v6738_v28  ;;  %v1015_v52 = vsel %vm6820_vm8, %v6722_v39, %v1011_v37  ;;  %v1856_v60 = vmul.f32 %v6772_v0, %v1855_v14  ;;  %v1080_v9 = vadd.f32 0.014752088, %v1079_v5 }
 0x157   : > { %v6834_v23 = vadd.f32 %v6658_v15, %v1555_v49  ;;  %v6836_v13 = vpop.eup %5477  ;;  %v1032_v2 = vmul.f32 %v1031_v22, %v6564_v26  ;;  %v6840_v59 = vmul.f32 0.5, %v6537_v19  ;;  %5479 = vrcp.f32 %v6809_v33 }
 0x158   : > { %v1923_v54 = vmul.f32 3.8918573e-05, %v6811_v46  ;;  %v1841_v61 = vadd.f32 1.1283791, %v1840_v8  ;;  %v1864_v39 = vand.u32 2147483648, %v6707_v16  ;;  %v2167_v37 = vmul.f32 %v2166_v24, %v6738_v28 }
 0x159   : > { %v1362_v32 = vadd.f32 0.112945676, %v1361_v25  ;;  %v1020_v14 = vsel %vm6824_vm9, %v1019_v42, %v1015_v52  ;;  %vm1859_vm10 = vweird.f32 %v6772_v0  ;;  %v1876_v5 = vmul.f32 %v1875_v18, %v6587_v20 }
 0x15a   : > { %v2153_v22 = vadd.f32 0.00028619796, %v2152_v51  ;;  %v1857_v19 = vadd.f32 %v6772_v0, %v1856_v60  ;;  %v1048_v49 = vmul.f32 %v6836_v13, %v6786_v53  ;;  %v1081_v8 = vmul.f32 %v1080_v9, %v6752_v57 }
 0x15b   : > { %v6855_v17 = vmul.f32 0.70710677, %v6834_v23  ;;  %v6858_v25 = vmul.f32 %v2235_v41, %v6548_v4  ;;  %v1033_v24 = vadd.f32 0.18741608, %v1032_v2  ;;  %v1066_v56 = vmul.f32 2.1237322e-06, %v6752_v57 }
 0x15c   : > { %v1924_v42 = vadd.f32 0.001143296, %v1923_v54  ;;  %v1842_v18 = vmul.f32 %v1841_v61, %v6454_v27  ;;  %vm1858_vm11 = vweird.f32 %v6707_v16  ;;  %v1862_v51 = vand.u32 2147483647, %v6707_v16  ;;  %v1540_v54 = vpop.f32.mrf.mxu1 }
 0x15d   : > { %v2168_v52 = vadd.f32 0.112945676, %v2167_v37  ;;  %v6864_v60 = vpop.eup %5479  ;;  %v6867_v9 = vmul.f32 %v1020_v14, %v6789_v11  ;;  %vm6871_vm12 = vmor %vm1858_vm11, %vm1859_vm10  ;;  %v1363_v41 = vmul.f32 %v1362_v32, %v6702_v50  ;;  %v1877_v2 = vadd.f32 0.05243302, %v1876_v5 }
 0x15e   : > { %v2154_v27 = vmul.f32 %v2153_v22, %v6738_v28  ;;  %v1861_v16 = vsel %vm6871_vm12, %v6772_v0, %v1857_v19  ;;  %v1049_v61 = vsub.f32 1.0, %v1048_v49  ;;  %v1082_v37 = vadd.f32 0.112945676, %v1081_v8  ;;  %v694_v22 = vpop.f32.mrf.mxu0 }
 0x15f   : > { %v2190_v11 = vmul.f32 %v6855_v17, %v6855_v17  ;;  %v1865_v14 = vor.u32 1.1754944e-38, %v1864_v39  ;;  %v1034_v31 = vmul.f32 %v1033_v24, %v6564_v26  ;;  %v1067_v1 = vadd.f32 0.00028619796, %v1066_v56 }
 0x160   : > { %v1925_v7 = vmul.f32 %v1924_v42, %v6811_v46  ;;  %vm1863_vm13 = vcmp.eq.f32.partialorder %v1862_v51, 8.507059e+37  ;;  %v1894_v32 = vmul.f32 %v6864_v60, %v6809_v33  ;;  %v2169_v5 = vmul.f32 %v2168_v52, %v6738_v28 }
 0x161   : > { %v6888_v0 = vadd.f32 %v6658_v15, %v1540_v54  ;;  %v1866_v19 = vsel %vm1863_vm13, %v1865_v14, %v1861_v16  ;;  %v6890_v49 = vadd.f32 0.4994258, %v1363_v41  ;;  %v1878_v39 = vmul.f32 %v1877_v2, %v6587_v20 }
 0x162   : > { %v2155_v8 = vadd.f32 0.0036580483, %v2154_v27  ;;  %v1050_v24 = vmul.f32 %v6836_v13, %v1049_v61  ;;  %v1083_v56 = vmul.f32 %v1082_v37, %v6752_v57  ;;  %v6896_v42 = vmin.f32 %v2190_v11, 16.0 }
 0x163   : > { %v1035_v51 = vadd.f32 1.1283791, %v1034_v31  ;;  %v1068_v52 = vmul.f32 %v1067_v1, %v6752_v57  ;;  %v1926_v4 = vadd.f32 0.014752088, %v1925_v7  ;;  %v6900_v54 = vadd.f32 %v6638_v58, %v694_v22 }
 0x164   : > { %v6902_v41 = vmul.f32 %v1866_v19, %v1842_v18  ;;  %v1895_v16 = vsub.f32 1.0, %v1894_v32  ;;  %v2170_v2 = vadd.f32 0.4994258, %v2169_v5  ;;  %v6905_v27 = vmul.f32 0.70710677, %v6888_v0 }
 0x165   : > { %v1056_v61 = vand.u32 2147483647, %v6786_v53  ;;  %v1058_v37 = vand.u32 2147483648, %v6786_v53  ;;  %v1879_v11 = vadd.f32 0.18741608, %v1878_v39  ;;  %v2156_v31 = vmul.f32 %v2155_v8, %v6738_v28 }
 0x166   : > { %v1051_v1 = vadd.f32 %v6836_v13, %v1050_v24  ;;  %vm1053_vm14 = vweird.f32 %v6836_v13  ;;  %v1084_v7 = vadd.f32 0.4994258, %v1083_v56  ;;  %v2203_v18 = vmul.f32 3.8918573e-05, %v6896_v42 }
 0x167   : > { %v1036_v14 = vmul.f32 %v1035_v51, %v6519_v35  ;;  %v1069_v32 = vadd.f32 0.0036580483, %v1068_v52  ;;  %v1927_v5 = vmul.f32 %v1926_v4, %v6811_v46  ;;  %v6916_v22 = vmul.f32 0.70710677, %v6900_v54  ;;  %v2486_v4 = vld [vmem:[%s5915_s23 + $0x68] sm:$0xff] }
 0x168   : > { %vm1052_vm15 = vweird.f32 %v6786_v53  ;;  %v1896_v19 = vmul.f32 %v6864_v60, %v1895_v16  ;;  %v2171_v39 = vmul.f32 %v2170_v2, %v6738_v28  ;;  %v1950_v8 = vmul.f32 %v6905_v27, %v6905_v27  ;;  %v2485_v53 = vld [vmem:[%s5915_s23 + $0x60] sm:$0xff] }
 0x169   : > { %vm6923_vm0 = vmor %vm1052_vm15, %vm1053_vm14  ;;  %vm6927_vm1 = vcmp.eq.f32.partialorder %v1056_v61, 8.507059e+37  ;;  %v1059_v56 = vor.u32 1.1754944e-38, %v1058_v37  ;;  %v1880_v51 = vmul.f32 %v1879_v11, %v6587_v20  ;;  %v2157_v52 = vadd.f32 0.05243302, %v2156_v31 }
 0x16a   : > { %v1055_v16 = vsel %vm6923_vm0, %v6836_v13, %v1051_v1  ;;  %v1085_v2 = vmul.f32 %v1084_v7, %v6752_v57  ;;  %v1912_v26 = vmul.f32 2.1237322e-06, %v6811_v46  ;;  %v2204_v44 = vadd.f32 0.001143296, %v2203_v18 }
 0x16b   : > { %vm1899_vm3 = vweird.f32 %v6864_v60  ;;  %v1070_v61 = vmul.f32 %v1069_v32, %v6752_v57  ;;  %v1928_v21 = vadd.f32 0.112945676, %v1927_v5  ;;  %v1104_v20 = vmul.f32 %v6916_v22, %v6916_v22 }
 0x16c   : > { %v1897_v37 = vadd.f32 %v6864_v60, %v1896_v19  ;;  %v6944_v11 = vadd.f32 1.0, %v2171_v39  ;;  %v6946_v31 = vmin.f32 %v1950_v8, 16.0  ;;  %v2495_v13 = vpack.c.bf16 %v2486_v4, %v2485_v53 }
 0x16d   : > { %v1060_v1 = vsel %vm6927_vm1, %v1059_v56, %v1055_v16  ;;  %vm1898_vm4 = vweird.f32 %v6809_v33  ;;  %v1902_v7 = vand.u32 2147483647, %v6809_v33  ;;  %v1904_v18 = vand.u32 2147483648, %v6809_v33 }
 0x16e   : > { %v2158_v32 = vmul.f32 %v2157_v52, %v6738_v28  ;;  %v6954_v5 = vadd.f32 1.0, %v1085_v2  ;;  %v1913_v24 = vadd.f32 0.00028619796, %v1912_v26  ;;  %v2205_v19 = vmul.f32 %v2204_v44, %v6896_v42  ;;  %5268 = vmatmul.msk.bf16.gmra.mxu0 %vm2302_vm2, %v2495_v13  ;;  %vm6960_vm5 = vmor %vm1898_vm4, %vm1899_vm3 }
 0x16f   : > { %v1881_v39 = vadd.f32 1.1283791, %v1880_v51  ;;  %v1071_v35 = vadd.f32 0.05243302, %v1070_v61  ;;  %v1929_v56 = vmul.f32 %v1928_v21, %v6811_v46  ;;  %v6965_v33 = vmin.f32 %v1104_v20, 16.0  ;;  %v1543_v61 = vpop.f32.mrf.mxu1 }
 0x170   : > { %v1061_v52 = vmul.f32 %v1060_v1, %v1036_v14  ;;  %v1901_v26 = vsel %vm6960_vm5, %v6864_v60, %v1897_v37  ;;  %5481 = vrcp.f32 %v6944_v11  ;;  %v1963_v44 = vmul.f32 3.8918573e-05, %v6946_v31 }
 0x171   : > { %v9911_v51 = vclamps-f32 %v6867_v9, 1.0  ;;  %v5188_v4 = vclamps-f32 %v6902_v41, 1.0  ;;  %vm1903_vm6 = vcmp.eq.f32.partialorder %v1902_v7, 8.507059e+37  ;;  %v1905_v16 = vor.u32 1.1754944e-38, %v1904_v18 }
 0x172   : > { %v2159_v2 = vadd.f32 0.18741608, %v2158_v32  ;;  %5483 = vrcp.f32 %v6954_v5  ;;  %v1914_v21 = vmul.f32 %v1913_v24, %v6811_v46  ;;  %v2206_v14 = vadd.f32 0.014752088, %v2205_v19 }
 0x173   : > { %v1390_v53 = vadd.f32 1.0, %v9911_v51  ;;  %v1906_v20 = vsel %vm1903_vm6, %v1905_v16, %v1901_v26  ;;  %v1072_v60 = vmul.f32 %v1071_v35, %v6752_v57  ;;  %v1930_v37 = vadd.f32 0.4994258, %v1929_v56 }
 0x174   : > { %v1117_v13 = vmul.f32 3.8918573e-05, %v6965_v33  ;;  %v6981_v9 = vmul.f32 %v6890_v49, %v6702_v50  ;;  %v5153_v41 = vclamps-f32 %v1061_v52, 1.0  ;;  %v1882_v1 = vmul.f32 %v1881_v39, %v6555_v12  ;;  %v2488_v50 = vld [vmem:[%s5915_s23 + $0x78] sm:$0xff] }
 0x175   : > { %v1964_v7 = vadd.f32 0.001143296, %v1963_v44  ;;  %v2236_v18 = vadd.f32 1.0, %v5188_v4  ;;  %v2192_v32 = vmul.f32 2.1237322e-06, %v6896_v42  ;;  %v6986_v24 = vadd.f32 %v6658_v15, %v1543_v61 }
 0x176   : > { %9912 = vst [vmem:[#allocation24_spill] sm:$0xff] %v6981_v9  ;;  %v2263_v19 = vpack.c.bf16 %v6598_v47, %v6478_v63  ;;  %v6990_v8 = vpop.eup %5481  ;;  %v1907_v35 = vmul.f32 %v1906_v20, %v1882_v1  ;;  %v2160_v56 = vmul.f32 %v2159_v2, %v6738_v28  ;;  %v1915_v49 = vadd.f32 0.0036580483, %v1914_v21 }
 0x177   : > { %v2207_v52 = vmul.f32 %v2206_v14, %v6896_v42  ;;  %v6995_v12 = vmul.f32 %v1390_v53, %v6609_v10  ;;  %v1073_v39 = vadd.f32 0.18741608, %v1072_v60  ;;  %v1931_v26 = vmul.f32 %v1930_v37, %v6811_v46 }
 0x178   : > { %v1118_v44 = vadd.f32 0.001143296, %v1117_v13  ;;  %5215 = vmatmul.msk.bf16.gmra.mxu2 %vm2302_vm2, %v2263_v19  ;;  %v6999_v51 = vpop.eup %5483  ;;  %v1391_v63 = vadd.f32 1.0, %v5153_v41  ;;  %v7002_v47 = vmul.f32 0.5, %v6661_v30  ;;  %v7005_v28 = vmul.f32 0.5, %v6670_v40 }
 0x179   : > { %v1965_v4 = vmul.f32 %v1964_v7, %v6946_v31  ;;  %v7009_v10 = vmul.f32 %v2236_v18, %v6650_v36  ;;  %v2174_v53 = vmul.f32 %v6990_v8, %v6944_v11  ;;  %v2193_v16 = vadd.f32 0.00028619796, %v2192_v32 }
 0x17a   : > { %v7014_v2 = vmul.f32 0.70710677, %v6986_v24  ;;  %v5189_v21 = vclamps-f32 %v1907_v35, 1.0  ;;  %v2161_v14 = vadd.f32 1.1283791, %v2160_v56  ;;  %v1916_v30 = vmul.f32 %v1915_v49, %v6811_v46 }
 0x17b   : > { %v2208_v61 = vadd.f32 0.112945676, %v2207_v52  ;;  %v1074_v40 = vmul.f32 %v1073_v39, %v6752_v57  ;;  %v1088_v20 = vmul.f32 %v6999_v51, %v6954_v5  ;;  %v7020_v60 = vadd.f32 1.0, %v1931_v26  ;;  %v1545_v39 = vpop.f32.mrf.mxu1 }
 0x17c   : > { %v1119_v36 = vmul.f32 %v1118_v44, %v6965_v33  ;;  %v7024_v37 = vmul.f32 %v1391_v63, %v6784_v6  ;;  %v2184_v13 = vand.u32 2147483648, %v6944_v11  ;;  %v7028_v41 = vmul.f32 0.5, %v6759_v62 }
 0x17d   : > { %v1966_v1 = vadd.f32 0.014752088, %v1965_v4  ;;  %v2175_v7 = vsub.f32 1.0, %v2174_v53  ;;  %v2182_v18 = vand.u32 2147483647, %v6944_v11  ;;  %v2194_v57 = vmul.f32 %v2193_v16, %v6896_v42 }
 0x17e   : > { %v1990_v32 = vmul.f32 %v7014_v2, %v7014_v2  ;;  %v2237_v19 = vadd.f32 1.0, %v5189_v21  ;;  %v7035_v35 = vmul.f32 %v2161_v14, %v6682_v45  ;;  %v1917_v6 = vadd.f32 0.05243302, %v1916_v30 }
 0x17f   : > { %v2209_v56 = vmul.f32 %v2208_v61, %v6896_v42  ;;  %v1075_v49 = vadd.f32 1.1283791, %v1074_v40  ;;  %v1089_v52 = vsub.f32 1.0, %v1088_v20  ;;  %5485 = vrcp.f32 %v7020_v60 }
 0x180   : > { %v1120_v62 = vadd.f32 0.014752088, %v1119_v36  ;;  %vm2178_vm7 = vweird.f32 %v6944_v11  ;;  %v2185_v26 = vor.u32 1.1754944e-38, %v2184_v13  ;;  %v7041_v44 = vmul.f32 0.5, %v6900_v54 }
 0x181   : > { %v1967_v63 = vmul.f32 %v1966_v1, %v6946_v31  ;;  %v2176_v45 = vmul.f32 %v6990_v8, %v2175_v7  ;;  %vm7045_vm8 = vcmp.eq.f32.partialorder %v2182_v18, 8.507059e+37  ;;  %v2195_v53 = vadd.f32 0.0036580483, %v2194_v57  ;;  %v697_v7 = vpop.f32.mrf.mxu0 }
 0x182   : > { %v1106_v16 = vmul.f32 2.1237322e-06, %v6965_v33  ;;  %v7050_v21 = vmin.f32 %v1990_v32, 16.0  ;;  %v7053_v14 = vmul.f32 %v2237_v19, %v6840_v59  ;;  %v1918_v30 = vmul.f32 %v1917_v6, %v6811_v46 }
 0x183   : > { %v2210_v54 = vadd.f32 0.4994258, %v2209_v56  ;;  %v7057_v61 = vadd.f32 %v6658_v15, %v1545_v39  ;;  %vm2179_vm9 = vweird.f32 %v6990_v8  ;;  %v7061_v40 = vmul.f32 %v1075_v49, %v6691_v43 }
 0x184   : > { %v1090_v20 = vmul.f32 %v6999_v51, %v1089_v52  ;;  %v1121_v36 = vmul.f32 %v1120_v62, %v6965_v33  ;;  %vm1092_vm10 = vweird.f32 %v6954_v5  ;;  %v1096_v59 = vand.u32 2147483647, %v6954_v5  ;;  %vm7075_vm11 = vmor %vm2178_vm7, %vm2179_vm9 }
 0x185   : > { %v1098_v13 = vand.u32 2147483648, %v6954_v5  ;;  %v1968_v1 = vadd.f32 0.112945676, %v1967_v63  ;;  %v7068_v18 = vpop.eup %5485  ;;  %v2177_v57 = vadd.f32 %v6990_v8, %v2176_v45  ;;  %v2196_v32 = vmul.f32 %v2195_v53, %v6896_v42 }
 0x186   : > { %v1107_v43 = vadd.f32 0.00028619796, %v1106_v16  ;;  %v2003_v19 = vmul.f32 3.8918573e-05, %v7050_v21  ;;  %v1919_v56 = vadd.f32 0.18741608, %v1918_v30  ;;  %v2211_v49 = vmul.f32 %v2210_v54, %v6896_v42 }
 0x187   : > { %v1952_v52 = vmul.f32 2.1237322e-06, %v6946_v31  ;;  %v7082_v62 = vmul.f32 0.70710677, %v7057_v61  ;;  %v1091_v39 = vadd.f32 %v6999_v51, %v1090_v20  ;;  %vm1093_vm12 = vweird.f32 %v6999_v51  ;;  %v2487_v54 = vld [vmem:[%s5915_s23 + $0x70] sm:$0xff]  ;;  %s5039_s23 = sshll.u32 %s574_s19, 4  ;;  %s5040_s23 = int_to_ptr.vmem [resolvable:$true] %s5039_s23 }
 0x188   : > { %v1122_v63 = vadd.f32 0.112945676, %v1121_v36  ;;  %v7087_v45 = vadd.f32 %v6638_v58, %v697_v7  ;;  %v1099_v11 = vor.u32 1.1754944e-38, %v1098_v13  ;;  %v1934_v53 = vmul.f32 %v7068_v18, %v7020_v60  ;;  %vm7103_vm13 = vmor %vm1092_vm10, %vm1093_vm12 }
 0x189   : > { %v7092_v16 = vmul.f32 0.5, %v6834_v23  ;;  %v1969_v30 = vmul.f32 %v1968_v1, %v6946_v31  ;;  %v2181_v20 = vsel %vm7075_vm11, %v6990_v8, %v2177_v57  ;;  %v2197_v9 = vadd.f32 0.05243302, %v2196_v32 }
 0x18a   : > { %9917 = vst [vmem:[#allocation25_spill] sm:$0xff] %v7087_v45  ;;  %v1108_v36 = vmul.f32 %v1107_v43, %v6965_v33  ;;  %v2004_v58 = vadd.f32 0.001143296, %v2003_v19  ;;  %v1920_v23 = vmul.f32 %v1919_v56, %v6811_v46  ;;  %v7108_v7 = vadd.f32 1.0, %v2211_v49 }
 0x18b   : > { %v1953_v1 = vadd.f32 0.00028619796, %v1952_v52  ;;  %v2030_v3 = vmul.f32 %v7082_v62, %v7082_v62  ;;  %v1095_v8 = vsel %vm7103_vm13, %v6999_v51, %v1091_v39  ;;  %v1123_v57 = vmul.f32 %v1122_v63, %v6965_v33 }
 0x18c   : > { %v7117_v5 = vmul.f32 0.70710677, %v7087_v45  ;;  %v2496_v32 = vpack.c.bf16 %v2488_v50, %v2487_v54  ;;  %v2186_v43 = vsel %vm7045_vm8, %v2185_v26, %v2181_v20  ;;  %v1935_v46 = vsub.f32 1.0, %v1934_v53 }
 0x18d   : > { %v1970_v19 = vadd.f32 0.4994258, %v1969_v30  ;;  %v7121_v6 = vmin.f32 %v2030_v3, 16.0  ;;  %vm1097_vm14 = vcmp.eq.f32.partialorder %v1096_v59, 8.507059e+37  ;;  %v2198_v56 = vmul.f32 %v2197_v9, %v6896_v42  ;;  %v1548_v59 = vpop.f32.mrf.mxu1 }
 0x18e   : > { %v1109_v49 = vadd.f32 0.0036580483, %v1108_v36  ;;  %v2005_v52 = vmul.f32 %v2004_v58, %v7050_v21  ;;  %5269 = vmatmul.msk.bf16.gmra.mxu0 %vm2302_vm2, %v2496_v32  ;;  %v1100_v51 = vsel %vm1097_vm14, %v1099_v11, %v1095_v8  ;;  %v1921_v39 = vadd.f32 1.1283791, %v1920_v23  ;;  %v7138_v58 = vpop.f32.mrf.mxu0 }
 0x18f   : > { %5487 = vrcp.f32 %v7108_v7  ;;  %v1954_v50 = vmul.f32 %v1953_v1, %v6946_v31  ;;  %v2187_v26 = vmul.f32 %v2186_v43, %v7035_v35  ;;  %vm1938_vm15 = vweird.f32 %v7020_v60 }
 0x190   : > { %v1942_v3 = vand.u32 2147483647, %v7020_v60  ;;  %v1124_v4 = vadd.f32 0.4994258, %v1123_v57  ;;  %v1936_v9 = vmul.f32 %v7068_v18, %v1935_v46  ;;  %v1971_v63 = vmul.f32 %v1970_v19, %v6946_v31 }
 0x191   : > { %v1144_v11 = vmul.f32 %v7117_v5, %v7117_v5  ;;  %v2043_v53 = vmul.f32 3.8918573e-05, %v7121_v6  ;;  %v1101_v30 = vmul.f32 %v1100_v51, %v7061_v40  ;;  %v2199_v54 = vadd.f32 0.18741608, %v2198_v56 }
 0x192   : > { %v1110_v35 = vmul.f32 %v1109_v49, %v6965_v33  ;;  %v2006_v20 = vadd.f32 0.014752088, %v2005_v52  ;;  %v1955_v36 = vadd.f32 0.0036580483, %v1954_v50  ;;  %v7141_v23 = vadd.f32 %v6658_v15, %v1548_v59 }
 0x193   : > { %v2044_v13 = vadd.f32 0.001143296, %v2043_v53  ;;  %v2264_v1 = vpack.c.bf16 %v6858_v25, %v6746_v55  ;;  %vm1939_vm0 = vweird.f32 %v7068_v18  ;;  %vm7146_vm1 = vcmp.eq.f32.partialorder %v1942_v3, 8.507059e+37 }
 0x194   : > { %v1944_v40 = vand.u32 2147483648, %v7020_v60  ;;  %v1125_v57 = vmul.f32 %v1124_v4, %v6965_v33  ;;  %v1937_v43 = vadd.f32 %v7068_v18, %v1936_v9  ;;  %v7155_v46 = vadd.f32 1.0, %v1971_v63  ;;  %vm7171_vm3 = vmor %vm1938_vm15, %vm1939_vm0 }
 0x195   : > { %v7152_v32 = vpop.eup %5487  ;;  %v7157_v19 = vmin.f32 %v1144_v11, 16.0  ;;  %v2045_v55 = vmul.f32 %v2044_v13, %v7121_v6  ;;  %5216 = vmatmul.msk.bf16.gmra.mxu2 %vm2302_vm2, %v2264_v1  ;;  %v5196_v25 = vclamps-f32 %v2187_v26, 1.0  ;;  %v5154_v56 = vclamps-f32 %v1101_v30, 1.0 }
 0x196   : > { %v2200_v49 = vmul.f32 %v2199_v54, %v6896_v42  ;;  %v2007_v52 = vmul.f32 %v2006_v20, %v7050_v21  ;;  %v1111_v51 = vadd.f32 0.05243302, %v1110_v35  ;;  %v1956_v50 = vmul.f32 %v1955_v36, %v6946_v31 }
 0x197   : > { %v2046_v3 = vadd.f32 0.014752088, %v2045_v55  ;;  %v7165_v4 = vmul.f32 0.70710677, %v7141_v23  ;;  %v1945_v26 = vor.u32 1.1754944e-38, %v1944_v40  ;;  %v2214_v42 = vmul.f32 %v7152_v32, %v7108_v7 }
 0x198   : > { %v7177_v9 = vadd.f32 1.0, %v1125_v57  ;;  %v1146_v63 = vmul.f32 2.1237322e-06, %v7157_v19  ;;  %v1941_v11 = vsel %vm7171_vm3, %v7068_v18, %v1937_v43  ;;  %5489 = vrcp.f32 %v7155_v46 }
 0x199   : > { %v1157_v60 = vmul.f32 3.8918573e-05, %v7157_v19  ;;  %v2047_v53 = vmul.f32 %v2046_v3, %v7121_v6  ;;  %v2244_v30 = vadd.f32 1.0, %v5196_v25  ;;  %v1392_v54 = vadd.f32 1.0, %v5154_v56 }
 0x19a   : > { %v2201_v35 = vadd.f32 1.1283791, %v2200_v49  ;;  %v2008_v20 = vadd.f32 0.112945676, %v2007_v52  ;;  %v1112_v36 = vmul.f32 %v1111_v51, %v6965_v33  ;;  %v1957_v13 = vadd.f32 0.05243302, %v1956_v50  ;;  %v7197_v52 = vpop.f32.mrf.mxu0 }
 0x19b   : > { %v2048_v1 = vadd.f32 0.112945676, %v2047_v53  ;;  %v2070_v40 = vmul.f32 %v7165_v4, %v7165_v4  ;;  %v1946_v18 = vsel %vm7146_vm1, %v1945_v26, %v1941_v11  ;;  %v2215_v57 = vsub.f32 1.0, %v2214_v42 }
 0x19c   : > { %5491 = vrcp.f32 %v7177_v9  ;;  %v1147_v43 = vadd.f32 0.00028619796, %v1146_v63  ;;  %v1922_v55 = vmul.f32 %v1921_v39, %v6778_v38  ;;  %v7194_v25 = vmul.f32 0.5, %v6888_v0 }
 0x19d   : > { %v1158_v56 = vadd.f32 0.001143296, %v1157_v60  ;;  %v2049_v49 = vmul.f32 %v2048_v1, %v7121_v6  ;;  %v7200_v51 = vmul.f32 %v2244_v30, %v7002_v47  ;;  %v7203_v8 = vmul.f32 %v1392_v54, %v7005_v28 }
 0x19e   : > { %v7206_v50 = vmul.f32 %v2201_v35, %v6855_v17  ;;  %v2009_v3 = vmul.f32 %v2008_v20, %v7050_v21  ;;  %v7209_v38 = vpop.eup %5489  ;;  %v1947_v0 = vmul.f32 %v1946_v18, %v1922_v55  ;;  %v1113_v39 = vadd.f32 0.18741608, %v1112_v36 }
 0x19f   : > { %v1958_v59 = vmul.f32 %v1957_v13, %v6946_v31  ;;  %v7212_v26 = vmin.f32 %v2070_v40, 16.0  ;;  %v2216_v42 = vmul.f32 %v7152_v32, %v2215_v57  ;;  %v2222_v47 = vand.u32 2147483647, %v7108_v7 }
 0x1a0   : > { %v1148_v28 = vmul.f32 %v1147_v43, %v7157_v19  ;;  %v1992_v63 = vmul.f32 2.1237322e-06, %v7050_v21  ;;  %vm2218_vm4 = vweird.f32 %v7108_v7  ;;  %v2224_v17 = vand.u32 2147483648, %v7108_v7 }
 0x1a1   : > { %v1159_v11 = vmul.f32 %v1158_v56, %v7157_v19  ;;  %v2050_v60 = vadd.f32 0.4994258, %v2049_v49  ;;  %vm2219_vm5 = vweird.f32 %v7152_v32  ;;  %v1974_v30 = vmul.f32 %v7209_v38, %v7155_v46 }
 0x1a2   : > { %v7221_v53 = vpop.eup %5491  ;;  %v2010_v54 = vadd.f32 0.4994258, %v2009_v3  ;;  %v2032_v35 = vmul.f32 2.1237322e-06, %v7121_v6  ;;  %v5190_v20 = vclamps-f32 %v1947_v0, 1.0  ;;  %v1114_v36 = vmul.f32 %v1113_v39, %v6965_v33  ;;  %vm7236_vm7 = vmor %vm2218_vm4, %vm2219_vm5  ;;  %v7250_v45 = vpop.f32.mrf.mxu0 }
 0x1a3   : > { %v1959_v13 = vadd.f32 0.18741608, %v1958_v59  ;;  %v2083_v1 = vmul.f32 3.8918573e-05, %v7212_v26  ;;  %v2217_v40 = vadd.f32 %v7152_v32, %v2216_v42  ;;  %vm7230_vm6 = vcmp.eq.f32.partialorder %v2222_v47, 8.507059e+37 }
 0x1a4   : > { %v1149_v57 = vadd.f32 0.0036580483, %v1148_v28  ;;  %v1993_v43 = vadd.f32 0.00028619796, %v1992_v63  ;;  %v1128_v33 = vmul.f32 %v7221_v53, %v7177_v9  ;;  %v1160_v56 = vadd.f32 0.014752088, %v1159_v11 }
 0x1a5   : > { %v2051_v49 = vmul.f32 %v2050_v60, %v7121_v6  ;;  %v2084_v3 = vadd.f32 0.001143296, %v2083_v1  ;;  %v2225_v0 = vor.u32 1.1754944e-38, %v2224_v17  ;;  %v1975_v39 = vsub.f32 1.0, %v1974_v30 }
 0x1a6   : > { %v2011_v59 = vmul.f32 %v2010_v54, %v7050_v21  ;;  %v2033_v42 = vadd.f32 0.00028619796, %v2032_v35  ;;  %v7244_v47 = vadd.f32 1.0, %v5190_v20  ;;  %v1115_v28 = vadd.f32 1.1283791, %v1114_v36  ;;  %v1550_v54 = vpop.f32.mrf.mxu1 }
 0x1a7   : > { %v1960_v7 = vmul.f32 %v1959_v13, %v6946_v31  ;;  %v7248_v63 = vmul.f32 0.5, %v6986_v24  ;;  %v2221_v11 = vsel %vm7236_vm7, %v7152_v32, %v2217_v40  ;;  %v1150_v60 = vmul.f32 %v1149_v57, %v7157_v19 }
 0x1a8   : > { %v1994_v30 = vmul.f32 %v1993_v43, %v7050_v21  ;;  %v1129_v35 = vsub.f32 1.0, %v1128_v33  ;;  %v1161_v20 = vmul.f32 %v1160_v56, %v7157_v19  ;;  %v7259_v31 = vadd.f32 1.0, %v2051_v49 }
 0x1a9   : > { %v2085_v24 = vmul.f32 %v2084_v3, %v7212_v26  ;;  %v1138_v36 = vand.u32 2147483648, %v7177_v9  ;;  %v1976_v13 = vmul.f32 %v7209_v38, %v1975_v39  ;;  %v7264_v1 = vadd.f32 1.0, %v2011_v59 }
 0x1aa   : > { %v2034_v32 = vmul.f32 %v2033_v42, %v7121_v6  ;;  %v1961_v40 = vadd.f32 1.1283791, %v1960_v7  ;;  %v1982_v57 = vand.u32 2147483647, %v7155_v46  ;;  %v7269_v55 = vadd.f32 %v6658_v15, %v1550_v54 }
 0x1ab   : > { %v2086_v43 = vadd.f32 0.014752088, %v2085_v24  ;;  %v2226_v33 = vsel %vm7230_vm6, %v2225_v0, %v2221_v11  ;;  %v1984_v56 = vand.u32 2147483648, %v7155_v46  ;;  %v1151_v49 = vadd.f32 0.05243302, %v1150_v60 }
 0x1ac   : > { %v1995_v3 = vadd.f32 0.0036580483, %v1994_v30  ;;  %v1130_v39 = vmul.f32 %v7221_v53, %v1129_v35  ;;  %v1162_v59 = vadd.f32 0.112945676, %v1161_v20  ;;  %5493 = vrcp.f32 %v7259_v31  ;;  %v7292_v35 = vld [vmem:[%s9805_s6] ss:$0 sm:$0xff] }
 0x1ad   : > { %v2087_v42 = vmul.f32 %v2086_v43, %v7212_v26  ;;  %v1977_v7 = vadd.f32 %v7209_v38, %v1976_v13  ;;  %vm1979_vm8 = vweird.f32 %v7209_v38  ;;  %5495 = vrcp.f32 %v7264_v1 }
 0x1ae   : > { %v2035_v15 = vadd.f32 0.0036580483, %v2034_v32  ;;  %v7281_v18 = vmul.f32 %v1115_v28, %v6916_v22  ;;  %v2072_v0 = vmul.f32 2.1237322e-06, %v7212_v26  ;;  %v7285_v60 = vmul.f32 0.70710677, %v7269_v55 }
 0x1af   : > { %v2088_v11 = vadd.f32 0.112945676, %v2087_v42  ;;  %v1139_v30 = vor.u32 1.1754944e-38, %v1138_v36  ;;  %vm1978_vm9 = vweird.f32 %v7155_v46  ;;  %v1996_v54 = vmul.f32 %v1995_v3, %v7050_v21  ;;  %v2566_v36 = vpop.f32.mrf.mxu0 }
 0x1b0   : > { %v7296_v22 = vadd.f32 %v7292_v35, %v7138_v58  ;;  %v2227_v28 = vmul.f32 %v2226_v33, %v7206_v50  ;;  %vm1133_vm10 = vweird.f32 %v7221_v53  ;;  %vm7300_vm11 = vmor %vm1978_vm9, %vm1979_vm8  ;;  %v1152_v46 = vmul.f32 %v1151_v49, %v7157_v19 }
 0x1b1   : > { %v2089_v24 = vmul.f32 %v2088_v11, %v7212_v26  ;;  %v1131_v13 = vadd.f32 %v7221_v53, %v1130_v39  ;;  %v1981_v58 = vsel %vm7300_vm11, %v7209_v38, %v1977_v7  ;;  %vm1983_vm12 = vcmp.eq.f32.partialorder %v1982_v57, 8.507059e+37 }
 0x1b2   : > { %9928 = vst [vmem:[#allocation26_spill] sm:$0xff] %v7296_v22  ;;  %v2036_v50 = vmul.f32 %v2035_v15, %v7121_v6  ;;  %v7311_v32 = vpop.eup %5493  ;;  %v1985_v43 = vor.u32 1.1754944e-38, %v1984_v56  ;;  %v1163_v33 = vmul.f32 %v1162_v59, %v7157_v19  ;;  %v2073_v3 = vadd.f32 0.00028619796, %v2072_v0 }
 0x1b3   : > { %v2110_v49 = vmul.f32 %v7285_v60, %v7285_v60  ;;  %v7316_v42 = vpop.eup %5495  ;;  %vm1132_vm13 = vweird.f32 %v7177_v9  ;;  %v1997_v39 = vadd.f32 0.05243302, %v1996_v54  ;;  %v7320_v11 = vmul.f32 0.70710677, %v7296_v22 }
 0x1b4   : > { %v2090_v38 = vadd.f32 0.4994258, %v2089_v24  ;;  %v5197_v57 = vclamps-f32 %v2227_v28, 1.0  ;;  %vm7324_vm14 = vmor %vm1132_vm13, %vm1133_vm10  ;;  %v1962_v59 = vmul.f32 %v1961_v40, %v6905_v27  ;;  %v1986_v7 = vsel %vm1983_vm12, %v1985_v43, %v1981_v58  ;;  %v7343_v27 = vld [vmem:[%s9807_s8] ss:$0 sm:$0xff] }
 0x1b5   : > { %v1153_v15 = vadd.f32 0.18741608, %v1152_v46  ;;  %v1135_v0 = vsel %vm7324_vm14, %v7221_v53, %v1131_v13  ;;  %v2037_v54 = vadd.f32 0.05243302, %v2036_v50  ;;  %v2054_v20 = vmul.f32 %v7311_v32, %v7259_v31 }
 0x1b6   : > { %v2091_v28 = vmul.f32 %v2090_v38, %v7212_v26  ;;  %v1164_v24 = vadd.f32 0.4994258, %v1163_v33  ;;  %v2014_v17 = vmul.f32 %v7316_v42, %v7264_v1  ;;  %v2074_v22 = vmul.f32 %v2073_v3, %v7212_v26 }
 0x1b7   : > { %v7338_v34 = vmin.f32 %v2110_v49, 16.0  ;;  %v1987_v53 = vmul.f32 %v1986_v7, %v1962_v59  ;;  %v1998_v40 = vmul.f32 %v1997_v39, %v7050_v21  ;;  %v1184_v46 = vmul.f32 %v7320_v11, %v7320_v11 }
 0x1b8   : > { %v7348_v13 = vadd.f32 1.0, %v2091_v28  ;;  %v9933_v58 = vand.u32 2147483647, %v7177_v9  ;;  %v1154_v50 = vmul.f32 %v1153_v15, %v7157_v19  ;;  %v2265_v33 = vpack.c.bf16 %v7053_v14, %v7009_v10  ;;  %v2568_v15 = vpop.f32.mrf.mxu0 }
 0x1b9   : > { %v2112_v43 = vmul.f32 2.1237322e-06, %v7338_v34  ;;  %v7356_v3 = vadd.f32 1.0, %v5197_v57  ;;  %v2038_v39 = vmul.f32 %v2037_v54, %v7121_v6  ;;  %v2055_v38 = vsub.f32 1.0, %v2054_v20 }
 0x1ba   : > { %vm1137_vm15 = vcmp.eq.f32.partialorder %v9933_v58, 8.507059e+37  ;;  %v1165_v56 = vmul.f32 %v1164_v24, %v7157_v19  ;;  %v2015_v59 = vsub.f32 1.0, %v2014_v17  ;;  %v2075_v7 = vadd.f32 0.0036580483, %v2074_v22  ;;  %5217 = vmatmul.msk.bf16.gmra.mxu2 %vm2302_vm2, %v2265_v33 }
 0x1bb   : > { %v1140_v49 = vsel %vm1137_vm15, %v1139_v30, %v1135_v0  ;;  %v7361_v9 = vadd.f32 %v7343_v27, %v2566_v36  ;;  %v5191_v28 = vclamps-f32 %v1987_v53, 1.0  ;;  %v1999_v58 = vadd.f32 0.18741608, %v1998_v40 }
 0x1bc   : > { %v7364_v29 = vmin.f32 %v1184_v46, 16.0  ;;  %5497 = vrcp.f32 %v7348_v13  ;;  %v7369_v10 = vmul.f32 %v7244_v47, %v7028_v41  ;;  %v7371_v14 = vadd.f32 1.1283791, %v1154_v50 }
 0x1bd   : > { %v2113_v19 = vadd.f32 0.00028619796, %v2112_v43  ;;  %v2123_v17 = vmul.f32 3.8918573e-05, %v7338_v34  ;;  %v7375_v30 = vmul.f32 %v1140_v49, %v7281_v18  ;;  %v7378_v22 = vmul.f32 0.5, %v7057_v61 }
 0x1be   : > { %v2039_v36 = vadd.f32 0.18741608, %v2038_v39  ;;  %v2056_v57 = vmul.f32 %v7311_v32, %v2055_v38  ;;  %v2016_v0 = vmul.f32 %v7316_v42, %v2015_v59  ;;  %v2076_v54 = vmul.f32 %v2075_v7, %v7212_v26 }
 0x1bf   : > { %v2124_v41 = vadd.f32 0.001143296, %v2123_v17  ;;  %v7384_v47 = vmul.f32 0.70710677, %v7361_v9  ;;  %v2239_v20 = vadd.f32 1.0, %v5191_v28  ;;  %v7386_v24 = vadd.f32 1.0, %v1165_v56 }
 0x1c0   : > { %v2000_v18 = vmul.f32 %v1999_v58, %v7050_v21  ;;  %v1186_v53 = vmul.f32 2.1237322e-06, %v7364_v29  ;;  %vm2019_vm0 = vweird.f32 %v7316_v42  ;;  %v2024_v61 = vand.u32 2147483648, %v7264_v1 }
 0x1c1   : > { %v2114_v40 = vmul.f32 %v2113_v19, %v7338_v34  ;;  %v2125_v46 = vmul.f32 %v2124_v41, %v7338_v34  ;;  %v2040_v43 = vmul.f32 %v2039_v36, %v7121_v6  ;;  %v2057_v33 = vadd.f32 %v7311_v32, %v2056_v57  ;;  %v2571_v36 = vpop.f32.mrf.mxu0 }
 0x1c2   : > { %v7394_v50 = vpop.eup %5497  ;;  %vm2059_vm1 = vweird.f32 %v7311_v32  ;;  %v2638_v21 = vmul.f32 %v7384_v47, %v7384_v47  ;;  %v2017_v49 = vadd.f32 %v7316_v42, %v2016_v0  ;;  %v2064_v39 = vand.u32 2147483648, %v7259_v31 }
 0x1c3   : > { %v2077_v38 = vadd.f32 0.05243302, %v2076_v54  ;;  %v2126_v56 = vadd.f32 0.014752088, %v2125_v46  ;;  %vm2018_vm3 = vweird.f32 %v7264_v1  ;;  %vm2058_vm4 = vweird.f32 %v7259_v31 }
 0x1c4   : > { %v2062_v59 = vand.u32 2147483647, %v7259_v31  ;;  %v7406_v6 = vmin.f32 %v2638_v21, 16.0  ;;  %v2022_v7 = vand.u32 2147483647, %v7264_v1  ;;  %vm7409_vm5 = vmor %vm2058_vm4, %vm2059_vm1  ;;  %v2094_v58 = vmul.f32 %v7394_v50, %v7348_v13 }
 0x1c5   : > { %v2115_v19 = vadd.f32 0.0036580483, %v2114_v40  ;;  %v2127_v17 = vmul.f32 %v2126_v56, %v7338_v34  ;;  %v2255_v57 = vmul.f32 %v2239_v20, %v7194_v25  ;;  %vm7419_vm6 = vmor %vm2018_vm3, %vm2019_vm0  ;;  %v2025_v1 = vor.u32 1.1754944e-38, %v2024_v61 }
 0x1c6   : > { %v2041_v0 = vadd.f32 1.1283791, %v2040_v43  ;;  %v2061_v54 = vsel %vm7409_vm5, %v7311_v32, %v2057_v33  ;;  %v2021_v41 = vsel %vm7419_vm6, %v7316_v42, %v2017_v49  ;;  %v2065_v40 = vor.u32 1.1754944e-38, %v2064_v39 }
 0x1c7   : > { %v2078_v46 = vmul.f32 %v2077_v38, %v7212_v26  ;;  %v2128_v25 = vadd.f32 0.112945676, %v2127_v17  ;;  %vm2063_vm7 = vcmp.eq.f32.partialorder %v2062_v59, 8.507059e+37  ;;  %v2651_v20 = vmul.f32 3.8918573e-05, %v7406_v6 }
 0x1c8   : > { %v7432_v21 = vadd.f32 %v7343_v27, %v2568_v15  ;;  %v7435_v61 = vadd.f32 %v7343_v27, %v2571_v36  ;;  %v2066_v43 = vsel %vm2063_vm7, %v2065_v40, %v2061_v54  ;;  %v2095_v56 = vsub.f32 1.0, %v2094_v58 }
 0x1c9   : > { %v2116_v32 = vmul.f32 %v2115_v19, %v7338_v34  ;;  %v2129_v33 = vmul.f32 %v2128_v25, %v7338_v34  ;;  %vm2023_vm8 = vcmp.eq.f32.partialorder %v2022_v7, 8.507059e+37  ;;  %v1197_v42 = vmul.f32 3.8918573e-05, %v7364_v29 }
 0x1ca   : > { %v2042_v49 = vmul.f32 %v2041_v0, %v7082_v62  ;;  %v2640_v39 = vmul.f32 2.1237322e-06, %v7406_v6  ;;  %v2001_v38 = vadd.f32 1.1283791, %v2000_v18  ;;  %v2026_v59 = vsel %vm2023_vm8, %v2025_v1, %v2021_v41 }
 0x1cb   : > { %v2079_v15 = vadd.f32 0.18741608, %v2078_v46  ;;  %v2130_v28 = vadd.f32 0.4994258, %v2129_v33  ;;  %v2652_v36 = vadd.f32 0.001143296, %v2651_v20  ;;  %v2096_v7 = vmul.f32 %v7394_v50, %v2095_v56 }
 0x1cc   : > { %v2067_v17 = vmul.f32 %v2066_v43, %v2042_v49  ;;  %v7443_v31 = vmul.f32 0.70710677, %v7432_v21  ;;  %v7446_v58 = vmul.f32 0.70710677, %v7435_v61  ;;  %v2117_v19 = vadd.f32 0.05243302, %v2116_v32 }
 0x1cd   : > { %v2131_v54 = vmul.f32 %v2130_v28, %v7338_v34  ;;  %v2266_v62 = vpack.c.bf16 %v2255_v57, %v7369_v10  ;;  %v2641_v0 = vadd.f32 0.00028619796, %v2640_v39  ;;  %v2653_v18 = vmul.f32 %v2652_v36, %v7406_v6 }
 0x1ce   : > { %v2678_v1 = vmul.f32 %v7443_v31, %v7443_v31  ;;  %v2718_v41 = vmul.f32 %v7446_v58, %v7446_v58  ;;  %v2002_v40 = vmul.f32 %v2001_v38, %v7014_v2  ;;  %v7457_v46 = vadd.f32 0.00028619796, %v1186_v53 }
 0x1cf   : > { %v1198_v25 = vadd.f32 0.001143296, %v1197_v42  ;;  %v2080_v20 = vmul.f32 %v2079_v15, %v7212_v26  ;;  %5218 = vmatmul.msk.bf16.gmra.mxu2 %vm2302_vm2, %v2266_v62  ;;  %v2104_v10 = vand.u32 2147483648, %v7348_v13  ;;  %v7462_v57 = vadd.f32 1.0, %v2131_v54 }
 0x1d0   : > { %v2654_v43 = vadd.f32 0.014752088, %v2653_v18  ;;  %v7464_v56 = vmin.f32 %v2678_v1, 16.0  ;;  %v2027_v32 = vmul.f32 %v2026_v59, %v2002_v40  ;;  %v2097_v33 = vadd.f32 %v7394_v50, %v2096_v7  ;;  %v2573_v59 = vpop.f32.mrf.mxu0 }
 0x1d1   : > { %vm2099_vm9 = vweird.f32 %v7394_v50  ;;  %v2118_v2 = vmul.f32 %v2117_v19, %v7338_v34  ;;  %v5193_v53 = vclamps-f32 %v2067_v17, 1.0  ;;  %5499 = vrcp.f32 %v7462_v57 }
 0x1d2   : > { %v2642_v26 = vmul.f32 %v2641_v0, %v7406_v6  ;;  %v7471_v42 = vmin.f32 %v2718_v41, 16.0  ;;  %vm2098_vm10 = vweird.f32 %v7348_v13  ;;  %v2102_v49 = vand.u32 2147483647, %v7348_v13 }
 0x1d3   : > { %v2655_v39 = vmul.f32 %v2654_v43, %v7406_v6  ;;  %v2680_v38 = vmul.f32 2.1237322e-06, %v7464_v56  ;;  %v1199_v15 = vmul.f32 %v1198_v25, %v7364_v29  ;;  %v2081_v28 = vadd.f32 1.1283791, %v2080_v20  ;;  %vm7478_vm11 = vmor %vm2098_vm10, %vm2099_vm9 }
 0x1d4   : > { %v2105_v36 = vor.u32 1.1754944e-38, %v2104_v10  ;;  %v2691_v7 = vmul.f32 3.8918573e-05, %v7464_v56  ;;  %v2101_v19 = vsel %vm7478_vm11, %v7394_v50, %v2097_v33  ;;  %v2119_v13 = vadd.f32 0.18741608, %v2118_v2 }
 0x1d5   : > { %v2656_v54 = vadd.f32 0.112945676, %v2655_v39  ;;  %v2681_v62 = vadd.f32 0.00028619796, %v2680_v38  ;;  %5501 = vrcp.f32 %v7386_v24  ;;  %v2643_v0 = vadd.f32 0.0036580483, %v2642_v26 }
 0x1d6   : > { %v2692_v18 = vadd.f32 0.001143296, %v2691_v7  ;;  %v2731_v1 = vmul.f32 3.8918573e-05, %v7471_v42  ;;  %v5192_v41 = vclamps-f32 %v2027_v32, 1.0  ;;  %v2241_v40 = vadd.f32 1.0, %v5193_v53 }
 0x1d7   : > { %vm2103_vm12 = vcmp.eq.f32.partialorder %v2102_v49, 8.507059e+37  ;;  %v2657_v25 = vmul.f32 %v2656_v54, %v7406_v6  ;;  %v5500_v20 = vpop.eup %5499  ;;  %v7491_v10 = vadd.f32 %v7292_v35, %v7197_v52  ;;  %v2682_v43 = vmul.f32 %v2681_v62, %v7464_v56 }
 0x1d8   : > { %v2106_v50 = vsel %vm2103_vm12, %v2105_v36, %v2101_v19  ;;  %v2693_v33 = vmul.f32 %v2692_v18, %v7464_v56  ;;  %v1200_v2 = vadd.f32 0.014752088, %v1199_v15  ;;  %v2082_v26 = vmul.f32 %v2081_v28, %v7165_v4  ;;  %v2576_v18 = vpop.f32.mrf.mxu0 }
 0x1d9   : > { %v2120_v39 = vmul.f32 %v2119_v13, %v7338_v34  ;;  %v2134_v32 = vmul.f32 %v5500_v20, %v7462_v57  ;;  %v2644_v53 = vmul.f32 %v2643_v0, %v7406_v6  ;;  %v2658_v49 = vadd.f32 0.4994258, %v2657_v25 }
 0x1da   : > { %v2694_v38 = vadd.f32 0.014752088, %v2693_v33  ;;  %v2732_v17 = vadd.f32 0.001143296, %v2731_v1  ;;  %v2240_v7 = vadd.f32 1.0, %v5192_v41  ;;  %v2257_v52 = vmul.f32 %v2241_v40, %v7378_v22 }
 0x1db   : > { %v2107_v36 = vmul.f32 %v2106_v50, %v2082_v26  ;;  %v2135_v19 = vsub.f32 1.0, %v2134_v32  ;;  %v7500_v54 = vpop.eup %5501  ;;  %v2144_v15 = vand.u32 2147483648, %v7462_v57  ;;  %v2659_v4 = vmul.f32 %v2658_v49, %v7406_v6 }
 0x1dc   : > { %v2683_v28 = vadd.f32 0.0036580483, %v2682_v43  ;;  %v2695_v34 = vmul.f32 %v2694_v38, %v7464_v56  ;;  %v2121_v13 = vadd.f32 1.1283791, %v2120_v39  ;;  %vm2139_vm13 = vweird.f32 %v5500_v20 }
 0x1dd   : > { %v2136_v62 = vmul.f32 %v5500_v20, %v2135_v19  ;;  %v2142_v0 = vand.u32 2147483647, %v7462_v57  ;;  %v2645_v1 = vadd.f32 0.05243302, %v2644_v53  ;;  %v7506_v41 = vadd.f32 1.0, %v2659_v4 }
 0x1de   : > { %v2696_v22 = vadd.f32 0.112945676, %v2695_v34  ;;  %v2733_v40 = vmul.f32 %v2732_v17, %v7471_v42  ;;  %v5194_v25 = vclamps-f32 %v2107_v36, 1.0  ;;  %vm2138_vm14 = vweird.f32 %v7462_v57  ;;  %v5389_v57 = vld [vmem:[%s9810_s11 + $0x18] sm:$0xff] }
 0x1df   : > { %v2137_v50 = vadd.f32 %v5500_v20, %v2136_v62  ;;  %v7511_v43 = vadd.f32 %v7343_v27, %v2573_v59  ;;  %vm2140_vm15 = vmor %vm2138_vm14, %vm2139_vm13  ;;  %v2145_v33 = vor.u32 1.1754944e-38, %v2144_v15  ;;  %5503 = vrcp.f32 %v7506_v41  ;;  %3378 = vmatpush.bf16.msrb.mxu1 %v5389_v57 }
 0x1e0   : > { %v2684_v26 = vmul.f32 %v2683_v28, %v7464_v56  ;;  %v7516_v39 = vadd.f32 %v7343_v27, %v2576_v18  ;;  %v2122_v32 = vmul.f32 %v2121_v13, %v7285_v60  ;;  %vm2143_vm0 = vcmp.eq.f32.partialorder %v2142_v0, 8.507059e+37 }
 0x1e1   : > { %v2141_v53 = vsel %vm2140_vm15, %v5500_v20, %v2137_v50  ;;  %v2697_v49 = vmul.f32 %v2696_v22, %v7464_v56  ;;  %v2256_v59 = vmul.f32 %v2240_v7, %v7248_v63  ;;  %v2646_v17 = vmul.f32 %v2645_v1, %v7406_v6 }
 0x1e2   : > { %v2146_v38 = vsel %vm2143_vm0, %v2145_v33, %v2141_v53  ;;  %v2734_v36 = vadd.f32 0.014752088, %v2733_v40  ;;  %v1188_v19 = vmul.f32 %v7457_v46, %v7364_v29  ;;  %v1201_v15 = vmul.f32 %v1200_v2, %v7364_v29  ;;  %v5388_v2 = vld [vmem:[%s9810_s11 + $0x10] sm:$0xff] }
 0x1e3   : > { %v2147_v60 = vmul.f32 %v2146_v38, %v2122_v32  ;;  %v2698_v20 = vadd.f32 0.4994258, %v2697_v49  ;;  %v2685_v4 = vadd.f32 0.05243302, %v2684_v26  ;;  %v7529_v28 = vmul.f32 0.70710677, %v7511_v43  ;;  %3379 = vmatpush.bf16.msrb.mxu1 %v5388_v2 }
 0x1e4   : > { %v7532_v34 = vmul.f32 0.70710677, %v7516_v39  ;;  %v2267_v63 = vpack.c.bf16 %v2257_v52, %v2256_v59  ;;  %v7535_v7 = vmul.f32 0.70710677, %v7491_v10  ;;  %v2242_v13 = vadd.f32 1.0, %v5194_v25 }
 0x1e5   : > { %v5195_v62 = vclamps-f32 %v2147_v60, 1.0  ;;  %v2699_v46 = vmul.f32 %v2698_v20, %v7464_v56  ;;  %v5504_v0 = vpop.eup %5503  ;;  %v1570_v18 = vmul.f32 0.5, %v7141_v23  ;;  %v2647_v1 = vadd.f32 0.18741608, %v2646_v17  ;;  %v5387_v20 = vld [vmem:[%s9810_s11 + $0x8] sm:$0xff] }
 0x1e6   : > { %v2735_v22 = vmul.f32 %v2734_v36, %v7471_v42  ;;  %v2758_v52 = vmul.f32 %v7529_v28, %v7529_v28  ;;  %5219 = vmatmul.msk.bf16.gmra.mxu2 %vm2302_vm2, %v2267_v63  ;;  %v1571_v40 = vmul.f32 0.5, %v7269_v55  ;;  %v2662_v50 = vmul.f32 %v5504_v0, %v7506_v41 }
 0x1e7   : > { %v2243_v25 = vadd.f32 1.0, %v5195_v62  ;;  %v2798_v33 = vmul.f32 %v7532_v34, %v7532_v34  ;;  %v1202_v26 = vadd.f32 0.112945676, %v1201_v15  ;;  %v2686_v23 = vmul.f32 %v2685_v4, %v7464_v56  ;;  %3380 = vmatpush.bf16.msrb.mxu1 %v5387_v20 }
 0x1e8   : > { %v7551_v32 = vadd.f32 1.0, %v2699_v46  ;;  %v7553_v53 = vmin.f32 %v2758_v52, 16.0  ;;  %v2258_v49 = vmul.f32 %v2242_v13, %v1570_v18  ;;  %v2663_v59 = vsub.f32 1.0, %v2662_v50 }
 0x1e9   : > { %v2259_v57 = vmul.f32 %v2243_v25, %v1571_v40  ;;  %v2672_v38 = vand.u32 2147483648, %v7506_v41  ;;  %v2648_v55 = vmul.f32 %v2647_v1, %v7406_v6  ;;  %vm2666_vm1 = vweird.f32 %v7506_v41 }
 0x1ea   : > { %5505 = vrcp.f32 %v7551_v32  ;;  %v2736_v17 = vadd.f32 0.112945676, %v2735_v22  ;;  %v2664_v15 = vmul.f32 %v5504_v0, %v2663_v59  ;;  %vm2667_vm3 = vweird.f32 %v5504_v0 }
 0x1eb   : > { %v2268_v36 = vpack.c.bf16 %v2259_v57, %v2258_v49  ;;  %v7559_v60 = vmin.f32 %v2798_v33, 16.0  ;;  %v7566_v4 = vmul.f32 %v7356_v3, %v7092_v16  ;;  %v2670_v6 = vand.u32 2147483647, %v7506_v41  ;;  %vm2668_vm4 = vmor %vm2666_vm1, %vm2667_vm3  ;;  %v5386_v41 = vld [vmem:[%s9810_s11] sm:$0xff] }
 0x1ec   : > { %v2687_v63 = vadd.f32 0.18741608, %v2686_v23  ;;  %v2771_v13 = vmul.f32 3.8918573e-05, %v7553_v53  ;;  %v7572_v62 = vmul.f32 %v7371_v14, %v7117_v5  ;;  %v1224_v46 = vmul.f32 %v7535_v7, %v7535_v7  ;;  %3381 = vmatpush.bf16.msrb.mxu1 %v5386_v41 }
 0x1ed   : > { %v2665_v2 = vadd.f32 %v5504_v0, %v2664_v15  ;;  %v2673_v18 = vor.u32 1.1754944e-38, %v2672_v38  ;;  %5220 = vmatmul.msk.bf16.vlgmr.msra.gmra.mxu3 %vm2302_vm2, %v2268_v36  ;;  %v5155_v16 = vclamps-f32 %v7375_v30, 1.0  ;;  %v1189_v3 = vadd.f32 0.0036580483, %v1188_v19 }
 0x1ee   : > { %v7580_v1 = vadd.f32 %v7292_v35, %v7250_v45  ;;  %v2649_v22 = vadd.f32 1.1283791, %v2648_v55  ;;  %v2737_v14 = vmul.f32 %v2736_v17, %v7471_v42  ;;  %v2772_v52 = vadd.f32 0.001143296, %v2771_v13  ;;  %v2578_v35 = vpop.f32.mrf.mxu0 }
 0x1ef   : > { %v2669_v5 = vsel %vm2668_vm4, %v5504_v0, %v2665_v2  ;;  %v2811_v40 = vmul.f32 3.8918573e-05, %v7559_v60  ;;  %v7589_v50 = vmul.f32 %v7500_v54, %v7386_v24  ;;  %v1203_v19 = vmul.f32 %v1202_v26, %v7364_v29 }
 0x1f0   : > { %v5506_v25 = vpop.eup %5505  ;;  %vm2671_vm5 = vcmp.eq.f32.partialorder %v2670_v6, 8.507059e+37  ;;  %v2688_v45 = vmul.f32 %v2687_v63, %v7464_v56  ;;  %v7596_v0 = vmin.f32 %v1224_v46, 16.0  ;;  %v2773_v49 = vmul.f32 %v2772_v52, %v7553_v53 }
 0x1f1   : > { %v2674_v33 = vsel %vm2671_vm5, %v2673_v18, %v2669_v5  ;;  %v2702_v23 = vmul.f32 %v5506_v25, %v7551_v32  ;;  %v7601_v57 = vmul.f32 0.70710677, %v7580_v1  ;;  %v2650_v26 = vmul.f32 %v2649_v22, %v7384_v47 }
 0x1f2   : > { %v2720_v59 = vmul.f32 2.1237322e-06, %v7471_v42  ;;  %v2812_v56 = vadd.f32 0.001143296, %v2811_v40  ;;  %v2738_v55 = vadd.f32 0.4994258, %v2737_v14  ;;  %v7606_v36 = vadd.f32 %v7343_v27, %v2578_v35 }
 0x1f3   : > { %v2703_v38 = vsub.f32 1.0, %v2702_v23  ;;  %v2774_v17 = vadd.f32 0.014752088, %v2773_v49  ;;  %v2675_v15 = vmul.f32 %v2674_v33, %v2650_v26  ;;  %v2689_v20 = vadd.f32 1.1283791, %v2688_v45 }
 0x1f4   : > { %v2710_v6 = vand.u32 2147483647, %v7551_v32  ;;  %v2712_v63 = vand.u32 2147483648, %v7551_v32  ;;  %vm2707_vm6 = vweird.f32 %v5506_v25  ;;  %v2813_v46 = vmul.f32 %v2812_v56, %v7559_v60 }
 0x1f5   : > { %v2704_v13 = vmul.f32 %v5506_v25, %v2703_v38  ;;  %v2775_v47 = vmul.f32 %v2774_v17, %v7553_v53  ;;  %v1204_v2 = vadd.f32 0.4994258, %v1203_v19  ;;  %v1264_v18 = vmul.f32 %v7601_v57, %v7601_v57 }
 0x1f6   : > { %v2721_v22 = vadd.f32 0.00028619796, %v2720_v59  ;;  %v2760_v5 = vmul.f32 2.1237322e-06, %v7553_v53  ;;  %vm2706_vm7 = vweird.f32 %v7551_v32  ;;  %v2739_v52 = vmul.f32 %v2738_v55, %v7471_v42 }
 0x1f7   : > { %v2705_v14 = vadd.f32 %v5506_v25, %v2704_v13  ;;  %v2776_v40 = vadd.f32 0.112945676, %v2775_v47  ;;  %v2690_v45 = vmul.f32 %v2689_v20, %v7443_v31  ;;  %vm2708_vm8 = vmor %vm2706_vm7, %vm2707_vm6  ;;  %vm2711_vm9 = vcmp.eq.f32.partialorder %v2710_v6, 8.507059e+37 }
 0x1f8   : > { %v2713_v35 = vor.u32 1.1754944e-38, %v2712_v63  ;;  %v7619_v41 = vmul.f32 0.70710677, %v7606_v36  ;;  %v5270_v19 = vclamps-f32 %v2675_v15, 1.0  ;;  %v2814_v49 = vadd.f32 0.014752088, %v2813_v46 }
 0x1f9   : > { %v2709_v33 = vsel %vm2708_vm8, %v5506_v25, %v2705_v14  ;;  %v2777_v23 = vmul.f32 %v2776_v40, %v7553_v53  ;;  %v1237_v26 = vmul.f32 3.8918573e-05, %v7596_v0  ;;  %v7623_v59 = vmin.f32 %v1264_v18, 16.0 }
 0x1fa   : > { %v2714_v32 = vsel %vm2711_vm9, %v2713_v35, %v2709_v33  ;;  %v2761_v56 = vadd.f32 0.00028619796, %v2760_v5  ;;  %v1169_v38 = vsub.f32 1.0, %v7589_v50  ;;  %v2838_v17 = vmul.f32 %v7619_v41, %v7619_v41 }
 0x1fb   : > { %v2715_v31 = vmul.f32 %v2714_v32, %v2690_v45  ;;  %v2778_v55 = vadd.f32 0.4994258, %v2777_v23  ;;  %v1190_v20 = vmul.f32 %v1189_v3, %v7364_v29  ;;  %v1205_v25 = vmul.f32 %v1204_v2, %v7364_v29 }
 0x1fc   : > { %v2722_v15 = vmul.f32 %v2721_v22, %v7471_v42  ;;  %v7631_v6 = vadd.f32 1.0, %v2739_v52  ;;  %v3278_v63 = vadd.f32 1.0, %v5270_v19  ;;  %v2815_v46 = vmul.f32 %v2814_v49, %v7559_v60 }
 0x1fd   : > { %v5271_v13 = vclamps-f32 %v2715_v31, 1.0  ;;  %v2779_v47 = vmul.f32 %v2778_v55, %v7553_v53  ;;  %v1238_v50 = vadd.f32 0.001143296, %v1237_v26  ;;  %v1277_v18 = vmul.f32 3.8918573e-05, %v7623_v59 }
 0x1fe   : > { %v2606_v5 = vmul.f32 0.5, %v7361_v9  ;;  %v2762_v14 = vmul.f32 %v2761_v56, %v7553_v53  ;;  %v2607_v3 = vmul.f32 0.5, %v7432_v21  ;;  %v7641_v22 = vmin.f32 %v2838_v17, 16.0 }
 0x1ff   : > { %v3279_v2 = vadd.f32 1.0, %v5271_v13  ;;  %v7639_v40 = vadd.f32 1.0, %v2779_v47  ;;  %v1170_v52 = vmul.f32 %v7500_v54, %v1169_v38  ;;  %v1191_v45 = vadd.f32 0.05243302, %v1190_v20 }
 0x200   : > { %v2723_v35 = vadd.f32 0.0036580483, %v2722_v15  ;;  %5507 = vrcp.f32 %v7631_v6  ;;  %v3294_v19 = vmul.f32 %v3278_v63, %v2606_v5  ;;  %v2816_v9 = vadd.f32 0.112945676, %v2815_v46 }
 0x201   : > { %v3295_v33 = vmul.f32 %v3279_v2, %v2607_v3  ;;  %5509 = vrcp.f32 %v7639_v40  ;;  %v1393_v23 = vadd.f32 1.0, %v5155_v16  ;;  %v7648_v21 = vadd.f32 1.0, %v1205_v25 }
 0x202   : > { %v1278_v49 = vadd.f32 0.001143296, %v1277_v18  ;;  %v2763_v26 = vadd.f32 0.0036580483, %v2762_v14  ;;  %v1178_v32 = vand.u32 2147483648, %v7386_v24  ;;  %v1239_v56 = vmul.f32 %v1238_v50, %v7596_v0 }
 0x203   : > { %v3310_v38 = vpack.c.bf16 %v3295_v33, %v3294_v19  ;;  %v2851_v31 = vmul.f32 3.8918573e-05, %v7641_v22  ;;  %vm1172_vm10 = vweird.f32 %v7386_v24  ;;  %v1176_v55 = vand.u32 2147483647, %v7386_v24 }
 0x204   : > { %v1192_v17 = vmul.f32 %v1191_v45, %v7364_v29  ;;  %v2724_v30 = vmul.f32 %v2723_v35, %v7471_v42  ;;  %v1171_v16 = vadd.f32 %v7500_v54, %v1170_v52  ;;  %vm1173_vm11 = vweird.f32 %v7500_v54 }
 0x205   : > { %v2817_v20 = vmul.f32 %v2816_v9, %v7559_v60  ;;  %v2852_v25 = vadd.f32 0.001143296, %v2851_v31  ;;  %5302 = vmatmul.msk.bf16.vlgmr.msrb.gmra.mxu1 %vm2302_vm2, %v3310_v38  ;;  %5511 = vrcp.f32 %v7648_v21  ;;  %v1226_v63 = vmul.f32 2.1237322e-06, %v7596_v0  ;;  %vm7678_vm12 = vmor %vm1172_vm10, %vm1173_vm11 }
 0x206   : > { %v7661_v15 = vpop.eup %5507  ;;  %v1279_v13 = vmul.f32 %v1278_v49, %v7623_v59  ;;  %v2764_v47 = vmul.f32 %v2763_v26, %v7553_v53  ;;  %v1179_v50 = vor.u32 1.1754944e-38, %v1178_v32  ;;  %v1240_v18 = vadd.f32 0.014752088, %v1239_v56 }
 0x207   : > { %v7667_v46 = vpop.eup %5509  ;;  %v2800_v5 = vmul.f32 2.1237322e-06, %v7559_v60  ;;  %v2853_v14 = vmul.f32 %v2852_v25, %v7641_v22  ;;  %v7672_v3 = vmul.f32 %v1393_v23, %v7041_v44  ;;  %v1193_v52 = vadd.f32 0.18741608, %v1192_v17 }
 0x208   : > { %v2725_v45 = vadd.f32 0.05243302, %v2724_v30  ;;  %v2840_v35 = vmul.f32 2.1237322e-06, %v7641_v22  ;;  %v1175_v19 = vsel %vm7678_vm12, %v7500_v54, %v1171_v16  ;;  %v2742_v44 = vmul.f32 %v7661_v15, %v7631_v6 }
 0x209   : > { %v2818_v33 = vadd.f32 0.4994258, %v2817_v20  ;;  %v2854_v9 = vadd.f32 0.014752088, %v2853_v14  ;;  %v1227_v23 = vadd.f32 0.00028619796, %v1226_v63  ;;  %v2782_v26 = vmul.f32 %v7667_v46, %v7639_v40 }
 0x20a   : > { %v1280_v49 = vadd.f32 0.014752088, %v1279_v13  ;;  %v2765_v24 = vadd.f32 0.05243302, %v2764_v47  ;;  %vm1177_vm13 = vcmp.eq.f32.partialorder %v1176_v55, 8.507059e+37  ;;  %v1241_v32 = vmul.f32 %v1240_v18, %v7596_v0 }
 0x20b   : > { %v2801_v56 = vadd.f32 0.00028619796, %v2800_v5  ;;  %v2855_v38 = vmul.f32 %v2854_v9, %v7641_v22  ;;  %v7692_v31 = vpop.eup %5511  ;;  %v1194_v54 = vmul.f32 %v1193_v52, %v7364_v29  ;;  %v2726_v17 = vmul.f32 %v2725_v45, %v7471_v42 }
 0x20c   : > { %v2841_v30 = vadd.f32 0.00028619796, %v2840_v35  ;;  %v2269_v16 = vpack.c.bf16 %v7566_v4, %v7200_v51  ;;  %v1180_v20 = vsel %vm1177_vm13, %v1179_v50, %v1175_v19  ;;  %v2743_v25 = vsub.f32 1.0, %v2742_v44 }
 0x20d   : > { %v2819_v63 = vmul.f32 %v2818_v33, %v7559_v60  ;;  %v2856_v55 = vadd.f32 0.112945676, %v2855_v38  ;;  %v1228_v13 = vmul.f32 %v1227_v23, %v7596_v0  ;;  %v1281_v47 = vmul.f32 %v1280_v49, %v7623_v59 }
 0x20e   : > { %v2766_v18 = vmul.f32 %v2765_v24, %v7553_v53  ;;  %v2783_v5 = vsub.f32 1.0, %v2782_v26  ;;  %5221 = vmatmul.msk.bf16.gmra.mxu3 %vm2302_vm2, %v2269_v16  ;;  %v1208_v29 = vmul.f32 %v7692_v31, %v7648_v21  ;;  %v1242_v14 = vadd.f32 0.112945676, %v1241_v32 }
 0x20f   : > { %v2802_v51 = vmul.f32 %v2801_v56, %v7559_v60  ;;  %v2857_v4 = vmul.f32 %v2856_v55, %v7641_v22  ;;  %v7708_v50 = vmul.f32 %v1180_v20, %v7572_v62  ;;  %v7710_v2 = vadd.f32 1.1283791, %v1194_v54  ;;  %v2581_v62 = vpop.f32.mrf.mxu0 }
 0x210   : > { %v2727_v52 = vadd.f32 0.18741608, %v2726_v17  ;;  %v2842_v45 = vmul.f32 %v2841_v30, %v7641_v22  ;;  %v1218_v35 = vand.u32 2147483648, %v7648_v21  ;;  %v2744_v19 = vmul.f32 %v7661_v15, %v2743_v25 }
 0x211   : > { %v7715_v44 = vadd.f32 1.0, %v2819_v63  ;;  %v2858_v33 = vadd.f32 0.4994258, %v2857_v4  ;;  %v7717_v9 = vadd.f32 0.0036580483, %v1228_v13  ;;  %v2784_v24 = vmul.f32 %v7667_v46, %v2783_v5 }
 0x212   : > { %v1282_v23 = vadd.f32 0.112945676, %v1281_v47  ;;  %v2767_v49 = vadd.f32 0.18741608, %v2766_v18  ;;  %v1209_v26 = vsub.f32 1.0, %v1208_v29  ;;  %v1243_v32 = vmul.f32 %v1242_v14, %v7596_v0 }
 0x213   : > { %v2803_v56 = vadd.f32 0.0036580483, %v2802_v51  ;;  %v2859_v38 = vmul.f32 %v2858_v33, %v7641_v22  ;;  %v2728_v54 = vmul.f32 %v2727_v52, %v7471_v42  ;;  %vm2746_vm14 = vweird.f32 %v7631_v6 }
 0x214   : > { %v2752_v17 = vand.u32 2147483648, %v7631_v6  ;;  %v2843_v30 = vadd.f32 0.0036580483, %v2842_v45  ;;  %v2745_v16 = vadd.f32 %v7661_v15, %v2744_v19  ;;  %vm2747_vm15 = vweird.f32 %v7661_v15 }
 0x215   : > { %5513 = vrcp.f32 %v7715_v44  ;;  %v7728_v20 = vadd.f32 1.0, %v2859_v38  ;;  %v1283_v25 = vmul.f32 %v1282_v23, %v7623_v59  ;;  %v2768_v63 = vmul.f32 %v2767_v49, %v7553_v53  ;;  %vm7740_vm1 = vmor %vm2746_vm14, %vm2747_vm15 }
 0x216   : > { %v2785_v55 = vadd.f32 %v7667_v46, %v2784_v24  ;;  %vm2787_vm0 = vweird.f32 %v7667_v46  ;;  %v2750_v42 = vand.u32 2147483647, %v7631_v6  ;;  %v2792_v13 = vand.u32 2147483648, %v7639_v40 }
 0x217   : > { %v2804_v47 = vmul.f32 %v2803_v56, %v7559_v60  ;;  %5515 = vrcp.f32 %v7728_v20  ;;  %v2753_v5 = vor.u32 1.1754944e-38, %v2752_v17  ;;  %vm2786_vm3 = vweird.f32 %v7639_v40 }
 0x218   : > { %v2790_v53 = vand.u32 2147483647, %v7639_v40  ;;  %v2844_v29 = vmul.f32 %v2843_v30, %v7641_v22  ;;  %v1244_v14 = vadd.f32 0.4994258, %v1243_v32  ;;  %v1266_v51 = vmul.f32 2.1237322e-06, %v7623_v59  ;;  %vm7751_vm4 = vmor %vm2786_vm3, %vm2787_vm0 }
 0x219   : > { %v2729_v4 = vadd.f32 1.1283791, %v2728_v54  ;;  %v2749_v52 = vsel %vm7740_vm1, %v7661_v15, %v2745_v16  ;;  %v1210_v45 = vmul.f32 %v7692_v31, %v1209_v26  ;;  %v1284_v19 = vadd.f32 0.4994258, %v1283_v25  ;;  %v2583_v26 = vpop.f32.mrf.mxu0 }
 0x21a   : > { %v2769_v33 = vadd.f32 1.1283791, %v2768_v63  ;;  %v2789_v40 = vsel %vm7751_vm4, %v7667_v46, %v2785_v55  ;;  %vm2751_vm5 = vcmp.eq.f32.partialorder %v2750_v42, 8.507059e+37  ;;  %v2793_v49 = vor.u32 1.1754944e-38, %v2792_v13 }
 0x21b   : > { %v7759_v23 = vpop.eup %5513  ;;  %v2805_v24 = vadd.f32 0.05243302, %v2804_v47  ;;  %v7762_v32 = vadd.f32 %v7343_v27, %v2581_v62  ;;  %vm1213_vm6 = vweird.f32 %v7692_v31  ;;  %v2754_v15 = vsel %vm2751_vm5, %v2753_v5, %v2749_v52 }
 0x21c   : > { %vm2791_vm7 = vcmp.eq.f32.partialorder %v2790_v53, 8.507059e+37  ;;  %v2845_v56 = vadd.f32 0.05243302, %v2844_v29  ;;  %v1245_v54 = vmul.f32 %v1244_v14, %v7596_v0  ;;  %v1267_v17 = vadd.f32 0.00028619796, %v1266_v51 }
 0x21d   : > { %v7765_v38 = vpop.eup %5515  ;;  %v2730_v46 = vmul.f32 %v2729_v4, %v7446_v58  ;;  %v2794_v30 = vsel %vm2791_vm7, %v2793_v49, %v2789_v40  ;;  %v1285_v16 = vmul.f32 %v1284_v19, %v7623_v59  ;;  %v2770_v25 = vmul.f32 %v2769_v33, %v7529_v28 }
 0x21e   : > { %v2822_v62 = vmul.f32 %v7759_v23, %v7715_v44  ;;  %v2862_v63 = vmul.f32 %v7765_v38, %v7728_v20  ;;  %v1211_v55 = vadd.f32 %v7692_v31, %v1210_v45  ;;  %v2806_v13 = vmul.f32 %v2805_v24, %v7559_v60 }
 0x21f   : > { %v2755_v42 = vmul.f32 %v2754_v15, %v2730_v46  ;;  %v7778_v47 = vmul.f32 0.70710677, %v7762_v32  ;;  %v2795_v58 = vmul.f32 %v2794_v30, %v2770_v25  ;;  %v2846_v18 = vmul.f32 %v2845_v56, %v7641_v22  ;;  %v5374_v15 = vld [vmem:[%s9808_s9 + $0x18] sm:$0xff] }
 0x220   : > { %v2863_v5 = vsub.f32 1.0, %v2862_v63  ;;  %v1419_v28 = vpack.c.bf16 %v7024_v37, %v6995_v12  ;;  %vm1212_vm8 = vweird.f32 %v7648_v21  ;;  %v1216_v53 = vand.u32 2147483647, %v7648_v21  ;;  %2428 = vmatpush.bf16.msrb.mxu3 %v5374_v15 }
 0x221   : > { %v1230_v29 = vmul.f32 %v7717_v9, %v7596_v0  ;;  %v7787_v14 = vadd.f32 1.0, %v1245_v54  ;;  %v1196_v51 = vmul.f32 %v7710_v2, %v7320_v11  ;;  %vm7793_vm9 = vmor %vm1212_vm8, %vm1213_vm6  ;;  %v1268_v52 = vmul.f32 %v1267_v17, %v7623_v59 }
 0x222   : > { %v7798_v6 = vadd.f32 1.0, %v1285_v16  ;;  %v2823_v45 = vsub.f32 1.0, %v2822_v62  ;;  %v1215_v9 = vsel %vm7793_vm9, %v7692_v31, %v1211_v55  ;;  %v5272_v19 = vclamps-f32 %v2755_v42, 1.0 }
 0x223   : > { %v2807_v33 = vadd.f32 0.18741608, %v2806_v13  ;;  %v2878_v11 = vmul.f32 %v7778_v47, %v7778_v47  ;;  %v1219_v2 = vor.u32 1.1754944e-38, %v1218_v35  ;;  %v5273_v40 = vclamps-f32 %v2795_v58, 1.0  ;;  %v2586_v35 = vpop.f32.mrf.mxu0 }
 0x224   : > { %v2847_v49 = vadd.f32 0.18741608, %v2846_v18  ;;  %v2864_v24 = vmul.f32 %v7765_v38, %v2863_v5  ;;  %vm1217_vm10 = vcmp.eq.f32.partialorder %v1216_v53, 8.507059e+37  ;;  %v1231_v56 = vadd.f32 0.05243302, %v1230_v29 }
 0x225   : > { %5517 = vrcp.f32 %v7787_v14  ;;  %v7813_v31 = vadd.f32 %v7343_v27, %v2583_v26  ;;  %v1220_v54 = vsel %vm1217_vm10, %v1219_v2, %v1215_v9  ;;  %v1269_v17 = vadd.f32 0.0036580483, %v1268_v52  ;;  %v5373_v26 = vld [vmem:[%s9808_s9 + $0x10] sm:$0xff] }
 0x226   : > { %5519 = vrcp.f32 %v7798_v6  ;;  %v2824_v21 = vmul.f32 %v7759_v23, %v2823_v45  ;;  %v3280_v46 = vadd.f32 1.0, %v5272_v19  ;;  %v2609_v30 = vmul.f32 0.5, %v7511_v43  ;;  %2429 = vmatpush.bf16.msrb.mxu3 %v5373_v26 }
 0x227   : > { %v2808_v16 = vmul.f32 %v2807_v33, %v7559_v60  ;;  %v7819_v25 = vmin.f32 %v2878_v11, 16.0  ;;  %v3281_v62 = vadd.f32 1.0, %v5273_v40  ;;  %v2848_v63 = vmul.f32 %v2847_v49, %v7641_v22  ;;  %v7873_v49 = vld [vmem:[%s9807_s8] ss:$0 sm:$0xff] }
 0x228   : > { %v2865_v27 = vadd.f32 %v7765_v38, %v2864_v24  ;;  %vm2867_vm11 = vweird.f32 %v7765_v38  ;;  %vm2826_vm12 = vweird.f32 %v7715_v44  ;;  %v2832_v55 = vand.u32 2147483648, %v7715_v44 }
 0x229   : > { %v2872_v43 = vand.u32 2147483648, %v7728_v20  ;;  %v7831_v60 = vmul.f32 0.70710677, %v7813_v31  ;;  %v2825_v42 = vadd.f32 %v7759_v23, %v2824_v21  ;;  %vm2827_vm13 = vweird.f32 %v7759_v23 }
 0x22a   : > { %vm2866_vm14 = vweird.f32 %v7728_v20  ;;  %v2870_v22 = vand.u32 2147483647, %v7728_v20  ;;  %v1221_v58 = vmul.f32 %v1220_v54, %v1196_v51  ;;  %v1270_v18 = vmul.f32 %v1269_v17, %v7623_v59  ;;  %vm7861_vm0 = vmor %vm2826_vm12, %vm2827_vm13 }
 0x22b   : > { %v7837_v13 = vpop.eup %5517  ;;  %v2608_v5 = vmul.f32 0.5, %v7435_v61  ;;  %v2830_v53 = vand.u32 2147483647, %v7715_v44  ;;  %vm7844_vm15 = vmor %vm2866_vm14, %vm2867_vm11  ;;  %v3297_v52 = vmul.f32 %v3281_v62, %v2609_v30  ;;  %v2849_v20 = vadd.f32 1.1283791, %v2848_v63  ;;  %v5372_v61 = vld [vmem:[%s9808_s9 + $0x8] sm:$0xff] }
 0x22c   : > { %v7848_v4 = vpop.eup %5519  ;;  %v2869_v51 = vsel %vm7844_vm15, %v7765_v38, %v2865_v27  ;;  %v2891_v45 = vmul.f32 3.8918573e-05, %v7819_v25  ;;  %v2809_v9 = vadd.f32 1.1283791, %v2808_v16  ;;  %v2833_v33 = vor.u32 1.1754944e-38, %v2832_v55  ;;  %2430 = vmatpush.bf16.msrb.mxu3 %v5372_v61 }
 0x22d   : > { %v2873_v11 = vor.u32 1.1754944e-38, %v2872_v43  ;;  %v2918_v38 = vmul.f32 %v7831_v60, %v7831_v60  ;;  %v3296_v2 = vmul.f32 %v3280_v46, %v2608_v5  ;;  %v2829_v40 = vsel %vm7861_vm0, %v7759_v23, %v2825_v42  ;;  %v2588_v46 = vpop.f32.mrf.mxu0 }
 0x22e   : > { %vm2871_vm1 = vcmp.eq.f32.partialorder %v2870_v22, 8.507059e+37  ;;  %v7876_v44 = vadd.f32 %v7873_v49, %v2586_v35  ;;  %v1248_v24 = vmul.f32 %v7837_v13, %v7787_v14  ;;  %v1271_v15 = vadd.f32 0.05243302, %v1270_v18  ;;  %v5371_v35 = vld [vmem:[%s9808_s9] sm:$0xff] }
 0x22f   : > { %v1288_v54 = vmul.f32 %v7848_v4, %v7798_v6  ;;  %v2874_v17 = vsel %vm2871_vm1, %v2873_v11, %v2869_v51  ;;  %vm2831_vm3 = vcmp.eq.f32.partialorder %v2830_v53, 8.507059e+37  ;;  %v2850_v23 = vmul.f32 %v2849_v20, %v7619_v41  ;;  %v9952_v22 = vld [vmem:[#allocation21_spill] sm:$0xff]  ;;  %v9954_v20 = vld [vmem:[#allocation22_spill] sm:$0xff] }
 0x230   : > { %v2892_v21 = vadd.f32 0.001143296, %v2891_v45  ;;  %v3311_v30 = vpack.c.bf16 %v3297_v52, %v3296_v2  ;;  %v1232_v16 = vmul.f32 %v1231_v56, %v7596_v0  ;;  %v2834_v62 = vsel %vm2831_vm3, %v2833_v33, %v2829_v40  ;;  %2431 = vmatpush.bf16.msrb.mxu3 %v5371_v35  ;;  %v9953_v52 = vld [vmem:[#allocation20_spill] sm:$0xff]  ;;  %v9955_v45 = vld [vmem:[#allocation23_spill] sm:$0xff]  ;;  %v9956_v33 = vld [vmem:[#allocation10_spill] sm:$0xff] }
 0x231   : > { %v7887_v63 = vmin.f32 %v2918_v38, 16.0  ;;  %v5157_v26 = vclamps-f32 %v1221_v58, 1.0  ;;  %v2810_v55 = vmul.f32 %v2809_v9, %v7532_v34  ;;  %v2875_v43 = vmul.f32 %v2874_v17, %v2850_v23  ;;  %v9957_v11 = vld [vmem:[#allocation9_spill] sm:$0xff]  ;;  %v9961_v23 = vld [vmem:[#allocation26_spill] sm:$0xff] }
 0x232   : > { %v7893_v41 = vmul.f32 0.70710677, %v7876_v44  ;;  %5303 = vmatmul.msk.bf16.gmra.mxu1 %vm2302_vm2, %v3311_v30  ;;  %v5151_v42 = vclamps-f32 %v6775_v48, 1.0  ;;  %v7898_v56 = vadd.f32 1.1283791, %v9952_v22  ;;  %v1249_v18 = vsub.f32 1.0, %v1248_v24 }
 0x233   : > { %v1272_v5 = vmul.f32 %v1271_v15, %v7623_v59  ;;  %v5156_v53 = vclamps-f32 %v7708_v50, 1.0  ;;  %v1289_v58 = vsub.f32 1.0, %v1288_v54  ;;  %v2835_v29 = vmul.f32 %v2834_v62, %v2810_v55  ;;  %v9959_v50 = vld [vmem:[#allocation24_spill] sm:$0xff]  ;;  %v9960_v54 = vld [vmem:[#allocation25_spill] sm:$0xff] }
 0x234   : > { %v2893_v34 = vmul.f32 %v2892_v21, %v7819_v25  ;;  %v7905_v51 = vmul.f32 %v9954_v20, %v9953_v52  ;;  %v7908_v61 = vadd.f32 0.0036580483, %v9955_v45  ;;  %v1233_v9 = vadd.f32 0.18741608, %v1232_v16 }
 0x235   : > { %v2931_v19 = vmul.f32 3.8918573e-05, %v7887_v63  ;;  %v9958_v38 = vpack.c.bf16 %v9956_v33, %v9957_v11  ;;  %v7916_v2 = vadd.f32 1.0, %v9959_v50  ;;  %v1395_v40 = vadd.f32 1.0, %v5157_v26 }
 0x236   : > { %v5275_v24 = vclamps-f32 %v2875_v43, 1.0  ;;  %v2958_v15 = vmul.f32 %v7893_v41, %v7893_v41  ;;  %v722_v17 = vmul.f32 0.5, %v9960_v54  ;;  %v723_v21 = vmul.f32 0.5, %v9961_v23 }
 0x237   : > { %5238 = vmatmul.msk.bf16.vlgmr.msrb.gmra.mxu3 %vm2302_vm2, %v9958_v38  ;;  %v1250_v30 = vmul.f32 %v7837_v13, %v1249_v18  ;;  %v1273_v35 = vadd.f32 0.18741608, %v1272_v5  ;;  %v1394_v16 = vadd.f32 1.0, %v5156_v53  ;;  %v1290_v62 = vmul.f32 %v7848_v4, %v1289_v58  ;;  %v2591_v5 = vpop.f32.mrf.mxu0 }
 0x238   : > { %v5274_v55 = vclamps-f32 %v2835_v29, 1.0  ;;  %v2894_v22 = vadd.f32 0.014752088, %v2893_v34  ;;  %v1234_v45 = vmul.f32 %v1233_v9, %v7596_v0  ;;  %vm1252_vm4 = vweird.f32 %v7787_v14 }
 0x239   : > { %v2932_v26 = vadd.f32 0.001143296, %v2931_v19  ;;  %v7927_v43 = vadd.f32 %v7873_v49, %v2588_v46  ;;  %v7929_v33 = vmul.f32 %v1395_v40, %v723_v21  ;;  %v1258_v11 = vand.u32 2147483648, %v7787_v14 }
 0x23a   : > { %v3283_v38 = vadd.f32 1.0, %v5275_v24  ;;  %v7932_v18 = vmin.f32 %v2958_v15, 16.0  ;;  %v1251_v53 = vadd.f32 %v7837_v13, %v1250_v30  ;;  %vm1253_vm5 = vweird.f32 %v7837_v13  ;;  %v9969_v30 = vld [vmem:[#allocation19_spill] sm:$0xff] }
 0x23b   : > { %v1274_v0 = vmul.f32 %v1273_v35, %v7623_v59  ;;  %vm1293_vm6 = vweird.f32 %v7848_v4  ;;  %v1291_v58 = vadd.f32 %v7848_v4, %v1290_v62  ;;  %v3282_v46 = vadd.f32 1.0, %v5274_v55  ;;  %vm7963_vm9 = vmor %vm1252_vm4, %vm1253_vm5 }
 0x23c   : > { %v2611_v29 = vmul.f32 0.5, %v7606_v36  ;;  %v2895_v34 = vmul.f32 %v2894_v22, %v7819_v25  ;;  %vm1292_vm7 = vweird.f32 %v7798_v6  ;;  %v1298_v9 = vand.u32 2147483648, %v7798_v6 }
 0x23d   : > { %v2933_v19 = vmul.f32 %v2932_v26, %v7887_v63  ;;  %v7945_v50 = vmul.f32 0.70710677, %v7927_v43  ;;  %v1296_v59 = vand.u32 2147483647, %v7798_v6  ;;  %v2610_v40 = vmul.f32 0.5, %v7516_v39  ;;  %vm7955_vm8 = vmor %vm1292_vm7, %vm1293_vm6 }
 0x23e   : > { %v3299_v24 = vmul.f32 %v3283_v38, %v2611_v29  ;;  %v2971_v15 = vmul.f32 3.8918573e-05, %v7932_v18  ;;  %v7950_v54 = vmul.f32 %v1394_v16, %v722_v17  ;;  %v1235_v36 = vadd.f32 1.1283791, %v1234_v45 }
 0x23f   : > { %v1256_v23 = vand.u32 2147483647, %v7787_v14  ;;  %v1259_v21 = vor.u32 1.1754944e-38, %v1258_v11  ;;  %v1275_v6 = vadd.f32 1.1283791, %v1274_v0  ;;  %v1295_v17 = vsel %vm7955_vm8, %v7848_v4, %v1291_v58  ;;  %v9966_v0 = vld [vmem:[#allocation11_spill] sm:$0xff] }
 0x240   : > { %v3298_v35 = vmul.f32 %v3282_v46, %v2610_v40  ;;  %v2896_v16 = vadd.f32 0.112945676, %v2895_v34  ;;  %v1255_v62 = vsel %vm7963_vm9, %v7837_v13, %v1251_v53  ;;  %v1299_v55 = vor.u32 1.1754944e-38, %v1298_v9  ;;  %v9967_v58 = vld [vmem:[#allocation15_spill] sm:$0xff]  ;;  %v9968_v13 = vld [vmem:[#allocation14_spill] sm:$0xff]  ;;  %v2593_v9 = vpop.f32.mrf.mxu0 }
 0x241   : > { %v2934_v22 = vadd.f32 0.014752088, %v2933_v19  ;;  %v2998_v14 = vmul.f32 %v7945_v50, %v7945_v50  ;;  %vm1297_vm10 = vcmp.eq.f32.partialorder %v1296_v59, 8.507059e+37  ;;  %v2972_v45 = vadd.f32 0.001143296, %v2971_v15 }
 0x242   : > { %v3312_v26 = vpack.c.bf16 %v3299_v24, %v3298_v35  ;;  %5521 = vrcp.f32 %v7916_v2  ;;  %v1300_v4 = vsel %vm1297_vm10, %v1299_v55, %v1295_v17  ;;  %v2880_v38 = vmul.f32 2.1237322e-06, %v7819_v25 }
 0x243   : > { %v1417_v46 = vpack.c.bf16 %v9967_v58, %v9966_v0  ;;  %v7983_v53 = vmul.f32 %v7898_v56, %v9968_v13  ;;  %vm1257_vm11 = vcmp.eq.f32.partialorder %v1256_v23, 8.507059e+37  ;;  %v1276_v29 = vmul.f32 %v1275_v6, %v7601_v57 }
 0x244   : > { %v2897_v34 = vmul.f32 %v2896_v16, %v7819_v25  ;;  %5304 = vmatmul.msk.bf16.gmra.mxu1 %vm2302_vm2, %v3312_v26  ;;  %v1329_v19 = vsub.f32 1.0, %v7905_v51  ;;  %v1260_v59 = vsel %vm1257_vm11, %v1259_v21, %v1255_v62  ;;  %v2935_v40 = vmul.f32 %v2934_v22, %v7887_v63 }
 0x245   : > { %v7990_v24 = vmin.f32 %v2998_v14, 16.0  ;;  %v1236_v56 = vmul.f32 %v1235_v36, %v7535_v7  ;;  %v1301_v15 = vmul.f32 %v1300_v4, %v1276_v29  ;;  %v2973_v23 = vmul.f32 %v2972_v45, %v7932_v18 }
 0x246   : > { %v7996_v57 = vadd.f32 %v7873_v49, %v2591_v5  ;;  %vm1332_vm12 = vweird.f32 %v9953_v52  ;;  %v1350_v51 = vmul.f32 %v7908_v61, %v9969_v30  ;;  %v2881_v21 = vadd.f32 0.00028619796, %v2880_v38 }
 0x247   : > { %5239 = vmatmul.msk.bf16.gmra.mxu3 %vm2302_vm2, %v1417_v46  ;;  %v8002_v39 = vadd.f32 %v7873_v49, %v2593_v9  ;;  %v1336_v6 = vand.u32 2147483647, %v9953_v52  ;;  %v1338_v17 = vand.u32 2147483648, %v9953_v52  ;;  %v1261_v7 = vmul.f32 %v1260_v59, %v1236_v56 }
 0x248   : > { %v2898_v36 = vadd.f32 0.4994258, %v2897_v34  ;;  %v8006_v35 = vpop.eup %5521  ;;  %v1330_v5 = vmul.f32 %v9954_v20, %v1329_v19  ;;  %v2920_v16 = vmul.f32 2.1237322e-06, %v7887_v63  ;;  %v2936_v62 = vadd.f32 0.112945676, %v2935_v40 }
 0x249   : > { %v3011_v55 = vmul.f32 3.8918573e-05, %v7990_v24  ;;  %v1389_v61 = vadd.f32 1.0, %v5151_v42  ;;  %v5159_v22 = vclamps-f32 %v1301_v15, 1.0  ;;  %v2974_v14 = vadd.f32 0.014752088, %v2973_v23 }
 0x24a   : > { %v8014_v45 = vmul.f32 0.70710677, %v7996_v57  ;;  %vm1333_vm13 = vweird.f32 %v9954_v20  ;;  %v1351_v26 = vadd.f32 0.05243302, %v1350_v51  ;;  %v2882_v4 = vmul.f32 %v2881_v21, %v7819_v25  ;;  %v9974_v15 = vld [vmem:[#allocation12_spill] sm:$0xff] }
 0x24b   : > { %v8019_v38 = vmul.f32 0.70710677, %v8002_v39  ;;  %vm8021_vm14 = vcmp.eq.f32.partialorder %v1336_v6, 8.507059e+37  ;;  %v1368_v48 = vmul.f32 %v8006_v35, %v7916_v2  ;;  %v5158_v42 = vclamps-f32 %v1261_v7, 1.0  ;;  %vm8032_vm15 = vmor %vm1332_vm12, %vm1333_vm13 }
 0x24c   : > { %v2899_v58 = vmul.f32 %v2898_v36, %v7819_v25  ;;  %v1331_v46 = vadd.f32 %v9954_v20, %v1330_v5  ;;  %v2921_v13 = vadd.f32 0.00028619796, %v2920_v16  ;;  %v2937_v29 = vmul.f32 %v2936_v62, %v7887_v63 }
 0x24d   : > { %v3012_v34 = vadd.f32 0.001143296, %v3011_v55  ;;  %v1339_v19 = vor.u32 1.1754944e-38, %v1338_v17  ;;  %v1397_v59 = vadd.f32 1.0, %v5159_v22  ;;  %v2975_v40 = vmul.f32 %v2974_v14, %v7932_v18 }
 0x24e   : > { %v3038_v56 = vmul.f32 %v8014_v45, %v8014_v45  ;;  %v1405_v23 = vmul.f32 %v1389_v61, %v9974_v15  ;;  %v1352_v51 = vmul.f32 %v1351_v26, %v9969_v30  ;;  %v2883_v21 = vadd.f32 0.0036580483, %v2882_v4 }
 0x24f   : > { %v3078_v6 = vmul.f32 %v8019_v38, %v8019_v38  ;;  %v1369_v52 = vsub.f32 1.0, %v1368_v48  ;;  %v1396_v7 = vadd.f32 1.0, %v5158_v42  ;;  %v725_v36 = vmul.f32 0.5, %v7580_v1  ;;  %v9975_v42 = vld [vmem:[#allocation16_spill] sm:$0xff] }
 0x250   : > { %v8044_v5 = vadd.f32 1.0, %v2899_v58  ;;  %v1335_v17 = vsel %vm8032_vm15, %v9954_v20, %v1331_v46  ;;  %v2922_v16 = vmul.f32 %v2921_v13, %v7887_v63  ;;  %v2938_v62 = vadd.f32 0.4994258, %v2937_v29 }
 0x251   : > { %v3013_v55 = vmul.f32 %v3012_v34, %v7990_v24  ;;  %v724_v61 = vmul.f32 0.5, %v7491_v10  ;;  %v8052_v22 = vmul.f32 %v1397_v59, %v725_v36  ;;  %v2976_v14 = vadd.f32 0.112945676, %v2975_v40  ;;  %v2596_v10 = vpop.f32.mrf.mxu0 }
 0x252   : > { %v8054_v26 = vmin.f32 %v3038_v56, 16.0  ;;  %v1353_v4 = vadd.f32 0.18741608, %v1352_v51  ;;  %v2884_v1 = vmul.f32 %v2883_v21, %v7819_v25  ;;  %v8057_v48 = vmin.f32 %v3078_v6, 16.0 }
 0x253   : > { %v1418_v58 = vpack.c.bf16 %v1405_v23, %v9975_v42  ;;  %v1340_v20 = vsel %vm8021_vm14, %v1339_v19, %v1335_v17  ;;  %v1370_v46 = vmul.f32 %v8006_v35, %v1369_v52  ;;  %v8063_v13 = vmul.f32 %v1396_v7, %v724_v61 }
 0x254   : > { %5523 = vrcp.f32 %v8044_v5  ;;  %vm1372_vm0 = vweird.f32 %v7916_v2  ;;  %v2923_v29 = vadd.f32 0.0036580483, %v2922_v16  ;;  %v2939_v34 = vmul.f32 %v2938_v62, %v7887_v63 }
 0x255   : > { %v3014_v9 = vadd.f32 0.014752088, %v3013_v55  ;;  %vm1373_vm1 = vweird.f32 %v8006_v35  ;;  %v2977_v0 = vmul.f32 %v2976_v14, %v7932_v18  ;;  %v3051_v19 = vmul.f32 3.8918573e-05, %v8054_v26 }
 0x256   : > { %v1354_v40 = vmul.f32 %v1353_v4, %v9969_v30  ;;  %v2885_v56 = vadd.f32 0.05243302, %v2884_v1  ;;  %v3091_v15 = vmul.f32 3.8918573e-05, %v8057_v48  ;;  %v8077_v23 = vadd.f32 %v7873_v49, %v2596_v10  ;;  %vm8085_vm3 = vmor %vm1372_vm0, %vm1373_vm1 }
 0x257   : > { %5240 = vmatmul.msk.bf16.gmra.mxu3 %vm2302_vm2, %v1418_v58  ;;  %v1371_v51 = vadd.f32 %v8006_v35, %v1370_v46  ;;  %v1376_v21 = vand.u32 2147483647, %v7916_v2  ;;  %v1378_v6 = vand.u32 2147483648, %v7916_v2  ;;  %v2960_v52 = vmul.f32 2.1237322e-06, %v7932_v18 }
 0x258   : > { %v2924_v30 = vmul.f32 %v2923_v29, %v7887_v63  ;;  %v8090_v36 = vadd.f32 1.0, %v2939_v34  ;;  %v3015_v17 = vmul.f32 %v3014_v9, %v7990_v24  ;;  %v1341_v62 = vmul.f32 %v1340_v20, %v7983_v53  ;;  %v9978_v9 = vld [vmem:[#allocation18_spill] sm:$0xff] }
 0x259   : > { %v2978_v55 = vadd.f32 0.4994258, %v2977_v0  ;;  %v3052_v61 = vadd.f32 0.001143296, %v3051_v19  ;;  %v1355_v14 = vadd.f32 1.1283791, %v1354_v40  ;;  %v2886_v4 = vmul.f32 %v2885_v56, %v7819_v25 }
 0x25a   : > { %v8093_v16 = vpop.eup %5523  ;;  %v3092_v2 = vadd.f32 0.001143296, %v3091_v15  ;;  %v8098_v1 = vmul.f32 0.70710677, %v8077_v23  ;;  %v1375_v42 = vsel %vm8085_vm3, %v8006_v35, %v1371_v51  ;;  %vm1377_vm4 = vcmp.eq.f32.partialorder %v1376_v21, 8.507059e+37  ;;  %v9979_v56 = vld [vmem:[#allocation13_spill] sm:$0xff] }
 0x25b   : > { %v1379_v58 = vor.u32 1.1754944e-38, %v1378_v6  ;;  %v2961_v46 = vadd.f32 0.00028619796, %v2960_v52  ;;  %v2902_v10 = vmul.f32 %v8093_v16, %v8044_v5  ;;  %v2925_v53 = vadd.f32 0.05243302, %v2924_v30 }
 0x25c   : > { %5525 = vrcp.f32 %v8090_v36  ;;  %v3016_v20 = vadd.f32 0.112945676, %v3015_v17  ;;  %v2979_v29 = vmul.f32 %v2978_v55, %v7932_v18  ;;  %v3053_v34 = vmul.f32 %v3052_v61, %v8054_v26  ;;  %v2598_v55 = vpop.f32.mrf.mxu0  ;;  %v9980_v61 = vld [vmem:[#allocation17_spill] sm:$0xff] }
 0x25d   : > { %v1356_v0 = vmul.f32 %v1355_v14, %v9978_v9  ;;  %v2887_v19 = vadd.f32 0.18741608, %v2886_v4  ;;  %v3093_v40 = vmul.f32 %v3092_v2, %v8057_v48  ;;  %v3118_v35 = vmul.f32 %v8098_v1, %v8098_v1 }
 0x25e   : > { %v726_v15 = vmul.f32 0.5, %v9979_v56  ;;  %v1380_v51 = vsel %vm1377_vm4, %v1379_v58, %v1375_v42  ;;  %v2962_v21 = vmul.f32 %v2961_v46, %v7932_v18  ;;  %v3000_v6 = vmul.f32 2.1237322e-06, %v7990_v24 }
 0x25f   : > { %v5160_v52 = vclamps-f32 %v1341_v62, 1.0  ;;  %v2903_v7 = vsub.f32 1.0, %v2902_v10  ;;  %v2926_v30 = vmul.f32 %v2925_v53, %v7887_v63  ;;  %v3017_v17 = vmul.f32 %v3016_v20, %v7990_v24 }
 0x260   : > { %v8118_v14 = vmul.f32 0.5, %v9980_v61  ;;  %v8120_v4 = vadd.f32 1.0, %v2979_v29  ;;  %v3054_v2 = vadd.f32 0.014752088, %v3053_v34  ;;  %v8123_v9 = vadd.f32 %v7873_v49, %v2598_v55 }
 0x261   : > { %v8127_v58 = vmul.f32 %v1380_v51, %v1356_v0  ;;  %v2888_v62 = vmul.f32 %v2887_v19, %v7819_v25  ;;  %v3094_v46 = vadd.f32 0.014752088, %v3093_v40  ;;  %v8130_v10 = vmin.f32 %v3118_v35, 16.0 }
 0x262   : > { %v8125_v42 = vpop.eup %5525  ;;  %v2963_v53 = vadd.f32 0.0036580483, %v2962_v21  ;;  %v3001_v20 = vadd.f32 0.00028619796, %v3000_v6  ;;  %v8133_v56 = vmul.f32 0.70710677, %v8123_v9  ;;  %v2904_v34 = vmul.f32 %v8093_v16, %v2903_v7 }
 0x263   : > { %v1398_v29 = vadd.f32 1.0, %v5160_v52  ;;  %v2927_v61 = vadd.f32 0.18741608, %v2926_v30  ;;  %v3018_v55 = vadd.f32 0.4994258, %v3017_v17  ;;  %v2942_v25 = vmul.f32 %v8125_v42, %v8090_v36 }
 0x264   : > { %5527 = vrcp.f32 %v8120_v4  ;;  %v3055_v0 = vmul.f32 %v3054_v2, %v8054_v26  ;;  %v3158_v19 = vmul.f32 %v8133_v56, %v8133_v56  ;;  %v5161_v40 = vclamps-f32 %v8127_v58, 1.0 }
 0x265   : > { %v2889_v35 = vadd.f32 1.1283791, %v2888_v62  ;;  %v3095_v51 = vmul.f32 %v3094_v46, %v8057_v48  ;;  %v3131_v21 = vmul.f32 3.8918573e-05, %v8130_v10  ;;  %vm2906_vm5 = vweird.f32 %v8044_v5 }
 0x266   : > { %v2964_v12 = vmul.f32 %v2963_v53, %v7932_v18  ;;  %v3002_v37 = vmul.f32 %v3001_v20, %v7990_v24  ;;  %vm2907_vm6 = vweird.f32 %v8093_v16  ;;  %v2910_v6 = vand.u32 2147483647, %v8044_v5 }
 0x267   : > { %5241 = vmatmul.msk.bf16.gmra.mxu3 %vm2302_vm2, %v1419_v28  ;;  %v8152_v28 = vmin.f32 %v3158_v19, 16.0  ;;  %v2912_v52 = vand.u32 2147483648, %v8044_v5  ;;  %v3019_v7 = vmul.f32 %v3018_v55, %v7990_v24  ;;  %v2905_v30 = vadd.f32 %v8093_v16, %v2904_v34  ;;  %vm8171_vm7 = vmor %vm2906_vm5, %vm2907_vm6 }
 0x268   : > { %v2928_v17 = vmul.f32 %v2927_v61, %v7887_v63  ;;  %v2943_v2 = vsub.f32 1.0, %v2942_v25  ;;  %v3056_v58 = vadd.f32 0.112945676, %v3055_v0  ;;  %v8160_v62 = vmul.f32 %v1398_v29, %v726_v15 }
 0x269   : > { %v3096_v46 = vadd.f32 0.112945676, %v3095_v51  ;;  %v3132_v53 = vadd.f32 0.001143296, %v3131_v21  ;;  %v3171_v20 = vmul.f32 3.8918573e-05, %v8152_v28  ;;  %v2890_v59 = vmul.f32 %v2889_v35, %v7778_v47 }
 0x26a   : > { %v8163_v19 = vpop.eup %5527  ;;  %v2965_v11 = vadd.f32 0.05243302, %v2964_v12  ;;  %v3003_v27 = vadd.f32 0.0036580483, %v3002_v37  ;;  %v3040_v55 = vmul.f32 2.1237322e-06, %v8054_v26  ;;  %v2909_v61 = vsel %vm8171_vm7, %v8093_v16, %v2905_v30 }
 0x26b   : > { %vm8175_vm8 = vcmp.eq.f32.partialorder %v2910_v6, 8.507059e+37  ;;  %v2913_v29 = vor.u32 1.1754944e-38, %v2912_v52  ;;  %v8179_v34 = vadd.f32 1.0, %v3019_v7  ;;  %v3172_v47 = vadd.f32 0.001143296, %v3171_v20 }
 0x26c   : > { %v2929_v25 = vadd.f32 1.1283791, %v2928_v17  ;;  %v2944_v0 = vmul.f32 %v8125_v42, %v2943_v2  ;;  %v3057_v5 = vmul.f32 %v3056_v58, %v8054_v26  ;;  %v2982_v35 = vmul.f32 %v8163_v19, %v8120_v4 }
 0x26d   : > { %v3097_v51 = vmul.f32 %v3096_v46, %v8057_v48  ;;  %v3133_v21 = vmul.f32 %v3132_v53, %v8130_v10  ;;  %v3173_v12 = vmul.f32 %v3172_v47, %v8152_v28  ;;  %vm2946_vm9 = vweird.f32 %v8090_v36 }
 0x26e   : > { %v2966_v37 = vmul.f32 %v2965_v11, %v7932_v18  ;;  %v3004_v16 = vmul.f32 %v3003_v27, %v7990_v24  ;;  %v3041_v6 = vadd.f32 0.00028619796, %v3040_v55  ;;  %v2914_v52 = vsel %vm8175_vm8, %v2913_v29, %v2909_v61 }
 0x26f   : > { %v2950_v7 = vand.u32 2147483647, %v8090_v36  ;;  %5529 = vrcp.f32 %v8179_v34  ;;  %v3080_v30 = vmul.f32 2.1237322e-06, %v8057_v48  ;;  %v2945_v17 = vadd.f32 %v8125_v42, %v2944_v0 }
 0x270   : > { %vm2947_vm10 = vweird.f32 %v8125_v42  ;;  %v3058_v2 = vadd.f32 0.4994258, %v3057_v5  ;;  %v3174_v58 = vadd.f32 0.014752088, %v3173_v12  ;;  %v2952_v11 = vand.u32 2147483648, %v8090_v36 }
 0x271   : > { %v2983_v46 = vsub.f32 1.0, %v2982_v35  ;;  %v3098_v27 = vadd.f32 0.4994258, %v3097_v51  ;;  %v3134_v53 = vadd.f32 0.014752088, %v3133_v21  ;;  %v2915_v20 = vmul.f32 %v2914_v52, %v2890_v59  ;;  %vm8211_vm11 = vmor %vm2946_vm9, %vm2947_vm10  ;;  %v2601_v52 = vpop.f32.mrf.mxu0 }
 0x272   : > { %v2967_v55 = vadd.f32 0.18741608, %v2966_v37  ;;  %v3005_v63 = vadd.f32 0.05243302, %v3004_v16  ;;  %v3042_v15 = vmul.f32 %v3041_v6, %v8054_v26  ;;  %v8203_v29 = vadd.f32 1.0, %v5161_v40 }
 0x273   : > { %v8206_v47 = vmul.f32 0.5, %v7762_v32  ;;  %v2930_v61 = vmul.f32 %v2929_v25, %v7831_v60  ;;  %v3081_v5 = vadd.f32 0.00028619796, %v3080_v30  ;;  %v9987_v59 = vpack.c.bf16 %v7672_v3, %v7203_v8 }
 0x274   : > { %v2949_v40 = vsel %vm8211_vm11, %v8125_v42, %v2945_v17  ;;  %vm2951_vm12 = vcmp.eq.f32.partialorder %v2950_v7, 8.507059e+37  ;;  %v3059_v32 = vmul.f32 %v3058_v2, %v8054_v26  ;;  %v3175_v60 = vmul.f32 %v3174_v58, %v8152_v28 }
 0x275   : > { %v8224_v36 = vpop.eup %5529  ;;  %v2953_v25 = vor.u32 1.1754944e-38, %v2952_v11  ;;  %v2984_v35 = vmul.f32 %v8163_v19, %v2983_v46  ;;  %v3099_v51 = vmul.f32 %v3098_v27, %v8057_v48  ;;  %v3135_v8 = vmul.f32 %v3134_v53, %v8130_v10 }
 0x276   : > { %v5276_v3 = vclamps-f32 %v2915_v20, 1.0  ;;  %v2968_v21 = vmul.f32 %v2967_v55, %v7932_v18  ;;  %v3006_v12 = vmul.f32 %v3005_v63, %v7990_v24  ;;  %v3043_v42 = vadd.f32 0.0036580483, %v3042_v15 }
 0x277   : > { %5242 = vmatmul.msk.bf16.gmra.mxu3 %vm2302_vm2, %v9987_v59  ;;  %v2954_v37 = vsel %vm2951_vm12, %v2953_v25, %v2949_v40  ;;  %vm2986_vm13 = vweird.f32 %v8120_v4  ;;  %v2992_v16 = vand.u32 2147483648, %v8120_v4  ;;  %v3082_v6 = vmul.f32 %v3081_v5, %v8057_v48 }
 0x278   : > { %v3022_v7 = vmul.f32 %v8224_v36, %v8179_v34  ;;  %v8236_v30 = vadd.f32 1.0, %v3059_v32  ;;  %v3176_v17 = vadd.f32 0.112945676, %v3175_v60  ;;  %v8239_v2 = vadd.f32 %v7873_v49, %v2601_v52 }
 0x279   : > { %v2985_v18 = vadd.f32 %v8163_v19, %v2984_v35  ;;  %vm2987_vm14 = vweird.f32 %v8163_v19  ;;  %v8243_v58 = vadd.f32 1.0, %v3099_v51  ;;  %v3136_v11 = vadd.f32 0.112945676, %v3135_v8 }
 0x27a   : > { %v2955_v46 = vmul.f32 %v2954_v37, %v2930_v61  ;;  %v3007_v27 = vadd.f32 0.18741608, %v3006_v12  ;;  %v3044_v53 = vmul.f32 %v3043_v42, %v8054_v26  ;;  %v8247_v20 = vmul.f32 0.70710677, %v8239_v2  ;;  %vm8253_vm15 = vmor %vm2986_vm13, %vm2987_vm14 }
 0x27b   : > { %v2613_v55 = vmul.f32 0.5, %v7813_v31  ;;  %v2990_v63 = vand.u32 2147483647, %v8120_v4  ;;  %v2993_v15 = vor.u32 1.1754944e-38, %v2992_v16  ;;  %v3083_v0 = vadd.f32 0.0036580483, %v3082_v6 }
 0x27c   : > { %v3023_v59 = vsub.f32 1.0, %v3022_v7  ;;  %5531 = vrcp.f32 %v8236_v30  ;;  %v3177_v61 = vmul.f32 %v3176_v17, %v8152_v28  ;;  %v3198_v40 = vmul.f32 %v8247_v20, %v8247_v20 }
 0x27d   : > { %v2969_v32 = vadd.f32 1.1283791, %v2968_v21  ;;  %v2989_v31 = vsel %vm8253_vm15, %v8163_v19, %v2985_v18  ;;  %5533 = vrcp.f32 %v8243_v58  ;;  %v3137_v4 = vmul.f32 %v3136_v11, %v8130_v10 }
 0x27e   : > { %v3284_v60 = vadd.f32 1.0, %v5276_v3  ;;  %v5277_v25 = vclamps-f32 %v2955_v46, 1.0  ;;  %v3008_v35 = vmul.f32 %v3007_v27, %v7990_v24  ;;  %v3045_v51 = vadd.f32 0.05243302, %v3044_v53 }
 0x27f   : > { %v8268_v8 = vmul.f32 0.5, %v7876_v44  ;;  %vm2991_vm0 = vcmp.eq.f32.partialorder %v2990_v63, 8.507059e+37  ;;  %v3120_v12 = vmul.f32 2.1237322e-06, %v8130_v10  ;;  %v8271_v21 = vmin.f32 %v3198_v40, 16.0 }
 0x280   : > { %v2994_v42 = vsel %vm2991_vm0, %v2993_v15, %v2989_v31  ;;  %v3024_v19 = vmul.f32 %v8224_v36, %v3023_v59  ;;  %v3084_v37 = vmul.f32 %v3083_v0, %v8057_v48  ;;  %v3178_v16 = vadd.f32 0.4994258, %v3177_v61 }
 0x281   : > { %v2970_v3 = vmul.f32 %v2969_v32, %v7893_v41  ;;  %v3138_v6 = vadd.f32 0.4994258, %v3137_v4  ;;  %v3160_v24 = vmul.f32 2.1237322e-06, %v8152_v28  ;;  %v3211_v52 = vmul.f32 3.8918573e-05, %v8271_v21 }
 0x282   : > { %v8278_v44 = vpop.eup %5531  ;;  %v3300_v7 = vmul.f32 %v3284_v60, %v8206_v47  ;;  %v3285_v17 = vadd.f32 1.0, %v5277_v25  ;;  %v3009_v18 = vadd.f32 1.1283791, %v3008_v35  ;;  %v3046_v11 = vmul.f32 %v3045_v51, %v8054_v26 }
 0x283   : > { %v8282_v46 = vpop.eup %5533  ;;  %v2995_v27 = vmul.f32 %v2994_v42, %v2970_v3  ;;  %v3032_v53 = vand.u32 2147483648, %v8179_v34  ;;  %v3121_v63 = vadd.f32 0.00028619796, %v3120_v12  ;;  %v3212_v41 = vadd.f32 0.001143296, %v3211_v52 }
 0x284   : > { %v9990_v15 = vpack.c.bf16 %v7929_v33, %v7950_v54  ;;  %v3025_v0 = vadd.f32 %v8224_v36, %v3024_v19  ;;  %vm3027_vm1 = vweird.f32 %v8224_v36  ;;  %v3085_v47 = vadd.f32 0.05243302, %v3084_v37 }
 0x285   : > { %v3179_v5 = vmul.f32 %v3178_v16, %v8152_v28  ;;  %v3062_v59 = vmul.f32 %v8278_v44, %v8236_v30  ;;  %v3139_v61 = vmul.f32 %v3138_v6, %v8130_v10  ;;  %v3161_v40 = vadd.f32 0.00028619796, %v3160_v24 }
 0x286   : > { %v3213_v32 = vmul.f32 %v3212_v41, %v8271_v21  ;;  %vm3026_vm3 = vweird.f32 %v8179_v34  ;;  %v3030_v33 = vand.u32 2147483647, %v8179_v34  ;;  %v3047_v54 = vadd.f32 0.18741608, %v3046_v11 }
 0x287   : > { %5243 = vmatmul.msk.bf16.gmra.mxu3 %vm2302_vm2, %v9990_v15  ;;  %v3102_v31 = vmul.f32 %v8282_v46, %v8243_v58  ;;  %v3301_v4 = vmul.f32 %v3285_v17, %v2613_v55  ;;  %v5278_v60 = vclamps-f32 %v2995_v27, 1.0  ;;  %vm8300_vm4 = vmor %vm3026_vm3, %vm3027_vm1  ;;  %v3122_v35 = vmul.f32 %v3121_v63, %v8130_v10  ;;  %v2603_v15 = vpop.f32.mrf.mxu0 }
 0x288   : > { %v3214_v51 = vadd.f32 0.014752088, %v3213_v32  ;;  %v3029_v12 = vsel %vm8300_vm4, %v8224_v36, %v3025_v0  ;;  %v3033_v42 = vor.u32 1.1754944e-38, %v3032_v53  ;;  %v3086_v34 = vmul.f32 %v3085_v47, %v8057_v48 }
 0x289   : > { %v8309_v19 = vadd.f32 1.0, %v3179_v5  ;;  %v3063_v37 = vsub.f32 1.0, %v3062_v59  ;;  %v8311_v16 = vadd.f32 1.0, %v3139_v61  ;;  %v3162_v55 = vmul.f32 %v3161_v40, %v8152_v28 }
 0x28a   : > { %v3215_v3 = vmul.f32 %v3214_v51, %v8271_v21  ;;  %v3010_v6 = vmul.f32 %v3009_v18, %v7945_v50  ;;  %vm3031_vm5 = vcmp.eq.f32.partialorder %v3030_v33, 8.507059e+37  ;;  %v3048_v24 = vmul.f32 %v3047_v54, %v8054_v26 }
 0x28b   : > { %v3103_v52 = vsub.f32 1.0, %v3102_v31  ;;  %v3034_v17 = vsel %vm3031_vm5, %v3033_v42, %v3029_v12  ;;  %v3070_v36 = vand.u32 2147483647, %v8236_v30  ;;  %v3123_v11 = vadd.f32 0.0036580483, %v3122_v35 }
 0x28c   : > { %v3216_v27 = vadd.f32 0.112945676, %v3215_v3  ;;  %v3072_v53 = vand.u32 2147483648, %v8236_v30  ;;  %v3087_v63 = vadd.f32 0.18741608, %v3086_v34  ;;  %5535 = vrcp.f32 %v8309_v19 }
 0x28d   : > { %v3313_v41 = vpack.c.bf16 %v3301_v4, %v3300_v7  ;;  %v3064_v0 = vmul.f32 %v8278_v44, %v3063_v37  ;;  %5537 = vrcp.f32 %v8311_v16  ;;  %v3163_v50 = vadd.f32 0.0036580483, %v3162_v55 }
 0x28e   : > { %v8323_v26 = vadd.f32 %v7873_v49, %v2603_v15  ;;  %v3286_v18 = vadd.f32 1.0, %v5278_v60  ;;  %v2615_v47 = vmul.f32 0.5, %v7927_v43  ;;  %v3035_v5 = vmul.f32 %v3034_v17, %v3010_v6 }
 0x28f   : > { %v3104_v59 = vmul.f32 %v8282_v46, %v3103_v52  ;;  %5305 = vmatmul.msk.bf16.gmra.mxu1 %vm2302_vm2, %v3313_v41  ;;  %v3049_v61 = vadd.f32 1.1283791, %v3048_v24  ;;  %vm3066_vm6 = vweird.f32 %v8236_v30  ;;  %v3124_v7 = vmul.f32 %v3123_v11, %v8130_v10 }
 0x290   : > { %v3217_v40 = vmul.f32 %v3216_v27, %v8271_v21  ;;  %vm8331_vm7 = vcmp.eq.f32.partialorder %v3070_v36, 8.507059e+37  ;;  %v3073_v49 = vor.u32 1.1754944e-38, %v3072_v53  ;;  %v3088_v33 = vmul.f32 %v3087_v63, %v8057_v48 }
 0x291   : > { %v8337_v43 = vmul.f32 0.70710677, %v8323_v26  ;;  %v3065_v54 = vadd.f32 %v8278_v44, %v3064_v0  ;;  %vm3067_vm8 = vweird.f32 %v8278_v44  ;;  %v3112_v31 = vand.u32 2147483648, %v8243_v58 }
 0x292   : > { %v3164_v4 = vmul.f32 %v3163_v50, %v8152_v28  ;;  %v8343_v60 = vpop.eup %5535  ;;  %v5279_v25 = vclamps-f32 %v3035_v5, 1.0  ;;  %v3105_v35 = vadd.f32 %v8282_v46, %v3104_v59  ;;  %vm3107_vm9 = vweird.f32 %v8282_v46  ;;  %vm8362_vm10 = vmor %vm3066_vm6, %vm3067_vm8 }
 0x293   : > { %v3238_v48 = vmul.f32 %v8337_v43, %v8337_v43  ;;  %v8349_v51 = vpop.eup %5537  ;;  %v8353_v12 = vmul.f32 %v8203_v29, %v8118_v14  ;;  %v3125_v42 = vadd.f32 0.05243302, %v3124_v7  ;;  %v3200_v34 = vmul.f32 2.1237322e-06, %v8271_v21 }
 0x294   : > { %v3218_v37 = vadd.f32 0.4994258, %v3217_v40  ;;  %v9995_v55 = vpack.c.bf16 %v8052_v22, %v8063_v13  ;;  %v3089_v6 = vadd.f32 1.1283791, %v3088_v33  ;;  %vm3106_vm11 = vweird.f32 %v8243_v58 }
 0x295   : > { %v3110_v14 = vand.u32 2147483647, %v8243_v58  ;;  %v8368_v29 = vmin.f32 %v3238_v48, 16.0  ;;  %v3069_v24 = vsel %vm8362_vm10, %v8278_v44, %v3065_v54  ;;  %vm8373_vm12 = vmor %vm3106_vm11, %vm3107_vm9  ;;  %v3113_v13 = vor.u32 1.1754944e-38, %v3112_v31 }
 0x296   : > { %v3165_v30 = vadd.f32 0.05243302, %v3164_v4  ;;  %v3182_v52 = vmul.f32 %v8343_v60, %v8309_v19  ;;  %v3287_v17 = vadd.f32 1.0, %v5279_v25  ;;  %v3109_v58 = vsel %vm8373_vm12, %v8282_v46, %v3105_v35 }
 0x297   : > { %5244 = vmatmul.msk.bf16.gmra.mxu3 %vm2302_vm2, %v9995_v55  ;;  %v3142_v36 = vmul.f32 %v8349_v51, %v8311_v16  ;;  %v3240_v11 = vmul.f32 2.1237322e-06, %v8368_v29  ;;  %v3126_v44 = vmul.f32 %v3125_v42, %v8130_v10  ;;  %v3201_v27 = vadd.f32 0.00028619796, %v3200_v34 }
 0x298   : > { %v3219_v53 = vmul.f32 %v3218_v37, %v8271_v21  ;;  %v3251_v63 = vmul.f32 3.8918573e-05, %v8368_v29  ;;  %v3050_v41 = vmul.f32 %v3049_v61, %v8014_v45  ;;  %v3074_v15 = vsel %vm8331_vm7, %v3073_v49, %v3069_v24 }
 0x299   : > { %vm3111_vm13 = vcmp.eq.f32.partialorder %v3110_v14, 8.507059e+37  ;;  %v3241_v0 = vadd.f32 0.00028619796, %v3240_v11  ;;  %v3166_v50 = vmul.f32 %v3165_v30, %v8152_v28  ;;  %v3183_v5 = vsub.f32 1.0, %v3182_v52 }
 0x29a   : > { %v3114_v46 = vsel %vm3111_vm13, %v3113_v13, %v3109_v58  ;;  %v3252_v59 = vadd.f32 0.001143296, %v3251_v63  ;;  %v3303_v7 = vmul.f32 %v3287_v17, %v2615_v47  ;;  %v3090_v40 = vmul.f32 %v3089_v6, %v8019_v38 }
 0x29b   : > { %v3143_v33 = vsub.f32 1.0, %v3142_v36  ;;  %v3242_v54 = vmul.f32 %v3241_v0, %v8368_v29  ;;  %v3127_v31 = vadd.f32 0.18741608, %v3126_v44  ;;  %v3202_v4 = vmul.f32 %v3201_v27, %v8271_v21 }
 0x29c   : > { %v8395_v45 = vadd.f32 1.0, %v3219_v53  ;;  %v3253_v61 = vmul.f32 %v3252_v59, %v8368_v29  ;;  %v3302_v32 = vmul.f32 %v3286_v18, %v8268_v8  ;;  %v3075_v49 = vmul.f32 %v3074_v15, %v3050_v41 }
 0x29d   : > { %v3115_v25 = vmul.f32 %v3114_v46, %v3090_v40  ;;  %v3167_v35 = vadd.f32 0.18741608, %v3166_v50  ;;  %v3184_v48 = vmul.f32 %v8343_v60, %v3183_v5  ;;  %v3144_v38 = vmul.f32 %v8349_v51, %v3143_v33 }
 0x29e   : > { %v3254_v47 = vadd.f32 0.014752088, %v3253_v61  ;;  %v3243_v42 = vadd.f32 0.0036580483, %v3242_v54  ;;  %v3314_v34 = vpack.c.bf16 %v3303_v7, %v3302_v32  ;;  %v1423_v37 = vpack.c.bf16 %v8353_v12, %v8160_v62 }
 0x29f   : > { %v3128_v55 = vmul.f32 %v3127_v31, %v8130_v10  ;;  %v3203_v3 = vadd.f32 0.0036580483, %v3202_v4  ;;  %5539 = vrcp.f32 %v8395_v45  ;;  %v5280_v18 = vclamps-f32 %v3075_v49, 1.0 }
 0x2a0   : > { %v3255_v8 = vmul.f32 %v3254_v47, %v8368_v29  ;;  %v5281_v6 = vclamps-f32 %v3115_v25, 1.0  ;;  %vm3146_vm14 = vweird.f32 %v8311_v16  ;;  %v3152_v14 = vand.u32 2147483648, %v8311_v16  ;;  %5306 = vmatmul.msk.bf16.gmra.mxu1 %vm2302_vm2, %v3314_v34 }
 0x2a1   : > { %v3168_v24 = vmul.f32 %v3167_v35, %v8152_v28  ;;  %v3185_v22 = vadd.f32 %v8343_v60, %v3184_v48  ;;  %vm3187_vm15 = vweird.f32 %v8343_v60  ;;  %v3145_v62 = vadd.f32 %v8349_v51, %v3144_v38 }
 0x2a2   : > { %v3256_v10 = vadd.f32 0.112945676, %v3255_v8  ;;  %vm3147_vm0 = vweird.f32 %v8349_v51  ;;  %v3192_v12 = vand.u32 2147483648, %v8309_v19  ;;  %v3244_v13 = vmul.f32 %v3243_v42, %v8368_v29 }
 0x2a3   : > { %vm3186_vm1 = vweird.f32 %v8309_v19  ;;  %v3190_v30 = vand.u32 2147483647, %v8309_v19  ;;  %v3204_v52 = vmul.f32 %v3203_v3, %v8271_v21  ;;  %v2617_v17 = vmul.f32 0.5, %v8002_v39  ;;  %vm8436_vm4 = vmor %vm3146_vm14, %vm3147_vm0 }
 0x2a4   : > { %v3257_v28 = vmul.f32 %v3256_v10, %v8368_v29  ;;  %v3289_v58 = vadd.f32 1.0, %v5281_v6  ;;  %v3129_v36 = vadd.f32 1.1283791, %v3128_v55  ;;  %vm8422_vm3 = vmor %vm3186_vm1, %vm3187_vm15  ;;  %v3150_v27 = vand.u32 2147483647, %v8311_v16 }
 0x2a5   : > { %v8426_v44 = vpop.eup %5539  ;;  %v3169_v53 = vadd.f32 1.1283791, %v3168_v24  ;;  %v3189_v19 = vsel %vm8422_vm3, %v8343_v60, %v3185_v22  ;;  %v3288_v41 = vadd.f32 1.0, %v5280_v18  ;;  %v3153_v15 = vor.u32 1.1754944e-38, %v3152_v14 }
 0x2a6   : > { %v3258_v63 = vadd.f32 0.4994258, %v3257_v28  ;;  %v3193_v0 = vor.u32 1.1754944e-38, %v3192_v12  ;;  %v3245_v46 = vadd.f32 0.05243302, %v3244_v13  ;;  %v3149_v50 = vsel %vm8436_vm4, %v8349_v51, %v3145_v62 }
 0x2a7   : > { %5245 = vmatmul.msk.bf16.gmra.mxu3 %vm2302_vm2, %v1423_v37  ;;  %vm3191_vm5 = vcmp.eq.f32.partialorder %v3190_v30, 8.507059e+37  ;;  %v3205_v5 = vadd.f32 0.05243302, %v3204_v52  ;;  %v2616_v59 = vmul.f32 0.5, %v7996_v57  ;;  %v3305_v7 = vmul.f32 %v3289_v58, %v2617_v17 }
 0x2a8   : > { %v3259_v60 = vmul.f32 %v3258_v63, %v8368_v29  ;;  %v3194_v40 = vsel %vm3191_vm5, %v3193_v0, %v3189_v19  ;;  %v3222_v16 = vmul.f32 %v8426_v44, %v8395_v45  ;;  %vm3151_vm6 = vcmp.eq.f32.partialorder %v3150_v27, 8.507059e+37 }
 0x2a9   : > { %v3170_v33 = vmul.f32 %v3169_v53, %v8133_v56  ;;  %v3304_v31 = vmul.f32 %v3288_v41, %v2616_v59  ;;  %v3154_v4 = vsel %vm3151_vm6, %v3153_v15, %v3149_v50  ;;  %v3246_v61 = vmul.f32 %v3245_v46, %v8368_v29  ;;  %v8453_v56 = vpop.f32.mrf.mxu3 }
 0x2aa   : > { %v3260_v54 = vadd.f32 1.0, %v3259_v60  ;;  %v3130_v51 = vmul.f32 %v3129_v36, %v8098_v1  ;;  %v3206_v49 = vmul.f32 %v3205_v5, %v8271_v21  ;;  %v3223_v25 = vsub.f32 1.0, %v3222_v16 }
 0x2ab   : > { %v3195_v32 = vmul.f32 %v3194_v40, %v3170_v33  ;;  %v3315_v57 = vpack.c.bf16 %v3305_v7, %v3304_v31  ;;  %v3247_v48 = vadd.f32 0.18741608, %v3246_v61  ;;  %v3232_v18 = vand.u32 2147483648, %v8395_v45  ;;  %v3383_v31 = vpop.f32.mrf.mxu1 }
 0x2ac   : > { %5541 = vrcp.f32 %v3260_v54  ;;  %v3155_v35 = vmul.f32 %v3154_v4, %v3130_v51  ;;  %v3207_v38 = vadd.f32 0.18741608, %v3206_v49  ;;  %v3224_v42 = vmul.f32 %v8426_v44, %v3223_v25 }
 0x2ad   : > { %v5283_v47 = vclamps-f32 %v3195_v32, 1.0  ;;  %v3248_v1 = vmul.f32 %v3247_v48, %v8368_v29  ;;  %vm3226_vm7 = vweird.f32 %v8395_v45  ;;  %vm3227_vm8 = vweird.f32 %v8426_v44 }
 0x2ae   : > { %v5282_v37 = vclamps-f32 %v3155_v35, 1.0  ;;  %v3208_v8 = vmul.f32 %v3207_v38, %v8271_v21  ;;  %v3225_v6 = vadd.f32 %v8426_v44, %v3224_v42  ;;  %v2619_v22 = vmul.f32 0.5, %v8123_v9  ;;  %vm3228_vm10 = vmor %vm3226_vm7, %vm3227_vm8 }
 0x2af   : > { %v3291_v3 = vadd.f32 1.0, %v5283_v47  ;;  %v3230_v10 = vand.u32 2147483647, %v8395_v45  ;;  %v3272_v62 = vand.u32 2147483648, %v3260_v54  ;;  %v3249_v29 = vadd.f32 1.1283791, %v3248_v1 }
 0x2b0   : > { %5307 = vmatmul.msk.bf16.gmra.mxu1 %vm2302_vm2, %v3315_v57  ;;  %v3290_v24 = vadd.f32 1.0, %v5282_v37  ;;  %v3270_v13 = vand.u32 2147483647, %v3260_v54  ;;  %v2618_v21 = vmul.f32 0.5, %v8077_v23  ;;  %v3209_v30 = vadd.f32 1.1283791, %v3208_v8 }
 0x2b1   : > { %v3233_v52 = vor.u32 1.1754944e-38, %v3232_v18  ;;  %v3307_v28 = vmul.f32 %v3291_v3, %v2619_v22  ;;  %v3229_v17 = vsel %vm3228_vm10, %v8426_v44, %v3225_v6  ;;  %vm3266_vm11 = vweird.f32 %v3260_v54  ;;  %v8465_v36 = vpop.f32.mrf.mxu3 }
 0x2b2   : > { %v5542_v34 = vpop.eup %5541  ;;  %v3306_v9 = vmul.f32 %v3290_v24, %v2618_v21  ;;  %v3273_v45 = vor.u32 1.1754944e-38, %v3272_v62  ;;  %vm3231_vm13 = vcmp.eq.f32.partialorder %v3230_v10, 8.507059e+37  ;;  %v3250_v11 = vmul.f32 %v3249_v29, %v8337_v43 }
 0x2b3   : > { %v3262_v55 = vmul.f32 %v5542_v34, %v3260_v54  ;;  %vm3267_vm9 = vweird.f32 %v5542_v34  ;;  %vm3271_vm14 = vcmp.eq.f32.partialorder %v3270_v13, 8.507059e+37  ;;  %v3234_v53 = vsel %vm3231_vm13, %v3233_v52, %v3229_v17  ;;  %v8480_v54 = vld [vmem:[%s9811_s12] ss:$0 sm:$0xff]  ;;  %v3385_v38 = vpop.f32.mrf.mxu1 }
 0x2b4   : > { %vm3268_vm12 = vmor %vm3266_vm11, %vm3267_vm9  ;;  %v3316_v19 = vpack.c.bf16 %v3307_v28, %v3306_v9  ;;  %v3210_v63 = vmul.f32 %v3209_v30, %v8247_v20  ;;  %v2621_v5 = vmul.f32 0.5, %v8323_v26  ;;  %v2620_v43 = vmul.f32 0.5, %v8239_v2  ;;  %v2336_v20 = vpop.f32.mrf.mxu2 }
 0x2b5   : > { %v3263_v14 = vsub.f32 1.0, %v3262_v55 }
 0x2b6   : > { %v3235_v39 = vmul.f32 %v3234_v53, %v3210_v63 }
 0x2b7   : > { %v3264_v12 = vmul.f32 %v5542_v34, %v3263_v14 }
 0x2b8   : > { %v5284_v0 = vclamps-f32 %v3235_v39, 1.0 }
 0x2b9   : > { %v3265_v58 = vadd.f32 %v5542_v34, %v3264_v12  ;;  %v8470_v15 = vpop.f32.mrf.mxu3 }
 0x2ba   : > { %v3292_v50 = vadd.f32 1.0, %v5284_v0 }
 0x2bb   : > { %v3269_v27 = vsel %vm3268_vm12, %v5542_v34, %v3265_v58  ;;  %v3388_v30 = vpop.f32.mrf.mxu1 }
 0x2bc   : > { %v3274_v23 = vsel %vm3271_vm14, %v3273_v45, %v3269_v27  ;;  %v3308_v7 = vmul.f32 %v3292_v50, %v2620_v43  ;;  %v2338_v25 = vpop.f32.mrf.mxu2 }
 0x2bd   : > { %v3275_v41 = vmul.f32 %v3274_v23, %v3250_v11 }
 0x2bf   : > { %v5285_v44 = vclamps-f32 %v3275_v41, 1.0 }
 0x2c0   : > { %5308 = vmatmul.msk.bf16.gmra.mxu1 %vm2302_vm2, %v3316_v19 }
 0x2c1   : > { %v3293_v46 = vadd.f32 1.0, %v5285_v44  ;;  %v8474_v59 = vpop.f32.mrf.mxu3 }
 0x2c3   : > { %v3309_v60 = vmul.f32 %v3293_v46, %v2621_v5  ;;  %v3390_v46 = vpop.f32.mrf.mxu1 }
 0x2c4   : > { %v2341_v21 = vpop.f32.mrf.mxu2 }
 0x2c5   : > { %v3317_v40 = vpack.c.bf16 %v3309_v60, %v3308_v7 }
 0x2c9   : > { %v2433_v16 = vpop.f32.mrf.mxu3 }
 0x2ca   : > { %v2434_v33 = vadd.f32 %v2433_v16, %v2336_v20 }
 0x2cc   : > { %v3423_v4 = vadd.f32 %v3383_v31, %v2434_v33  ;;  %v2343_v0 = vpop.f32.mrf.mxu2 }
 0x2ce   : > { %v8483_v26 = vadd.f32 %v8480_v54, %v3423_v4 }
 0x2d0   : > { %5309 = vmatmul.msk.bf16.gmra.mxu1 %vm2302_vm2, %v3317_v40  ;;  %v8486_v2 = vmul.f32 0.70710677, %v8483_v26 }
 0x2d1   : > { %v2435_v48 = vpop.f32.mrf.mxu3 }
 0x2d2   : > { %v3491_v61 = vmul.f32 %v8486_v2, %v8486_v2  ;;  %v2436_v47 = vadd.f32 %v2435_v48, %v2338_v25 }
 0x2d4   : > { %v8490_v51 = vmin.f32 %v3491_v61, 16.0  ;;  %v3424_v42 = vadd.f32 %v3385_v38, %v2436_v47 }
 0x2d6   : > { %v3504_v32 = vmul.f32 3.8918573e-05, %v8490_v51  ;;  %v8496_v37 = vadd.f32 %v8480_v54, %v3424_v42  ;;  %v3493_v14 = vmul.f32 2.1237322e-06, %v8490_v51  ;;  %v3393_v42 = vpop.f32.mrf.mxu1 }
 0x2d8   : > { %v3505_v49 = vadd.f32 0.001143296, %v3504_v32  ;;  %v8499_v1 = vmul.f32 0.70710677, %v8496_v37  ;;  %v3494_v29 = vadd.f32 0.00028619796, %v3493_v14 }
 0x2d9   : > { %v2438_v45 = vpop.f32.mrf.mxu3 }
 0x2da   : > { %v3506_v57 = vmul.f32 %v3505_v49, %v8490_v51  ;;  %v3531_v3 = vmul.f32 %v8499_v1, %v8499_v1  ;;  %v3495_v17 = vmul.f32 %v3494_v29, %v8490_v51  ;;  %v2439_v53 = vadd.f32 %v2438_v45, %v2341_v21 }
 0x2dc   : > { %v3507_v35 = vadd.f32 0.014752088, %v3506_v57  ;;  %v8504_v18 = vmin.f32 %v3531_v3, 16.0  ;;  %v3496_v23 = vadd.f32 0.0036580483, %v3495_v17  ;;  %v3425_v63 = vadd.f32 %v3388_v30, %v2439_v53 }
 0x2de   : > { %v3508_v34 = vmul.f32 %v3507_v35, %v8490_v51  ;;  %v3544_v6 = vmul.f32 3.8918573e-05, %v8504_v18  ;;  %v3533_v10 = vmul.f32 2.1237322e-06, %v8504_v18  ;;  %v8520_v44 = vadd.f32 %v8480_v54, %v3425_v63  ;;  %v2346_v35 = vpop.f32.mrf.mxu2 }
 0x2df   : > { %v3497_v50 = vmul.f32 %v3496_v23, %v8490_v51 }
 0x2e0   : > { %v3509_v55 = vadd.f32 0.112945676, %v3508_v34  ;;  %v3545_v22 = vadd.f32 0.001143296, %v3544_v6  ;;  %v3534_v52 = vadd.f32 0.00028619796, %v3533_v10 }
 0x2e1   : > { %v8526_v43 = vmul.f32 0.70710677, %v8520_v44  ;;  %v2440_v60 = vpop.f32.mrf.mxu3  ;;  %v3498_v33 = vadd.f32 0.05243302, %v3497_v50 }
 0x2e2   : > { %v3510_v8 = vmul.f32 %v3509_v55, %v8490_v51  ;;  %v3546_v62 = vmul.f32 %v3545_v22, %v8504_v18  ;;  %v3535_v11 = vmul.f32 %v3534_v52, %v8504_v18  ;;  %v2441_v16 = vadd.f32 %v2440_v60, %v2343_v0 }
 0x2e3   : > { %v3571_v20 = vmul.f32 %v8526_v43, %v8526_v43  ;;  %v3499_v25 = vmul.f32 %v3498_v33, %v8490_v51 }
 0x2e4   : > { %v3511_v24 = vadd.f32 0.4994258, %v3510_v8  ;;  %v3547_v13 = vadd.f32 0.014752088, %v3546_v62  ;;  %v3536_v41 = vadd.f32 0.0036580483, %v3535_v11  ;;  %v3426_v4 = vadd.f32 %v3390_v46, %v2441_v16 }
 0x2e5   : > { %v8536_v32 = vmin.f32 %v3571_v20, 16.0  ;;  %v5393_v8 = vld [vmem:[%s9812_s13 + $0x18] sm:$0xff] }
 0x2e6   : > { %v3512_v12 = vmul.f32 %v3511_v24, %v8490_v51  ;;  %v3548_v28 = vmul.f32 %v3547_v13, %v8504_v18  ;;  %v3537_v40 = vmul.f32 %v3536_v41, %v8504_v18  ;;  %v8539_v49 = vadd.f32 %v8480_v54, %v3426_v4  ;;  %4235 = vmatpush.bf16.msrb.mxu2 %v5393_v8 }
 0x2e7   : > { %v3584_v14 = vmul.f32 3.8918573e-05, %v8536_v32  ;;  %v3500_v24 = vadd.f32 0.18741608, %v3499_v25  ;;  %v3573_v22 = vmul.f32 2.1237322e-06, %v8536_v32 }
 0x2e8   : > { %v8513_v58 = vadd.f32 1.0, %v3512_v12  ;;  %v3549_v9 = vadd.f32 0.112945676, %v3548_v28  ;;  %v3538_v61 = vadd.f32 0.05243302, %v3537_v40  ;;  %v3460_v4 = vmul.f32 0.5, %v8496_v37 }
 0x2e9   : > { %v2443_v38 = vpop.f32.mrf.mxu3  ;;  %v8548_v55 = vmul.f32 0.70710677, %v8539_v49  ;;  %v3585_v12 = vadd.f32 0.001143296, %v3584_v14  ;;  %v3501_v17 = vmul.f32 %v3500_v24, %v8490_v51  ;;  %v2348_v14 = vpop.f32.mrf.mxu2 }
 0x2ea   : > { %v3550_v27 = vmul.f32 %v3549_v9, %v8504_v18  ;;  %5543 = vrcp.f32 %v8513_v58  ;;  %v3539_v34 = vmul.f32 %v3538_v61, %v8504_v18  ;;  %v2444_v3 = vadd.f32 %v2443_v38, %v2346_v35 }
 0x2eb   : > { %v3611_v10 = vmul.f32 %v8548_v55, %v8548_v55  ;;  %v3586_v28 = vmul.f32 %v3585_v12, %v8536_v32  ;;  %v3574_v9 = vadd.f32 0.00028619796, %v3573_v22  ;;  %v3523_v11 = vand.u32 2147483647, %v8513_v58 }
 0x2ec   : > { %v3551_v19 = vadd.f32 0.4994258, %v3550_v27  ;;  %v3427_v62 = vadd.f32 %v3393_v42, %v2444_v3  ;;  %v3540_v13 = vadd.f32 0.18741608, %v3539_v34  ;;  %v3525_v50 = vand.u32 2147483648, %v8513_v58 }
 0x2ed   : > { %v8559_v30 = vmin.f32 %v3611_v10, 16.0  ;;  %v3587_v23 = vadd.f32 0.014752088, %v3586_v28  ;;  %v3575_v40 = vmul.f32 %v3574_v9, %v8536_v32  ;;  %vm3519_vm3 = vweird.f32 %v8513_v58 }
 0x2ee   : > { %v3552_v39 = vmul.f32 %v3551_v19, %v8504_v18  ;;  %v8562_v52 = vadd.f32 %v8480_v54, %v3427_v62  ;;  %v3541_v63 = vmul.f32 %v3540_v13, %v8504_v18  ;;  %v3395_v18 = vpop.f32.mrf.mxu1  ;;  %vm3524_vm6 = vcmp.eq.f32.partialorder %v3523_v11, 8.507059e+37 }
 0x2ef   : > { %v3613_v27 = vmul.f32 2.1237322e-06, %v8559_v30  ;;  %v3588_v0 = vmul.f32 %v3587_v23, %v8536_v32  ;;  %v3624_v46 = vmul.f32 3.8918573e-05, %v8559_v30  ;;  %v3526_v38 = vor.u32 1.1754944e-38, %v3525_v50 }
 0x2f0   : > { %v8523_v5 = vadd.f32 1.0, %v3552_v39  ;;  %v8528_v7 = vpop.eup %5543  ;;  %v8567_v45 = vmul.f32 0.70710677, %v8562_v52  ;;  %v3542_v61 = vadd.f32 1.1283791, %v3541_v63 }
 0x2f1   : > { %v3515_v31 = vmul.f32 %v8528_v7, %v8513_v58  ;;  %vm3520_vm15 = vweird.f32 %v8528_v7  ;;  %v2445_v53 = vpop.f32.mrf.mxu3  ;;  %v3614_v16 = vadd.f32 0.00028619796, %v3613_v27  ;;  %v3589_v33 = vadd.f32 0.112945676, %v3588_v0  ;;  %v5392_v0 = vld [vmem:[%s9812_s13 + $0x10] sm:$0xff] }
 0x2f2   : > { %5545 = vrcp.f32 %v8523_v5  ;;  %v3565_v51 = vand.u32 2147483648, %v8523_v5  ;;  %v3651_v39 = vmul.f32 %v8567_v45, %v8567_v45  ;;  %vm3559_vm1 = vweird.f32 %v8523_v5  ;;  %vm8592_vm5 = vmor %vm3519_vm3, %vm3520_vm15  ;;  %4236 = vmatpush.bf16.msrb.mxu2 %v5392_v0 }
 0x2f3   : > { %v3516_v48 = vsub.f32 1.0, %v3515_v31  ;;  %v3563_v60 = vand.u32 2147483647, %v8523_v5  ;;  %v3502_v31 = vadd.f32 1.1283791, %v3501_v17  ;;  %v3615_v3 = vmul.f32 %v3614_v16, %v8559_v30  ;;  %v5391_v16 = vld [vmem:[%s9812_s13 + $0x8] sm:$0xff] }
 0x2f4   : > { %v3625_v25 = vadd.f32 0.001143296, %v3624_v46  ;;  %v3566_v35 = vor.u32 1.1754944e-38, %v3565_v51  ;;  %v3576_v42 = vadd.f32 0.0036580483, %v3575_v40  ;;  %v2446_v22 = vadd.f32 %v2445_v53, %v2348_v14 }
 0x2f5   : > { %v3517_v29 = vmul.f32 %v8528_v7, %v3516_v48  ;;  %v8602_v48 = vmin.f32 %v3651_v39, 16.0  ;;  %vm3564_vm7 = vcmp.eq.f32.partialorder %v3563_v60, 8.507059e+37  ;;  %v3503_v12 = vmul.f32 %v3502_v31, %v8486_v2 }
 0x2f6   : > { %v3616_v28 = vadd.f32 0.0036580483, %v3615_v3  ;;  %v3428_v23 = vadd.f32 %v3395_v18, %v2446_v22  ;;  %4237 = vmatpush.bf16.msrb.mxu2 %v5391_v16 }
 0x2f7   : > { %v3518_v19 = vadd.f32 %v8528_v7, %v3517_v29  ;;  %v3664_v29 = vmul.f32 3.8918573e-05, %v8602_v48 }
 0x2f8   : > { %v8541_v57 = vpop.eup %5545  ;;  %v3617_v63 = vmul.f32 %v3616_v28, %v8559_v30  ;;  %v8620_v39 = vadd.f32 %v8480_v54, %v3428_v23 }
 0x2f9   : > { %v3555_v47 = vmul.f32 %v8541_v57, %v8523_v5  ;;  %vm3560_vm0 = vweird.f32 %v8541_v57  ;;  %v3522_v58 = vsel %vm8592_vm5, %v8528_v7, %v3518_v19  ;;  %v2448_v8 = vpop.f32.mrf.mxu3  ;;  %v3543_v7 = vmul.f32 %v3542_v61, %v8499_v1 }
 0x2fa   : > { %vm8586_vm4 = vmor %vm3559_vm1, %vm3560_vm0  ;;  %v3527_v24 = vsel %vm3524_vm6, %v3526_v38, %v3522_v58  ;;  %v3665_v1 = vadd.f32 0.001143296, %v3664_v29  ;;  %v3618_v20 = vadd.f32 0.05243302, %v3617_v63  ;;  %v3459_v58 = vmul.f32 0.5, %v8483_v26  ;;  %v5390_v26 = vld [vmem:[%s9812_s13] sm:$0xff] }
 0x2fb   : > { %v3556_v6 = vsub.f32 1.0, %v3555_v47  ;;  %v3590_v47 = vmul.f32 %v3589_v33, %v8536_v32  ;;  %v3528_v11 = vmul.f32 %v3527_v24, %v3503_v12  ;;  %4238 = vmatpush.bf16.msrb.mxu2 %v5390_v26 }
 0x2fc   : > { %v3666_v50 = vmul.f32 %v3665_v1, %v8602_v48 }
 0x2fd   : > { %v3557_v21 = vmul.f32 %v8541_v57, %v3556_v6  ;;  %v3591_v6 = vadd.f32 0.4994258, %v3590_v47  ;;  %v5310_v2 = vclamps-f32 %v3528_v11, 1.0  ;;  %v3653_v11 = vmul.f32 2.1237322e-06, %v8602_v48 }
 0x2ff   : > { %v3558_v41 = vadd.f32 %v8541_v57, %v3557_v21  ;;  %v3592_v10 = vmul.f32 %v3591_v6, %v8536_v32  ;;  %v3577_v21 = vmul.f32 %v3576_v42, %v8536_v32  ;;  %v4131_v31 = vadd.f32 1.0, %v5310_v2 }
 0x300   : > { %v3654_v0 = vadd.f32 0.00028619796, %v3653_v11  ;;  %v3461_v11 = vmul.f32 0.5, %v8520_v44 }
 0x301   : > { %v3562_v5 = vsel %vm8586_vm4, %v8541_v57, %v3558_v41  ;;  %v3626_v57 = vmul.f32 %v3625_v25, %v8559_v30  ;;  %v8612_v17 = vadd.f32 1.0, %v3592_v10  ;;  %v3578_v19 = vadd.f32 0.05243302, %v3577_v21  ;;  %v8617_v51 = vpop.f32.mrf.mxu3  ;;  %v2351_v25 = vpop.f32.mrf.mxu2 }
 0x302   : > { %v3567_v34 = vsel %vm3564_vm7, %v3566_v35, %v3562_v5  ;;  %v3667_v5 = vadd.f32 0.014752088, %v3666_v50  ;;  %v8635_v35 = vmul.f32 0.70710677, %v8620_v39  ;;  %v2449_v3 = vadd.f32 %v2448_v8, %v2351_v25 }
 0x303   : > { %v3627_v62 = vadd.f32 0.014752088, %v3626_v57  ;;  %v3568_v13 = vmul.f32 %v3567_v34, %v3543_v7  ;;  %5547 = vrcp.f32 %v8612_v17  ;;  %v3579_v18 = vmul.f32 %v3578_v19, %v8536_v32 }
 0x304   : > { %v3619_v57 = vmul.f32 %v3618_v20, %v8559_v30  ;;  %v4147_v14 = vmul.f32 %v4131_v31, %v3459_v58  ;;  %v3668_v24 = vmul.f32 %v3667_v5, %v8602_v48  ;;  %v3691_v7 = vmul.f32 %v8635_v35, %v8635_v35 }
 0x305   : > { %v3628_v9 = vmul.f32 %v3627_v62, %v8559_v30  ;;  %v5311_v53 = vclamps-f32 %v3568_v13, 1.0  ;;  %v3580_v42 = vadd.f32 0.18741608, %v3579_v18  ;;  %v3605_v21 = vand.u32 2147483648, %v8612_v17 }
 0x306   : > { %v3620_v12 = vadd.f32 0.18741608, %v3619_v57  ;;  %vm3599_vm9 = vweird.f32 %v8612_v17  ;;  %v3603_v28 = vand.u32 2147483647, %v8612_v17  ;;  %v8654_v23 = vmin.f32 %v3691_v7, 16.0 }
 0x307   : > { %v3629_v41 = vadd.f32 0.112945676, %v3628_v9  ;;  %v4132_v60 = vadd.f32 1.0, %v5311_v53  ;;  %v3581_v10 = vmul.f32 %v3580_v42, %v8536_v32  ;;  %v3669_v9 = vadd.f32 0.112945676, %v3668_v24 }
 0x308   : > { %v3621_v19 = vmul.f32 %v3620_v12, %v8559_v30  ;;  %v3606_v63 = vor.u32 1.1754944e-38, %v3605_v21  ;;  %vm3604_vm11 = vcmp.eq.f32.partialorder %v3603_v28, 8.507059e+37  ;;  %v3655_v58 = vmul.f32 %v3654_v0, %v8602_v48 }
 0x309   : > { %v3630_v46 = vmul.f32 %v3629_v41, %v8559_v30  ;;  %v5548_v40 = vpop.eup %5547  ;;  %v4148_v38 = vmul.f32 %v4132_v60, %v3460_v4  ;;  %v8648_v62 = vpop.f32.mrf.mxu3  ;;  %v3582_v32 = vadd.f32 1.1283791, %v3581_v10  ;;  %v3670_v41 = vmul.f32 %v3669_v9, %v8602_v48 }
 0x30a   : > { %v3595_v61 = vmul.f32 %v5548_v40, %v8612_v17  ;;  %vm3600_vm8 = vweird.f32 %v5548_v40  ;;  %v3704_v60 = vmul.f32 3.8918573e-05, %v8654_v23  ;;  %v3622_v16 = vadd.f32 1.1283791, %v3621_v19  ;;  %v2353_v10 = vpop.f32.mrf.mxu2 }
 0x30b   : > { %v3631_v33 = vadd.f32 0.4994258, %v3630_v46  ;;  %v4163_v29 = vpack.c.bf16 %v4148_v38, %v4147_v14  ;;  %vm3601_vm10 = vmor %vm3599_vm9, %vm3600_vm8  ;;  %v3693_v46 = vmul.f32 2.1237322e-06, %v8654_v23  ;;  %v3583_v18 = vmul.f32 %v3582_v32, %v8526_v43 }
 0x30c   : > { %v3398_v27 = vpop.f32.mrf.mxu1  ;;  %v3596_v6 = vsub.f32 1.0, %v3595_v61  ;;  %v3623_v57 = vmul.f32 %v3622_v16, %v8548_v55  ;;  %v3656_v24 = vadd.f32 0.0036580483, %v3655_v58  ;;  %v3462_v32 = vmul.f32 0.5, %v8539_v49 }
 0x30d   : > { %v3632_v47 = vmul.f32 %v3631_v33, %v8559_v30  ;;  %v3429_v8 = vadd.f32 %v3398_v27, %v2449_v3  ;;  %5342 = vmatmul.msk.bf16.vlgmr.msrb.gmra.mxu2 %vm2302_vm2, %v4163_v29  ;;  %v3671_v30 = vadd.f32 0.4994258, %v3670_v41  ;;  %v3694_v38 = vadd.f32 0.00028619796, %v3693_v46 }
 0x30e   : > { %v3597_v22 = vmul.f32 %v5548_v40, %v3596_v6  ;;  %v3657_v28 = vmul.f32 %v3656_v24, %v8602_v48 }
 0x30f   : > { %v3633_v37 = vadd.f32 1.0, %v3632_v47  ;;  %v8657_v27 = vadd.f32 %v8480_v54, %v3429_v8  ;;  %v3672_v25 = vmul.f32 %v3671_v30, %v8602_v48  ;;  %v3705_v47 = vadd.f32 0.001143296, %v3704_v60 }
 0x310   : > { %v3598_v13 = vadd.f32 %v5548_v40, %v3597_v22 }
 0x311   : > { %5549 = vrcp.f32 %v3633_v37  ;;  %v3643_v33 = vand.u32 2147483647, %v3633_v37  ;;  %v3645_v31 = vand.u32 2147483648, %v3633_v37  ;;  %v8670_v4 = vpop.f32.mrf.mxu3  ;;  %vm3639_vm13 = vweird.f32 %v3633_v37 }
 0x312   : > { %v3602_v1 = vsel %vm3601_vm10, %v5548_v40, %v3598_v13  ;;  %v8668_v40 = vmul.f32 0.70710677, %v8657_v27  ;;  %v8676_v6 = vadd.f32 1.0, %v3672_v25  ;;  %v3706_v22 = vmul.f32 %v3705_v47, %v8654_v23 }
 0x313   : > { %v3607_v50 = vsel %vm3604_vm11, %v3606_v63, %v3602_v1  ;;  %v3646_v3 = vor.u32 1.1754944e-38, %v3645_v31  ;;  %vm3644_vm15 = vcmp.eq.f32.partialorder %v3643_v33, 8.507059e+37  ;;  %v2451_v13 = vadd.f32 %v8617_v51, %v2353_v10 }
 0x314   : > { %v8638_v34 = vpop.f32.mrf.mxu1  ;;  %v3608_v61 = vmul.f32 %v3607_v50, %v3583_v18  ;;  %v3731_v42 = vmul.f32 %v8668_v40, %v8668_v40  ;;  %5551 = vrcp.f32 %v8676_v6  ;;  %v3707_v9 = vadd.f32 0.014752088, %v3706_v22 }
 0x315   : > { %v3430_v41 = vadd.f32 %v8638_v34, %v2451_v13  ;;  %v3658_v50 = vadd.f32 0.05243302, %v3657_v28  ;;  %vm3679_vm1 = vweird.f32 %v8676_v6 }
 0x316   : > { %v5312_v14 = vclamps-f32 %v3608_v61, 1.0  ;;  %v8684_v12 = vmin.f32 %v3731_v42, 16.0  ;;  %v2356_v61 = vpop.f32.mrf.mxu2 }
 0x317   : > { %v5550_v53 = vpop.eup %5549  ;;  %v8701_v18 = vadd.f32 %v8480_v54, %v3430_v41  ;;  %v3659_v34 = vmul.f32 %v3658_v50, %v8602_v48  ;;  %v2454_v47 = vadd.f32 %v8648_v62, %v2356_v61 }
 0x318   : > { %v3635_v2 = vmul.f32 %v5550_v53, %v3633_v37  ;;  %vm3640_vm12 = vweird.f32 %v5550_v53  ;;  %v3695_v37 = vmul.f32 %v3694_v38, %v8654_v23  ;;  %v4133_v21 = vadd.f32 1.0, %v5312_v14 }
 0x319   : > { %vm3641_vm14 = vmor %vm3639_vm13, %vm3640_vm12  ;;  %v3744_v51 = vmul.f32 3.8918573e-05, %v8684_v12  ;;  %v8710_v58 = vmul.f32 0.70710677, %v8701_v18 }
 0x31a   : > { %v3636_v20 = vsub.f32 1.0, %v3635_v2  ;;  %v3696_v1 = vadd.f32 0.0036580483, %v3695_v37  ;;  %v8692_v63 = vpop.eup %5551  ;;  %v3708_v2 = vmul.f32 %v3707_v9, %v8654_v23  ;;  %v4149_v0 = vmul.f32 %v4133_v21, %v3461_v11 }
 0x31b   : > { %v3675_v49 = vmul.f32 %v8692_v63, %v8676_v6  ;;  %v3745_v30 = vadd.f32 0.001143296, %v3744_v51  ;;  %v3771_v22 = vmul.f32 %v8710_v58, %v8710_v58  ;;  %vm3680_vm0 = vweird.f32 %v8692_v63 }
 0x31c   : > { %v3637_v5 = vmul.f32 %v5550_v53, %v3636_v20  ;;  %v3697_v60 = vmul.f32 %v3696_v1, %v8654_v23  ;;  %v3709_v20 = vadd.f32 0.112945676, %v3708_v2  ;;  %vm3681_vm3 = vmor %vm3679_vm1, %vm3680_vm0 }
 0x31d   : > { %v8662_v17 = vpop.f32.mrf.mxu1  ;;  %v3746_v31 = vmul.f32 %v3745_v30, %v8684_v12  ;;  %v3676_v25 = vsub.f32 1.0, %v3675_v49  ;;  %v8728_v9 = vmin.f32 %v3771_v22, 16.0 }
 0x31e   : > { %v3638_v43 = vadd.f32 %v5550_v53, %v3637_v5  ;;  %v3710_v33 = vmul.f32 %v3709_v20, %v8654_v23  ;;  %v3698_v5 = vadd.f32 0.05243302, %v3697_v60  ;;  %v3431_v62 = vadd.f32 %v8662_v17, %v2454_v47 }
 0x31f   : > { %v3747_v42 = vadd.f32 0.014752088, %v3746_v31  ;;  %v3677_v24 = vmul.f32 %v8692_v63, %v3676_v25  ;;  %v3685_v17 = vand.u32 2147483648, %v8676_v6  ;;  %v3773_v50 = vmul.f32 2.1237322e-06, %v8728_v9 }
 0x320   : > { %v3642_v26 = vsel %vm3641_vm14, %v5550_v53, %v3638_v43  ;;  %v8690_v53 = vpop.f32.mrf.mxu3  ;;  %v3711_v38 = vadd.f32 0.4994258, %v3710_v33  ;;  %v3699_v14 = vmul.f32 %v3698_v5, %v8654_v23  ;;  %v8731_v11 = vadd.f32 %v8480_v54, %v3431_v62 }
 0x321   : > { %v3647_v7 = vsel %vm3644_vm15, %v3646_v3, %v3642_v26  ;;  %v3660_v3 = vadd.f32 0.18741608, %v3659_v34  ;;  %v3733_v26 = vmul.f32 2.1237322e-06, %v8684_v12  ;;  %v3678_v28 = vadd.f32 %v8692_v63, %v3677_v24 }
 0x322   : > { %v3648_v29 = vmul.f32 %v3647_v7, %v3623_v57  ;;  %v3712_v57 = vmul.f32 %v3711_v38, %v8654_v23  ;;  %v3748_v7 = vmul.f32 %v3747_v42, %v8684_v12  ;;  %v3700_v13 = vadd.f32 0.18741608, %v3699_v14 }
 0x323   : > { %v3661_v37 = vmul.f32 %v3660_v3, %v8602_v48  ;;  %v3683_v48 = vand.u32 2147483647, %v8676_v6  ;;  %v8742_v60 = vmul.f32 0.70710677, %v8731_v11  ;;  %v3774_v31 = vadd.f32 0.00028619796, %v3773_v50 }
 0x324   : > { %v5313_v55 = vclamps-f32 %v3648_v29, 1.0  ;;  %v3713_v10 = vadd.f32 1.0, %v3712_v57  ;;  %v3749_v29 = vadd.f32 0.112945676, %v3748_v7  ;;  %v3701_v41 = vmul.f32 %v3700_v13, %v8654_v23 }
 0x325   : > { %v8682_v8 = vpop.f32.mrf.mxu1  ;;  %vm3684_vm4 = vcmp.eq.f32.partialorder %v3683_v48, 8.507059e+37  ;;  %v3463_v50 = vmul.f32 0.5, %v8562_v52 }
 0x326   : > { %v4134_v19 = vadd.f32 1.0, %v5313_v55  ;;  %5553 = vrcp.f32 %v3713_v10  ;;  %v3734_v55 = vadd.f32 0.00028619796, %v3733_v26  ;;  %v3750_v1 = vmul.f32 %v3749_v29, %v8684_v12 }
 0x327   : > { %v3702_v34 = vadd.f32 1.1283791, %v3701_v41  ;;  %v3725_v5 = vand.u32 2147483648, %v3713_v10  ;;  %v3723_v42 = vand.u32 2147483647, %v3713_v10  ;;  %vm3719_vm6 = vweird.f32 %v3713_v10 }
 0x328   : > { %v4150_v46 = vmul.f32 %v4134_v19, %v3462_v32  ;;  %v8713_v43 = vpop.f32.mrf.mxu3  ;;  %v2358_v32 = vpop.f32.mrf.mxu2  ;;  %v3662_v19 = vadd.f32 1.1283791, %v3661_v37  ;;  %v3735_v2 = vmul.f32 %v3734_v55, %v8684_v12  ;;  %v3751_v20 = vadd.f32 0.4994258, %v3750_v1 }
 0x329   : > { %v2456_v61 = vadd.f32 %v8670_v4, %v2358_v32  ;;  %v3703_v26 = vmul.f32 %v3702_v34, %v8635_v35  ;;  %v3775_v4 = vmul.f32 %v3774_v31, %v8728_v9  ;;  %v3726_v37 = vor.u32 1.1754944e-38, %v3725_v5 }
 0x32a   : > { %v4164_v44 = vpack.c.bf16 %v4150_v46, %v4149_v0  ;;  %v3682_v0 = vsel %vm3681_vm3, %v8692_v63, %v3678_v28  ;;  %v3663_v30 = vmul.f32 %v3662_v19, %v8567_v45  ;;  %v3736_v23 = vadd.f32 0.0036580483, %v3735_v2 }
 0x32b   : > { %v3811_v63 = vmul.f32 %v8742_v60, %v8742_v60  ;;  %v3752_v57 = vmul.f32 %v3751_v20, %v8684_v12  ;;  %v3784_v45 = vmul.f32 3.8918573e-05, %v8728_v9  ;;  %v3432_v62 = vadd.f32 %v8682_v8, %v2456_v61 }
 0x32c   : > { %5343 = vmatmul.msk.bf16.gmra.mxu2 %vm2302_vm2, %v4164_v44  ;;  %v5554_v46 = vpop.eup %5553  ;;  %v3686_v44 = vor.u32 1.1754944e-38, %v3685_v17  ;;  %v3737_v24 = vmul.f32 %v3736_v23, %v8684_v12  ;;  %vm3724_vm8 = vcmp.eq.f32.partialorder %v3723_v42, 8.507059e+37  ;;  %v3776_v1 = vadd.f32 0.0036580483, %v3775_v4 }
 0x32d   : > { %v8703_v16 = vpop.f32.mrf.mxu1  ;;  %v3715_v6 = vmul.f32 %v5554_v46, %v3713_v10  ;;  %vm3720_vm5 = vweird.f32 %v5554_v46  ;;  %v8754_v22 = vmin.f32 %v3811_v63, 16.0  ;;  %v8758_v17 = vadd.f32 1.0, %v3752_v57 }
 0x32e   : > { %v3687_v49 = vsel %vm3684_vm4, %v3686_v44, %v3682_v0  ;;  %vm3721_vm7 = vmor %vm3719_vm6, %vm3720_vm5  ;;  %v3785_v32 = vadd.f32 0.001143296, %v3784_v45  ;;  %v3738_v48 = vadd.f32 0.05243302, %v3737_v24  ;;  %v8763_v41 = vadd.f32 %v8480_v54, %v3432_v62 }
 0x32f   : > { %v3716_v33 = vsub.f32 1.0, %v3715_v6  ;;  %v3688_v47 = vmul.f32 %v3687_v49, %v3663_v30  ;;  %v3813_v8 = vmul.f32 2.1237322e-06, %v8754_v22  ;;  %5555 = vrcp.f32 %v8758_v17 }
 0x330   : > { %v2463_v51 = vpop.f32.mrf.mxu3  ;;  %v2361_v14 = vpop.f32.mrf.mxu2  ;;  %v3739_v49 = vmul.f32 %v3738_v48, %v8684_v12  ;;  %v3777_v20 = vmul.f32 %v3776_v1, %v8728_v9  ;;  %v8776_v23 = vmul.f32 0.70710677, %v8763_v41  ;;  %vm3759_vm10 = vweird.f32 %v8758_v17 }
 0x331   : > { %v3717_v38 = vmul.f32 %v5554_v46, %v3716_v33  ;;  %v2464_v3 = vadd.f32 %v2463_v51, %v8453_v56  ;;  %v2459_v56 = vadd.f32 %v8690_v53, %v2361_v14  ;;  %v5314_v29 = vclamps-f32 %v3688_v47, 1.0 }
 0x332   : > { %v3740_v57 = vadd.f32 0.18741608, %v3739_v49  ;;  %v3851_v45 = vmul.f32 %v8776_v23, %v8776_v23 }
 0x333   : > { %v3718_v7 = vadd.f32 %v5554_v46, %v3717_v38  ;;  %v4135_v2 = vadd.f32 1.0, %v5314_v29  ;;  %v3433_v51 = vadd.f32 %v8703_v16, %v2459_v56  ;;  %v3814_v16 = vadd.f32 0.00028619796, %v3813_v8 }
 0x334   : > { %v3778_v38 = vadd.f32 0.05243302, %v3777_v20  ;;  %v3741_v29 = vmul.f32 %v3740_v57, %v8684_v12 }
 0x335   : > { %v8724_v21 = vpop.f32.mrf.mxu1  ;;  %v3722_v13 = vsel %vm3721_vm7, %v5554_v46, %v3718_v7  ;;  %v3786_v46 = vmul.f32 %v3785_v32, %v8728_v9  ;;  %v4151_v33 = vmul.f32 %v4135_v2, %v3463_v50  ;;  %v8779_v63 = vadd.f32 %v8480_v54, %v3433_v51  ;;  %v8786_v47 = vpop.eup %5555 }
 0x336   : > { %v3727_v35 = vsel %vm3724_vm8, %v3726_v37, %v3722_v13  ;;  %v3755_v7 = vmul.f32 %v8786_v47, %v8758_v17  ;;  %v3779_v37 = vmul.f32 %v3778_v38, %v8728_v9  ;;  %v8809_v13 = vmin.f32 %v3851_v45, 16.0 }
 0x337   : > { %v3728_v10 = vmul.f32 %v3727_v35, %v3703_v26  ;;  %v3787_v61 = vadd.f32 0.014752088, %v3786_v46  ;;  %v8797_v14 = vmul.f32 0.70710677, %v8779_v63  ;;  %v3742_v2 = vadd.f32 1.1283791, %v3741_v29 }
 0x338   : > { %v2465_v55 = vpop.f32.mrf.mxu3  ;;  %v2363_v34 = vpop.f32.mrf.mxu2  ;;  %v3756_v48 = vsub.f32 1.0, %v3755_v7  ;;  %v3780_v8 = vadd.f32 0.18741608, %v3779_v37  ;;  %v3853_v51 = vmul.f32 2.1237322e-06, %v8809_v13  ;;  %vm3760_vm9 = vweird.f32 %v8786_v47 }
 0x339   : > { %v2466_v19 = vadd.f32 %v2465_v55, %v8465_v36  ;;  %v5315_v53 = vclamps-f32 %v3728_v10, 1.0  ;;  %v3464_v36 = vmul.f32 0.5, %v8620_v39  ;;  %v2461_v52 = vadd.f32 %v8713_v43, %v2363_v34  ;;  %vm8859_vm11 = vmor %vm3759_vm10, %vm3760_vm9 }
 0x33a   : > { %v3815_v43 = vmul.f32 %v3814_v16, %v8754_v22  ;;  %v3891_v35 = vmul.f32 %v8797_v14, %v8797_v14  ;;  %v3757_v20 = vmul.f32 %v8786_v47, %v3756_v48  ;;  %v3781_v16 = vmul.f32 %v3780_v8, %v8728_v9 }
 0x33b   : > { %v4136_v6 = vadd.f32 1.0, %v5315_v53  ;;  %v3434_v26 = vadd.f32 %v8724_v21, %v2461_v52  ;;  %v3854_v52 = vadd.f32 0.00028619796, %v3853_v51  ;;  %v3763_v7 = vand.u32 2147483647, %v8758_v17 }
 0x33c   : > { %v3782_v45 = vadd.f32 1.1283791, %v3781_v16 }
 0x33d   : > { %v3413_v25 = vpop.f32.mrf.mxu1  ;;  %v4152_v31 = vmul.f32 %v4136_v6, %v3464_v36  ;;  %v8815_v32 = vadd.f32 %v8480_v54, %v3434_v26  ;;  %v8825_v36 = vmin.f32 %v3891_v35, 16.0  ;;  %vm3764_vm12 = vcmp.eq.f32.partialorder %v3763_v7, 8.507059e+37 }
 0x33e   : > { %v3435_v28 = vadd.f32 %v3413_v25, %v2464_v3  ;;  %v3824_v25 = vmul.f32 3.8918573e-05, %v8754_v22  ;;  %v3788_v3 = vmul.f32 %v3787_v61, %v8728_v9 }
 0x33f   : > { %v4165_v5 = vpack.c.bf16 %v4152_v31, %v4151_v33  ;;  %v3743_v31 = vmul.f32 %v3742_v2, %v8668_v40 }
 0x340   : > { %v8767_v0 = vadd.f32 %v8480_v54, %v3435_v28  ;;  %v3789_v4 = vadd.f32 0.112945676, %v3788_v3  ;;  %v3825_v62 = vadd.f32 0.001143296, %v3824_v25  ;;  %v2468_v55 = vpop.f32.mrf.mxu3  ;;  %v3816_v28 = vadd.f32 0.0036580483, %v3815_v43 }
 0x341   : > { %5344 = vmatmul.msk.bf16.gmra.mxu2 %vm2302_vm2, %v4165_v5  ;;  %v2469_v49 = vadd.f32 %v2468_v55, %v8470_v15  ;;  %v3893_v5 = vmul.f32 2.1237322e-06, %v8825_v36  ;;  %v3758_v3 = vadd.f32 %v8786_v47, %v3757_v20  ;;  %v3765_v43 = vand.u32 2147483648, %v8758_v17 }
 0x342   : > { %v8783_v39 = vmul.f32 0.70710677, %v8767_v0  ;;  %v3790_v21 = vmul.f32 %v3789_v4, %v8728_v9  ;;  %v3817_v50 = vmul.f32 %v3816_v28, %v8754_v22  ;;  %v3864_v4 = vmul.f32 3.8918573e-05, %v8809_v13 }
 0x343   : > { %v3894_v37 = vadd.f32 0.00028619796, %v3893_v5  ;;  %v3762_v17 = vsel %vm8859_vm11, %v8786_v47, %v3758_v3 }
 0x344   : > { %v3971_v24 = vmul.f32 %v8783_v39, %v8783_v39  ;;  %v3791_v1 = vadd.f32 0.4994258, %v3790_v21  ;;  %v3818_v61 = vadd.f32 0.05243302, %v3817_v50 }
 0x345   : > { %v3415_v44 = vpop.f32.mrf.mxu1  ;;  %v3895_v20 = vmul.f32 %v3894_v37, %v8825_v36 }
 0x346   : > { %v3436_v30 = vadd.f32 %v3415_v44, %v2466_v19  ;;  %v8817_v10 = vmin.f32 %v3971_v24, 16.0  ;;  %v3826_v19 = vmul.f32 %v3825_v62, %v8754_v22  ;;  %v3792_v46 = vmul.f32 %v3791_v1, %v8728_v9 }
 0x347   : > { %v8828_v44 = vmul.f32 0.70710677, %v8815_v32  ;;  %v3855_v24 = vmul.f32 %v3854_v52, %v8809_v13  ;;  %v3819_v62 = vmul.f32 %v3818_v61, %v8754_v22 }
 0x348   : > { %v8789_v42 = vadd.f32 %v8480_v54, %v3436_v30  ;;  %v3984_v6 = vmul.f32 3.8918573e-05, %v8817_v10  ;;  %v8833_v30 = vadd.f32 1.0, %v3792_v46  ;;  %v3827_v34 = vadd.f32 0.014752088, %v3826_v19  ;;  %v2470_v9 = vpop.f32.mrf.mxu3 }
 0x349   : > { %v3931_v15 = vmul.f32 %v8828_v44, %v8828_v44  ;;  %v2471_v26 = vadd.f32 %v2470_v9, %v8474_v59  ;;  %v3783_v19 = vmul.f32 %v3782_v45, %v8710_v58  ;;  %v3856_v2 = vadd.f32 0.0036580483, %v3855_v24 }
 0x34a   : > { %v8806_v56 = vmul.f32 0.70710677, %v8789_v42  ;;  %5557 = vrcp.f32 %v8833_v30  ;;  %v3985_v25 = vadd.f32 0.001143296, %v3984_v6  ;;  %v3828_v57 = vmul.f32 %v3827_v34, %v8754_v22 }
 0x34b   : > { %v8854_v29 = vmin.f32 %v3931_v15, 16.0  ;;  %v3865_v46 = vadd.f32 0.001143296, %v3864_v4  ;;  %v3805_v61 = vand.u32 2147483648, %v8833_v30  ;;  %v3820_v3 = vadd.f32 0.18741608, %v3819_v62 }
 0x34c   : > { %v4011_v53 = vmul.f32 %v8806_v56, %v8806_v56  ;;  %v3986_v21 = vmul.f32 %v3985_v25, %v8817_v10  ;;  %v3829_v1 = vadd.f32 0.112945676, %v3828_v57  ;;  %v3803_v25 = vand.u32 2147483647, %v8833_v30 }
 0x34d   : > { %v3418_v12 = vpop.f32.mrf.mxu1  ;;  %v3933_v50 = vmul.f32 2.1237322e-06, %v8854_v29  ;;  %v3857_v9 = vmul.f32 %v3856_v2, %v8809_v13  ;;  %vm3799_vm14 = vweird.f32 %v8833_v30  ;;  %v3806_v7 = vor.u32 1.1754944e-38, %v3805_v61 }
 0x34e   : > { %v8836_v33 = vmin.f32 %v4011_v53, 16.0  ;;  %v3437_v38 = vadd.f32 %v3418_v12, %v2469_v49  ;;  %v3766_v12 = vor.u32 1.1754944e-38, %v3765_v43  ;;  %v3830_v47 = vmul.f32 %v3829_v1, %v8754_v22 }
 0x34f   : > { %v3987_v34 = vadd.f32 0.014752088, %v3986_v21  ;;  %v3934_v57 = vadd.f32 0.00028619796, %v3933_v50  ;;  %vm3804_vm0 = vcmp.eq.f32.partialorder %v3803_v25, 8.507059e+37 }
 0x350   : > { %v4024_v40 = vmul.f32 3.8918573e-05, %v8836_v33  ;;  %v5558_v28 = vpop.eup %5557  ;;  %v8864_v35 = vadd.f32 %v8480_v54, %v3437_v38  ;;  %v3767_v6 = vsel %vm3764_vm12, %v3766_v12, %v3762_v17  ;;  %v3831_v5 = vadd.f32 0.4994258, %v3830_v47 }
 0x351   : > { %v3795_v53 = vmul.f32 %v5558_v28, %v8833_v30  ;;  %v3768_v15 = vmul.f32 %v3767_v6, %v3743_v31  ;;  %vm3800_vm13 = vweird.f32 %v5558_v28  ;;  %v3866_v38 = vmul.f32 %v3865_v46, %v8809_v13 }
 0x352   : > { %v4025_v8 = vadd.f32 0.001143296, %v4024_v40  ;;  %v8878_v58 = vmul.f32 0.70710677, %v8864_v35  ;;  %v3832_v31 = vmul.f32 %v3831_v5, %v8754_v22  ;;  %v3988_v24 = vmul.f32 %v3987_v34, %v8817_v10  ;;  %vm3801_vm15 = vmor %vm3799_vm14, %vm3800_vm13 }
 0x353   : > { %v3796_v49 = vsub.f32 1.0, %v3795_v53  ;;  %v3867_v4 = vadd.f32 0.014752088, %v3866_v38  ;;  %v5316_v37 = vclamps-f32 %v3768_v15, 1.0  ;;  %v3935_v21 = vmul.f32 %v3934_v57, %v8854_v29 }
 0x354   : > { %v4026_v52 = vmul.f32 %v4025_v8, %v8836_v33  ;;  %v4051_v40 = vmul.f32 %v8878_v58, %v8878_v58  ;;  %v3858_v30 = vadd.f32 0.05243302, %v3857_v9  ;;  %v3973_v53 = vmul.f32 2.1237322e-06, %v8817_v10 }
 0x355   : > { %v3420_v55 = vpop.f32.mrf.mxu1  ;;  %v3868_v12 = vmul.f32 %v3867_v4, %v8809_v13  ;;  %v3989_v2 = vadd.f32 0.112945676, %v3988_v24  ;;  %v3465_v46 = vmul.f32 0.5, %v8657_v27  ;;  %v3466_v47 = vmul.f32 0.5, %v8701_v18 }
 0x356   : > { %v3438_v48 = vadd.f32 %v3420_v55, %v2471_v26  ;;  %v3896_v26 = vadd.f32 0.0036580483, %v3895_v20  ;;  %v4027_v62 = vadd.f32 0.014752088, %v4026_v52  ;;  %v8900_v1 = vmin.f32 %v4051_v40, 16.0 }
 0x357   : > { %v3821_v52 = vmul.f32 %v3820_v3, %v8754_v22  ;;  %v3869_v5 = vadd.f32 0.112945676, %v3868_v12  ;;  %v3859_v15 = vmul.f32 %v3858_v30, %v8809_v13  ;;  %v3974_v27 = vadd.f32 0.00028619796, %v3973_v53 }
 0x358   : > { %v8872_v51 = vadd.f32 %v8480_v54, %v3438_v48  ;;  %v3797_v54 = vmul.f32 %v5558_v28, %v3796_v49  ;;  %v8898_v48 = vadd.f32 1.0, %v3832_v31  ;;  %v4028_v50 = vmul.f32 %v4027_v62, %v8836_v33 }
 0x359   : > { %v4137_v49 = vadd.f32 1.0, %v5316_v37  ;;  %v3897_v20 = vmul.f32 %v3896_v26, %v8825_v36  ;;  %v3990_v25 = vmul.f32 %v3989_v2, %v8817_v10  ;;  %v3944_v3 = vmul.f32 3.8918573e-05, %v8854_v29 }
 0x35a   : > { %v8881_v16 = vmul.f32 0.70710677, %v8872_v51  ;;  %v3798_v43 = vadd.f32 %v5558_v28, %v3797_v54  ;;  %5559 = vrcp.f32 %v8898_v48  ;;  %v4064_v54 = vmul.f32 3.8918573e-05, %v8900_v1 }
 0x35b   : > { %v4029_v9 = vadd.f32 0.112945676, %v4028_v50  ;;  %v4153_v57 = vmul.f32 %v4137_v49, %v3465_v46  ;;  %v3975_v62 = vmul.f32 %v3974_v27, %v8817_v10  ;;  %v3991_v37 = vadd.f32 0.4994258, %v3990_v25 }
 0x35c   : > { %v4091_v45 = vmul.f32 %v8881_v16, %v8881_v16  ;;  %v3802_v55 = vsel %vm3801_vm15, %v5558_v28, %v3798_v43  ;;  %v3904_v28 = vmul.f32 3.8918573e-05, %v8825_v36  ;;  %v3898_v43 = vadd.f32 0.05243302, %v3897_v20 }
 0x35d   : > { %v3807_v59 = vsel %vm3804_vm0, %v3806_v7, %v3802_v55  ;;  %v4065_v24 = vadd.f32 0.001143296, %v4064_v54  ;;  %v4013_v55 = vmul.f32 2.1237322e-06, %v8836_v33  ;;  %v3945_v12 = vadd.f32 0.001143296, %v3944_v3 }
 0x35e   : > { %v8896_v17 = vmin.f32 %v4091_v45, 16.0  ;;  %v3808_v8 = vmul.f32 %v3807_v59, %v3783_v19  ;;  %v3936_v19 = vadd.f32 0.0036580483, %v3935_v21  ;;  %v3905_v38 = vadd.f32 0.001143296, %v3904_v28 }
 0x35f   : > { %v3870_v45 = vmul.f32 %v3869_v5, %v8809_v13  ;;  %v4030_v59 = vmul.f32 %v4029_v9, %v8836_v33  ;;  %v3822_v53 = vadd.f32 1.1283791, %v3821_v52  ;;  %v3860_v2 = vadd.f32 0.18741608, %v3859_v15 }
 0x360   : > { %v5317_v6 = vclamps-f32 %v3808_v8, 1.0  ;;  %v4104_v34 = vmul.f32 3.8918573e-05, %v8896_v17  ;;  %v8916_v40 = vpop.eup %5559  ;;  %v3906_v22 = vmul.f32 %v3905_v38, %v8825_v36  ;;  %v3937_v26 = vmul.f32 %v3936_v19, %v8854_v29 }
 0x361   : > { %v3835_v4 = vmul.f32 %v8916_v40, %v8898_v48  ;;  %v3871_v21 = vadd.f32 0.4994258, %v3870_v45  ;;  %v4066_v50 = vmul.f32 %v4065_v24, %v8900_v1  ;;  %v3899_v20 = vmul.f32 %v3898_v43, %v8825_v36 }
 0x362   : > { %v4138_v61 = vadd.f32 1.0, %v5317_v6  ;;  %v4105_v31 = vadd.f32 0.001143296, %v4104_v34  ;;  %v3907_v8 = vadd.f32 0.014752088, %v3906_v22  ;;  %v3992_v52 = vmul.f32 %v3991_v37, %v8817_v10 }
 0x363   : > { %v3836_v30 = vsub.f32 1.0, %v3835_v4  ;;  %v3872_v46 = vmul.f32 %v3871_v21, %v8809_v13  ;;  %v3938_v19 = vadd.f32 0.05243302, %v3937_v26  ;;  %v3976_v34 = vadd.f32 0.0036580483, %v3975_v62 }
 0x364   : > { %v4154_v18 = vmul.f32 %v4138_v61, %v3466_v47  ;;  %v4106_v28 = vmul.f32 %v4105_v31, %v8896_v17  ;;  %v3908_v49 = vmul.f32 %v3907_v8, %v8825_v36  ;;  %v3946_v47 = vmul.f32 %v3945_v12, %v8854_v29 }
 0x365   : > { %v3837_v6 = vmul.f32 %v8916_v40, %v3836_v30  ;;  %v8934_v54 = vadd.f32 1.0, %v3872_v46  ;;  %v4014_v61 = vadd.f32 0.00028619796, %v4013_v55  ;;  %v4031_v5 = vadd.f32 0.4994258, %v4030_v59 }
 0x366   : > { %v4166_v7 = vpack.c.bf16 %v4154_v18, %v4153_v57  ;;  %v3909_v15 = vadd.f32 0.112945676, %v3908_v49  ;;  %v4107_v27 = vadd.f32 0.014752088, %v4106_v28  ;;  %vm3840_vm1 = vweird.f32 %v8916_v40 }
 0x367   : > { %v3838_v25 = vadd.f32 %v8916_v40, %v3837_v6  ;;  %5561 = vrcp.f32 %v8934_v54  ;;  %v3861_v38 = vmul.f32 %v3860_v2, %v8809_v13  ;;  %v4067_v9 = vadd.f32 0.014752088, %v4066_v50 }
 0x368   : > { %5345 = vmatmul.msk.bf16.gmra.mxu2 %vm2302_vm2, %v4166_v7  ;;  %v3845_v57 = vand.u32 2147483648, %v8898_v48  ;;  %v3947_v18 = vadd.f32 0.014752088, %v3946_v47  ;;  %v3900_v45 = vadd.f32 0.18741608, %v3899_v20  ;;  %vm3839_vm3 = vweird.f32 %v8898_v48 }
 0x369   : > { %v3843_v43 = vand.u32 2147483647, %v8898_v48  ;;  %v3910_v31 = vmul.f32 %v3909_v15, %v8825_v36  ;;  %v3939_v22 = vmul.f32 %v3938_v19, %v8854_v29  ;;  %v3977_v3 = vmul.f32 %v3976_v34, %v8817_v10  ;;  %vm8948_vm4 = vmor %vm3839_vm3, %vm3840_vm1 }
 0x36a   : > { %v4032_v26 = vmul.f32 %v4031_v5, %v8836_v33  ;;  %v8952_v13 = vadd.f32 1.0, %v3992_v52  ;;  %v4015_v7 = vmul.f32 %v4014_v61, %v8836_v33  ;;  %v4108_v4 = vmul.f32 %v4107_v27, %v8896_v17 }
 0x36b   : > { %v3842_v48 = vsel %vm8948_vm4, %v8916_v40, %v3838_v25  ;;  %v4068_v62 = vmul.f32 %v4067_v9, %v8900_v1  ;;  %v3846_v37 = vor.u32 1.1754944e-38, %v3845_v57  ;;  %v3911_v55 = vadd.f32 0.4994258, %v3910_v31 }
 0x36c   : > { %v3948_v21 = vmul.f32 %v3947_v18, %v8854_v29  ;;  %v3823_v30 = vmul.f32 %v3822_v53, %v8742_v60  ;;  %v3862_v8 = vadd.f32 1.1283791, %v3861_v38  ;;  %v3901_v12 = vmul.f32 %v3900_v45, %v8825_v36 }
 0x36d   : > { %v5562_v59 = vpop.eup %5561  ;;  %vm3844_vm5 = vcmp.eq.f32.partialorder %v3843_v43, 8.507059e+37  ;;  %v3940_v2 = vadd.f32 0.18741608, %v3939_v22  ;;  %v8963_v28 = vadd.f32 1.0, %v4032_v26  ;;  %v3978_v40 = vadd.f32 0.05243302, %v3977_v3 }
 0x36e   : > { %v3847_v46 = vsel %vm3844_vm5, %v3846_v37, %v3842_v48  ;;  %v3875_v50 = vmul.f32 %v5562_v59, %v8934_v54  ;;  %v4109_v6 = vadd.f32 0.112945676, %v4108_v4  ;;  %v3912_v49 = vmul.f32 %v3911_v55, %v8825_v36 }
 0x36f   : > { %v3949_v47 = vadd.f32 0.112945676, %v3948_v21  ;;  %5563 = vrcp.f32 %v8952_v13  ;;  %v4016_v20 = vadd.f32 0.0036580483, %v4015_v7  ;;  %v4069_v19 = vadd.f32 0.112945676, %v4068_v62 }
 0x370   : > { %v3876_v60 = vsub.f32 1.0, %v3875_v50  ;;  %v3848_v53 = vmul.f32 %v3847_v46, %v3823_v30  ;;  %v3885_v34 = vand.u32 2147483648, %v8934_v54  ;;  %v8969_v52 = vadd.f32 1.0, %v3912_v49 }
 0x371   : > { %v3950_v61 = vmul.f32 %v3949_v47, %v8854_v29  ;;  %5565 = vrcp.f32 %v8963_v28  ;;  %vm3880_vm6 = vweird.f32 %v5562_v59  ;;  %v3883_v15 = vand.u32 2147483647, %v8934_v54 }
 0x372   : > { %v3877_v5 = vmul.f32 %v5562_v59, %v3876_v60  ;;  %v3863_v36 = vmul.f32 %v3862_v8, %v8776_v23  ;;  %v3902_v27 = vadd.f32 1.1283791, %v3901_v12  ;;  %v4110_v25 = vmul.f32 %v4109_v6, %v8896_v17 }
 0x373   : > { %5567 = vrcp.f32 %v8969_v52  ;;  %v4017_v38 = vmul.f32 %v4016_v20, %v8836_v33  ;;  %vm3879_vm7 = vweird.f32 %v8934_v54  ;;  %v3951_v57 = vadd.f32 0.4994258, %v3950_v61 }
 0x374   : > { %v3878_v9 = vadd.f32 %v5562_v59, %v3877_v5  ;;  %v3941_v18 = vmul.f32 %v3940_v2, %v8854_v29  ;;  %v4070_v45 = vmul.f32 %v4069_v19, %v8900_v1  ;;  %v5318_v43 = vclamps-f32 %v3848_v53, 1.0  ;;  %vm3881_vm8 = vmor %vm3879_vm7, %vm3880_vm6 }
 0x375   : > { %v3886_v31 = vor.u32 1.1754944e-38, %v3885_v34  ;;  %v8981_v22 = vpop.eup %5563  ;;  %v3979_v23 = vmul.f32 %v3978_v40, %v8817_v10  ;;  %vm3884_vm9 = vcmp.eq.f32.partialorder %v3883_v15, 8.507059e+37  ;;  %v3952_v26 = vmul.f32 %v3951_v57, %v8854_v29 }
 0x376   : > { %v3882_v3 = vsel %vm3881_vm8, %v5562_v59, %v3878_v9  ;;  %v3467_v24 = vmul.f32 0.5, %v8731_v11  ;;  %v4053_v54 = vmul.f32 2.1237322e-06, %v8900_v1  ;;  %v4111_v7 = vadd.f32 0.4994258, %v4110_v25 }
 0x377   : > { %v3887_v4 = vsel %vm3884_vm9, %v3886_v31, %v3882_v3  ;;  %v8987_v48 = vpop.eup %5565  ;;  %v4018_v62 = vadd.f32 0.05243302, %v4017_v38  ;;  %v4093_v37 = vmul.f32 2.1237322e-06, %v8896_v17  ;;  %v8990_v21 = vadd.f32 1.0, %v3952_v26 }
 0x378   : > { %v3888_v55 = vmul.f32 %v3887_v4, %v3863_v36  ;;  %v3468_v59 = vmul.f32 0.5, %v8763_v41  ;;  %v3903_v8 = vmul.f32 %v3902_v27, %v8797_v14  ;;  %v4071_v29 = vadd.f32 0.4994258, %v4070_v45 }
 0x379   : > { %v5568_v30 = vpop.eup %5567  ;;  %v4139_v12 = vadd.f32 1.0, %v5318_v43  ;;  %v3942_v11 = vadd.f32 1.1283791, %v3941_v18  ;;  %v3980_v2 = vadd.f32 0.18741608, %v3979_v23  ;;  %v4035_v40 = vmul.f32 %v8987_v48, %v8963_v28 }
 0x37a   : > { %v5319_v46 = vclamps-f32 %v3888_v55, 1.0  ;;  %v3915_v50 = vmul.f32 %v5568_v30, %v8969_v52  ;;  %v4054_v6 = vadd.f32 0.00028619796, %v4053_v54  ;;  %v4112_v49 = vmul.f32 %v4111_v7, %v8896_v17 }
 0x37b   : > { %5569 = vrcp.f32 %v8990_v21  ;;  %v4019_v47 = vmul.f32 %v4018_v62, %v8836_v33  ;;  %v4094_v41 = vadd.f32 0.00028619796, %v4093_v37  ;;  %v3995_v19 = vmul.f32 %v8981_v22, %v8952_v13 }
 0x37c   : > { %v4140_v20 = vadd.f32 1.0, %v5319_v46  ;;  %v3916_v14 = vsub.f32 1.0, %v3915_v50  ;;  %v4072_v60 = vmul.f32 %v4071_v29, %v8900_v1  ;;  %v4155_v53 = vmul.f32 %v4139_v12, %v3467_v24 }
 0x37d   : > { %v3925_v34 = vand.u32 2147483648, %v8969_v52  ;;  %vm3920_vm10 = vweird.f32 %v5568_v30  ;;  %v3923_v15 = vand.u32 2147483647, %v8969_v52  ;;  %v3981_v36 = vmul.f32 %v3980_v2, %v8817_v10 }
 0x37e   : > { %v4156_v61 = vmul.f32 %v4140_v20, %v3468_v59  ;;  %v3917_v5 = vmul.f32 %v5568_v30, %v3916_v14  ;;  %v4036_v27 = vsub.f32 1.0, %v4035_v40  ;;  %v4055_v25 = vmul.f32 %v4054_v6, %v8900_v1 }
 0x37f   : > { %v9007_v38 = vadd.f32 1.0, %v4112_v49  ;;  %v4095_v9 = vmul.f32 %v4094_v41, %v8896_v17  ;;  %vm3919_vm11 = vweird.f32 %v8969_v52  ;;  %v3943_v43 = vmul.f32 %v3942_v11, %v8828_v44 }
 0x380   : > { %v4167_v57 = vpack.c.bf16 %v4156_v61, %v4155_v53  ;;  %v3918_v18 = vadd.f32 %v5568_v30, %v3917_v5  ;;  %v3996_v31 = vsub.f32 1.0, %v3995_v19  ;;  %v9012_v23 = vadd.f32 1.0, %v4072_v60  ;;  %vm3921_vm12 = vmor %vm3919_vm11, %vm3920_vm10 }
 0x381   : > { %v5570_v45 = vpop.eup %5569  ;;  %v3926_v3 = vor.u32 1.1754944e-38, %v3925_v34  ;;  %v4020_v10 = vadd.f32 0.18741608, %v4019_v47  ;;  %vm3924_vm13 = vcmp.eq.f32.partialorder %v3923_v15, 8.507059e+37  ;;  %v4037_v54 = vmul.f32 %v8987_v48, %v4036_v27 }
 0x382   : > { %5346 = vmatmul.msk.bf16.gmra.mxu2 %vm2302_vm2, %v4167_v57  ;;  %v3922_v26 = vsel %vm3921_vm12, %v5568_v30, %v3918_v18  ;;  %v3955_v24 = vmul.f32 %v5570_v45, %v8990_v21  ;;  %v4056_v7 = vadd.f32 0.0036580483, %v4055_v25  ;;  %5571 = vrcp.f32 %v9007_v38 }
 0x383   : > { %v3927_v52 = vsel %vm3924_vm13, %v3926_v3, %v3922_v26  ;;  %v3982_v4 = vadd.f32 1.1283791, %v3981_v36  ;;  %v4005_v44 = vand.u32 2147483648, %v8952_v13  ;;  %v4096_v62 = vadd.f32 0.0036580483, %v4095_v9 }
 0x384   : > { %v3956_v37 = vsub.f32 1.0, %v3955_v24  ;;  %v3997_v55 = vmul.f32 %v8981_v22, %v3996_v31  ;;  %vm4000_vm14 = vweird.f32 %v8981_v22  ;;  %5573 = vrcp.f32 %v9012_v23 }
 0x385   : > { %v3965_v30 = vand.u32 2147483648, %v8990_v21  ;;  %v3928_v59 = vmul.f32 %v3927_v52, %v3903_v8  ;;  %vm3960_vm15 = vweird.f32 %v5570_v45  ;;  %v3963_v12 = vand.u32 2147483647, %v8990_v21 }
 0x386   : > { %v3957_v29 = vmul.f32 %v5570_v45, %v3956_v37  ;;  %v4021_v11 = vmul.f32 %v4020_v10, %v8836_v33  ;;  %v4038_v2 = vadd.f32 %v8987_v48, %v4037_v54  ;;  %vm4040_vm0 = vweird.f32 %v8987_v48 }
 0x387   : > { %v4057_v46 = vmul.f32 %v4056_v7, %v8900_v1  ;;  %v4045_v50 = vand.u32 2147483648, %v8963_v28  ;;  %v4097_v40 = vmul.f32 %v4096_v62, %v8896_v17  ;;  %vm3959_vm1 = vweird.f32 %v8990_v21 }
 0x388   : > { %v3958_v6 = vadd.f32 %v5570_v45, %v3957_v29  ;;  %v9031_v8 = vpop.eup %5571  ;;  %v3998_v49 = vadd.f32 %v8981_v22, %v3997_v55  ;;  %vm4039_vm3 = vweird.f32 %v8963_v28  ;;  %v4043_v33 = vand.u32 2147483647, %v8963_v28  ;;  %vm3961_vm4 = vmor %vm3959_vm1, %vm3960_vm15 }
 0x389   : > { %v3966_v47 = vor.u32 1.1754944e-38, %v3965_v30  ;;  %vm3999_vm5 = vweird.f32 %v8952_v13  ;;  %vm9037_vm6 = vmor %vm4039_vm3, %vm4040_vm0  ;;  %v5320_v20 = vclamps-f32 %v3928_v59, 1.0  ;;  %vm3964_vm7 = vcmp.eq.f32.partialorder %v3963_v12, 8.507059e+37 }
 0x38a   : > { %v3962_v14 = vsel %vm3961_vm4, %v5570_v45, %v3958_v6  ;;  %v9041_v21 = vpop.eup %5573  ;;  %v4003_v19 = vand.u32 2147483647, %v8952_v13  ;;  %v4022_v60 = vadd.f32 1.1283791, %v4021_v11  ;;  %v4042_v28 = vsel %vm9037_vm6, %v8987_v48, %v4038_v2  ;;  %vm9049_vm8 = vmor %vm3999_vm5, %vm4000_vm14 }
 0x38b   : > { %v3967_v53 = vsel %vm3964_vm7, %v3966_v47, %v3962_v14  ;;  %v4046_v61 = vor.u32 1.1754944e-38, %v4045_v50  ;;  %v4098_v5 = vadd.f32 0.05243302, %v4097_v40  ;;  %v4115_v15 = vmul.f32 %v9031_v8, %v9007_v38 }
 0x38c   : > { %v3968_v36 = vmul.f32 %v3967_v53, %v3943_v43  ;;  %v4002_v13 = vsel %vm9049_vm8, %v8981_v22, %v3998_v49  ;;  %v4006_v27 = vor.u32 1.1754944e-38, %v4005_v44  ;;  %vm4044_vm9 = vcmp.eq.f32.partialorder %v4043_v33, 8.507059e+37 }
 0x38d   : > { %v4058_v48 = vadd.f32 0.05243302, %v4057_v46  ;;  %v4047_v25 = vsel %vm4044_vm9, %v4046_v61, %v4042_v28  ;;  %v4075_v9 = vmul.f32 %v9041_v21, %v9012_v23  ;;  %v4141_v18 = vadd.f32 1.0, %v5320_v20 }
 0x38e   : > { %v5321_v57 = vclamps-f32 %v3968_v36, 1.0  ;;  %v3469_v45 = vmul.f32 0.5, %v8779_v63  ;;  %v3470_v31 = vmul.f32 0.5, %v8815_v32  ;;  %vm4004_vm10 = vcmp.eq.f32.partialorder %v4003_v19, 8.507059e+37 }
 0x38f   : > { %v4023_v43 = vmul.f32 %v4022_v60, %v8806_v56  ;;  %v4007_v3 = vsel %vm4004_vm10, %v4006_v27, %v4002_v13  ;;  %v4099_v10 = vmul.f32 %v4098_v5, %v8896_v17  ;;  %v4116_v22 = vsub.f32 1.0, %v4115_v15 }
 0x390   : > { %v4142_v26 = vadd.f32 1.0, %v5321_v57  ;;  %v3983_v24 = vmul.f32 %v3982_v4, %v8783_v39  ;;  %v4059_v7 = vmul.f32 %v4058_v48, %v8900_v1  ;;  %v4076_v52 = vsub.f32 1.0, %v4075_v9  ;;  %v9072_v39 = vld [vmem:[%s9813_s14] ss:$0 sm:$0xff]  ;;  %v4240_v4 = vpop.f32.mrf.mxu2 }
 0x391   : > { %v4048_v54 = vmul.f32 %v4047_v25, %v4023_v43  ;;  %v4157_v44 = vmul.f32 %v4141_v18, %v3469_v45  ;;  %v4100_v63 = vadd.f32 0.18741608, %v4099_v10  ;;  %v4117_v32 = vmul.f32 %v9031_v8, %v4116_v22 }
 0x392   : > { %v4158_v62 = vmul.f32 %v4142_v26, %v3470_v31  ;;  %v4008_v37 = vmul.f32 %v4007_v3, %v3983_v24  ;;  %v4060_v56 = vadd.f32 0.18741608, %v4059_v7  ;;  %v4077_v59 = vmul.f32 %v9041_v21, %v4076_v52 }
 0x393   : > { %v5323_v30 = vclamps-f32 %v4048_v54, 1.0  ;;  %v4101_v12 = vmul.f32 %v4100_v63, %v8896_v17  ;;  %v4118_v11 = vadd.f32 %v9031_v8, %v4117_v32  ;;  %vm4120_vm11 = vweird.f32 %v9031_v8 }
 0x394   : > { %v4168_v55 = vpack.c.bf16 %v4158_v62, %v4157_v44  ;;  %v5322_v29 = vclamps-f32 %v4008_v37, 1.0  ;;  %v9078_v2 = vadd.f32 %v9072_v39, %v4240_v4  ;;  %v4061_v50 = vmul.f32 %v4060_v56, %v8900_v1 }
 0x395   : > { %v4144_v46 = vadd.f32 1.0, %v5323_v30  ;;  %vm4080_vm12 = vweird.f32 %v9041_v21  ;;  %v4125_v40 = vand.u32 2147483648, %v9007_v38  ;;  %v4078_v6 = vadd.f32 %v9041_v21, %v4077_v59 }
 0x396   : > { %5347 = vmatmul.msk.bf16.gmra.mxu2 %vm2302_vm2, %v4168_v55  ;;  %vm4119_vm13 = vweird.f32 %v9007_v38  ;;  %v4123_v17 = vand.u32 2147483647, %v9007_v38  ;;  %v9087_v49 = vmul.f32 0.70710677, %v9078_v2  ;;  %v4143_v33 = vadd.f32 1.0, %v5322_v29 }
 0x397   : > { %v3472_v47 = vmul.f32 0.5, %v8789_v42  ;;  %vm4079_vm14 = vweird.f32 %v9012_v23  ;;  %v4085_v1 = vand.u32 2147483648, %v9012_v23  ;;  %vm4121_vm15 = vmor %vm4119_vm13, %vm4120_vm11  ;;  %v4083_v41 = vand.u32 2147483647, %v9012_v23 }
 0x398   : > { %v4102_v20 = vadd.f32 1.1283791, %v4101_v12  ;;  %v4122_v14 = vsel %vm4121_vm15, %v9031_v8, %v4118_v11  ;;  %v4312_v19 = vmul.f32 %v9087_v49, %v9087_v49  ;;  %v3471_v38 = vmul.f32 0.5, %v8767_v0  ;;  %vm4081_vm0 = vmor %vm4079_vm14, %vm4080_vm12 }
 0x399   : > { %v4062_v60 = vadd.f32 1.1283791, %v4061_v50  ;;  %v4126_v42 = vor.u32 1.1754944e-38, %v4125_v40  ;;  %v4160_v28 = vmul.f32 %v4144_v46, %v3472_v47  ;;  %v4082_v53 = vsel %vm4081_vm0, %v9041_v21, %v4078_v6 }
 0x39a   : > { %vm4124_vm1 = vcmp.eq.f32.partialorder %v4123_v17, 8.507059e+37  ;;  %v9100_v34 = vmin.f32 %v4312_v19, 16.0  ;;  %v4086_v23 = vor.u32 1.1754944e-38, %v4085_v1  ;;  %v4159_v5 = vmul.f32 %v4143_v33, %v3471_v38 }
 0x39b   : > { %v4127_v61 = vsel %vm4124_vm1, %v4126_v42, %v4122_v14  ;;  %vm4084_vm3 = vcmp.eq.f32.partialorder %v4083_v41, 8.507059e+37  ;;  %v4103_v8 = vmul.f32 %v4102_v20, %v8881_v16  ;;  %v4063_v36 = vmul.f32 %v4062_v60, %v8878_v58  ;;  %v4242_v16 = vpop.f32.mrf.mxu2 }
 0x39c   : > { %v4325_v15 = vmul.f32 3.8918573e-05, %v9100_v34  ;;  %v4087_v0 = vsel %vm4084_vm3, %v4086_v23, %v4082_v53  ;;  %v4169_v27 = vpack.c.bf16 %v4160_v28, %v4159_v5  ;;  %v3474_v3 = vmul.f32 0.5, %v8872_v51 }
 0x39d   : > { %v4128_v13 = vmul.f32 %v4127_v61, %v4103_v8  ;;  %v4088_v25 = vmul.f32 %v4087_v0, %v4063_v36  ;;  %v9110_v58 = vadd.f32 %v9072_v39, %v4242_v16  ;;  %v3473_v22 = vmul.f32 0.5, %v8864_v35 }
 0x39e   : > { %v4326_v48 = vadd.f32 0.001143296, %v4325_v15  ;;  %v4314_v51 = vmul.f32 2.1237322e-06, %v9100_v34 }
 0x39f   : > { %v5325_v9 = vclamps-f32 %v4128_v13, 1.0  ;;  %v5324_v18 = vclamps-f32 %v4088_v25, 1.0  ;;  %v9114_v24 = vmul.f32 0.70710677, %v9110_v58 }
 0x3a0   : > { %v4327_v21 = vmul.f32 %v4326_v48, %v9100_v34  ;;  %v4315_v32 = vadd.f32 0.00028619796, %v4314_v51 }
 0x3a1   : > { %v4146_v31 = vadd.f32 1.0, %v5325_v9  ;;  %v4145_v43 = vadd.f32 1.0, %v5324_v18  ;;  %v4352_v52 = vmul.f32 %v9114_v24, %v9114_v24 }
 0x3a2   : > { %v4328_v57 = vadd.f32 0.014752088, %v4327_v21  ;;  %v4316_v29 = vmul.f32 %v4315_v32, %v9100_v34 }
 0x3a3   : > { %v4162_v26 = vmul.f32 %v4146_v31, %v3474_v3  ;;  %v4161_v54 = vmul.f32 %v4145_v43, %v3473_v22  ;;  %v9119_v62 = vmin.f32 %v4352_v52, 16.0 }
 0x3a4   : > { %v4329_v45 = vmul.f32 %v4328_v57, %v9100_v34  ;;  %v4317_v17 = vadd.f32 0.0036580483, %v4316_v29 }
 0x3a5   : > { %v4170_v44 = vpack.c.bf16 %v4162_v26, %v4161_v54  ;;  %v4365_v63 = vmul.f32 3.8918573e-05, %v9119_v62  ;;  %v4354_v40 = vmul.f32 2.1237322e-06, %v9119_v62 }
 0x3a6   : > { %5348 = vmatmul.msk.bf16.gmra.mxu2 %vm2302_vm2, %v4169_v27  ;;  %v4330_v10 = vadd.f32 0.112945676, %v4329_v45  ;;  %v4318_v60 = vmul.f32 %v4317_v17, %v9100_v34 }
 0x3a7   : > { %v4366_v35 = vadd.f32 0.001143296, %v4365_v63  ;;  %v4355_v14 = vadd.f32 0.00028619796, %v4354_v40 }
 0x3a8   : > { %v4331_v7 = vmul.f32 %v4330_v10, %v9100_v34  ;;  %v4319_v36 = vadd.f32 0.05243302, %v4318_v60 }
 0x3a9   : > { %v4367_v30 = vmul.f32 %v4366_v35, %v9119_v62  ;;  %v4356_v5 = vmul.f32 %v4355_v14, %v9119_v62 }
 0x3aa   : > { %v4332_v37 = vadd.f32 0.4994258, %v4331_v7  ;;  %v4320_v18 = vmul.f32 %v4319_v36, %v9100_v34 }
 0x3ab   : > { %v4368_v59 = vadd.f32 0.014752088, %v4367_v30  ;;  %v4357_v9 = vadd.f32 0.0036580483, %v4356_v5 }
 0x3ac   : > { %v4333_v55 = vmul.f32 %v4332_v37, %v9100_v34 }
 0x3ad   : > { %v4369_v11 = vmul.f32 %v4368_v59, %v9119_v62  ;;  %v4358_v7 = vmul.f32 %v4357_v9, %v9119_v62 }
 0x3ae   : > { %v9130_v12 = vadd.f32 1.0, %v4333_v55 }
 0x3af   : > { %v4245_v56 = vpop.f32.mrf.mxu2  ;;  %v4370_v50 = vadd.f32 0.112945676, %v4369_v11  ;;  %v4359_v11 = vadd.f32 0.05243302, %v4358_v7 }
 0x3b0   : > { %v9127_v4 = vadd.f32 %v9072_v39, %v4245_v56  ;;  %5575 = vrcp.f32 %v9130_v12  ;;  %v4344_v36 = vand.u32 2147483647, %v9130_v12 }
 0x3b1   : > { %v4371_v33 = vmul.f32 %v4370_v50, %v9119_v62 }
 0x3b2   : > { %v9134_v46 = vmul.f32 0.70710677, %v9127_v4  ;;  %vm4345_vm6 = vcmp.eq.f32.partialorder %v4344_v36, 8.507059e+37 }
 0x3b3   : > { %v4372_v41 = vadd.f32 0.4994258, %v4371_v33 }
 0x3b4   : > { %v4392_v6 = vmul.f32 %v9134_v46, %v9134_v46 }
 0x3b5   : > { %v4373_v42 = vmul.f32 %v4372_v41, %v9119_v62 }
 0x3b6   : > { %5349 = vmatmul.msk.bf16.gmra.mxu2 %vm2302_vm2, %v4170_v44  ;;  %v9141_v47 = vmin.f32 %v4392_v6, 16.0  ;;  %v9153_v23 = vpop.eup %5575  ;;  %v4321_v44 = vadd.f32 0.18741608, %v4320_v18  ;;  %vm4340_vm2 = vweird.f32 %v9130_v12 }
 0x3b7   : > { %v4247_v1 = vpop.f32.mrf.mxu2  ;;  %v9155_v61 = vadd.f32 1.0, %v4373_v42  ;;  %v4336_v13 = vmul.f32 %v9153_v23, %v9130_v12  ;;  %vm4341_vm4 = vweird.f32 %v9153_v23 }
 0x3b8   : > { %v9144_v20 = vadd.f32 %v9072_v39, %v4247_v1  ;;  %v4394_v19 = vmul.f32 2.1237322e-06, %v9141_v47  ;;  %v4405_v38 = vmul.f32 3.8918573e-05, %v9141_v47  ;;  %v4322_v6 = vmul.f32 %v4321_v44, %v9100_v34  ;;  %vm9211_vm5 = vmor %vm4340_vm2, %vm4341_vm4 }
 0x3b9   : > { %5577 = vrcp.f32 %v9155_v61  ;;  %v4337_v43 = vsub.f32 1.0, %v4336_v13  ;;  %v4346_v34 = vand.u32 2147483648, %v9130_v12  ;;  %vm4380_vm8 = vweird.f32 %v9155_v61 }
 0x3ba   : > { %v4406_v28 = vadd.f32 0.001143296, %v4405_v38  ;;  %v9151_v53 = vmul.f32 0.70710677, %v9144_v20  ;;  %v4395_v8 = vadd.f32 0.00028619796, %v4394_v19 }
 0x3bb   : > { %v4338_v35 = vmul.f32 %v9153_v23, %v4337_v43 }
 0x3bc   : > { %v4407_v15 = vmul.f32 %v4406_v28, %v9141_v47  ;;  %v4432_v0 = vmul.f32 %v9151_v53, %v9151_v53  ;;  %v4396_v57 = vmul.f32 %v4395_v8, %v9141_v47  ;;  %v4360_v28 = vmul.f32 %v4359_v11, %v9119_v62 }
 0x3bd   : > { %v4339_v1 = vadd.f32 %v9153_v23, %v4338_v35 }
 0x3be   : > { %v9164_v27 = vmin.f32 %v4432_v0, 16.0  ;;  %v4408_v25 = vadd.f32 0.014752088, %v4407_v15  ;;  %v4397_v52 = vadd.f32 0.0036580483, %v4396_v57 }
 0x3bf   : > { %v9179_v54 = vpop.eup %5577  ;;  %v4323_v15 = vadd.f32 1.1283791, %v4322_v6  ;;  %v4343_v13 = vsel %vm9211_vm5, %v9153_v23, %v4339_v1  ;;  %v4361_v43 = vadd.f32 0.18741608, %v4360_v28 }
 0x3c0   : > { %v4409_v45 = vmul.f32 %v4408_v25, %v9141_v47  ;;  %v4445_v31 = vmul.f32 3.8918573e-05, %v9164_v27  ;;  %v4434_v3 = vmul.f32 2.1237322e-06, %v9164_v27  ;;  %v4376_v30 = vmul.f32 %v9179_v54, %v9155_v61 }
 0x3c1   : > { %v4398_v50 = vmul.f32 %v4397_v52, %v9141_v47  ;;  %v4324_v23 = vmul.f32 %v4323_v15, %v9087_v49  ;;  %vm4381_vm7 = vweird.f32 %v9179_v54  ;;  %v4362_v49 = vmul.f32 %v4361_v43, %v9119_v62 }
 0x3c2   : > { %v4410_v10 = vadd.f32 0.112945676, %v4409_v45  ;;  %v4446_v22 = vadd.f32 0.001143296, %v4445_v31  ;;  %v4435_v32 = vadd.f32 0.00028619796, %v4434_v3  ;;  %vm9246_vm9 = vmor %vm4380_vm8, %vm4381_vm7 }
 0x3c3   : > { %v4377_v19 = vsub.f32 1.0, %v4376_v30  ;;  %v4399_v5 = vadd.f32 0.05243302, %v4398_v50  ;;  %v4347_v31 = vor.u32 1.1754944e-38, %v4346_v34 }
 0x3c4   : > { %v4250_v48 = vpop.f32.mrf.mxu2  ;;  %v4411_v51 = vmul.f32 %v4410_v10, %v9141_v47  ;;  %v4447_v37 = vmul.f32 %v4446_v22, %v9164_v27  ;;  %v4436_v41 = vmul.f32 %v4435_v32, %v9164_v27 }
 0x3c5   : > { %v9167_v21 = vadd.f32 %v9072_v39, %v4250_v48  ;;  %v4378_v9 = vmul.f32 %v9179_v54, %v4377_v19  ;;  %v4400_v12 = vmul.f32 %v4399_v5, %v9141_v47 }
 0x3c6   : > { %v4412_v56 = vadd.f32 0.4994258, %v4411_v51  ;;  %v4448_v59 = vadd.f32 0.014752088, %v4447_v37  ;;  %v4437_v48 = vadd.f32 0.0036580483, %v4436_v41 }
 0x3c7   : > { %v9174_v16 = vmul.f32 0.70710677, %v9167_v21  ;;  %v4379_v44 = vadd.f32 %v9179_v54, %v4378_v9  ;;  %v4401_v30 = vadd.f32 0.18741608, %v4400_v12  ;;  %v4363_v41 = vadd.f32 1.1283791, %v4362_v49 }
 0x3c8   : > { %v4413_v17 = vmul.f32 %v4412_v56, %v9141_v47  ;;  %v4449_v33 = vmul.f32 %v4448_v59, %v9164_v27  ;;  %v4438_v7 = vmul.f32 %v4437_v48, %v9164_v27  ;;  %v4384_v56 = vand.u32 2147483647, %v9155_v61 }
 0x3c9   : > { %v4472_v26 = vmul.f32 %v9174_v16, %v9174_v16  ;;  %v4402_v19 = vmul.f32 %v4401_v30, %v9141_v47  ;;  %v4364_v47 = vmul.f32 %v4363_v41, %v9114_v24  ;;  %v9273_v12 = vmul.f32 0.5, %v9110_v58 }
 0x3ca   : > { %v9201_v38 = vadd.f32 1.0, %v4413_v17  ;;  %v4450_v60 = vadd.f32 0.112945676, %v4449_v33  ;;  %v4439_v62 = vadd.f32 0.05243302, %v4438_v7  ;;  %v4383_v33 = vsel %vm9246_vm9, %v9179_v54, %v4379_v44 }
 0x3cb   : > { %v9184_v63 = vmin.f32 %v4472_v26, 16.0  ;;  %v4348_v26 = vsel %vm4345_vm6, %v4347_v31, %v4343_v13  ;;  %vm4385_vm10 = vcmp.eq.f32.partialorder %v4384_v56, 8.507059e+37  ;;  %v4403_v9 = vadd.f32 1.1283791, %v4402_v19 }
 0x3cc   : > { %v4252_v55 = vpop.f32.mrf.mxu2  ;;  %5579 = vrcp.f32 %v9201_v38  ;;  %v4451_v25 = vmul.f32 %v4450_v60, %v9164_v27  ;;  %v4440_v54 = vmul.f32 %v4439_v62, %v9164_v27  ;;  %vm4420_vm11 = vweird.f32 %v9201_v38 }
 0x3cd   : > { %v9190_v29 = vadd.f32 %v9072_v39, %v4252_v55  ;;  %v4485_v40 = vmul.f32 3.8918573e-05, %v9184_v63  ;;  %v4474_v57 = vmul.f32 2.1237322e-06, %v9184_v63  ;;  %v4386_v55 = vand.u32 2147483648, %v9155_v61 }
 0x3ce   : > { %v4452_v3 = vadd.f32 0.4994258, %v4451_v25 }
 0x3cf   : > { %v4486_v14 = vadd.f32 0.001143296, %v4485_v40  ;;  %v9204_v42 = vmul.f32 0.70710677, %v9190_v29  ;;  %v4475_v51 = vadd.f32 0.00028619796, %v4474_v57  ;;  %v4349_v40 = vmul.f32 %v4348_v26, %v4324_v23 }
 0x3d0   : > { %v4453_v52 = vmul.f32 %v4452_v3, %v9164_v27  ;;  %v4441_v23 = vadd.f32 0.18741608, %v4440_v54 }
 0x3d1   : > { %v4487_v8 = vmul.f32 %v4486_v14, %v9184_v63  ;;  %v4512_v45 = vmul.f32 %v9204_v42, %v9204_v42  ;;  %v4476_v1 = vmul.f32 %v4475_v51, %v9184_v63  ;;  %v4387_v14 = vor.u32 1.1754944e-38, %v4386_v55 }
 0x3d2   : > { %v9235_v32 = vpop.eup %5579  ;;  %v9241_v59 = vadd.f32 1.0, %v4453_v52  ;;  %v4404_v52 = vmul.f32 %v4403_v9, %v9134_v46  ;;  %v4424_v51 = vand.u32 2147483647, %v9201_v38  ;;  %v4442_v56 = vmul.f32 %v4441_v23, %v9164_v27 }
 0x3d3   : > { %v4488_v18 = vadd.f32 0.014752088, %v4487_v8  ;;  %v9228_v22 = vmin.f32 %v4512_v45, 16.0  ;;  %v4416_v61 = vmul.f32 %v9235_v32, %v9201_v38  ;;  %v5350_v8 = vclamps-f32 %v4349_v40, 1.0 }
 0x3d4   : > { %5581 = vrcp.f32 %v9241_v59  ;;  %v4388_v15 = vsel %vm4385_vm10, %v4387_v14, %v4383_v33  ;;  %v4477_v13 = vadd.f32 0.0036580483, %v4476_v1  ;;  %vm4421_vm12 = vweird.f32 %v9235_v32 }
 0x3d5   : > { %v4489_v10 = vmul.f32 %v4488_v18, %v9184_v63  ;;  %v4514_v35 = vmul.f32 2.1237322e-06, %v9228_v22  ;;  %v4525_v17 = vmul.f32 3.8918573e-05, %v9228_v22  ;;  %v4417_v36 = vsub.f32 1.0, %v4416_v61  ;;  %vm9308_vm15 = vmor %vm4420_vm11, %vm4421_vm12 }
 0x3d6   : > { %v4389_v3 = vmul.f32 %v4388_v15, %v4364_v47  ;;  %v9276_v26 = vadd.f32 1.0, %v5350_v8  ;;  %v4478_v7 = vmul.f32 %v4477_v13, %v9184_v63  ;;  %vm9300_vm14 = vcmp.eq.f32.partialorder %v4424_v51, 8.507059e+37 }
 0x3d7   : > { %v4490_v37 = vadd.f32 0.112945676, %v4489_v10  ;;  %v4515_v50 = vadd.f32 0.00028619796, %v4514_v35  ;;  %v4526_v28 = vadd.f32 0.001143296, %v4525_v17  ;;  %v4418_v24 = vmul.f32 %v9235_v32, %v4417_v36 }
 0x3d8   : > { %v5351_v30 = vclamps-f32 %v4389_v3, 1.0  ;;  %v4479_v40 = vadd.f32 0.05243302, %v4478_v7  ;;  %v4466_v1 = vand.u32 2147483648, %v9241_v59  ;;  %vm4460_vm0 = vweird.f32 %v9241_v59 }
 0x3d9   : > { %v4491_v11 = vmul.f32 %v4490_v37, %v9184_v63  ;;  %v4516_v34 = vmul.f32 %v4515_v50, %v9228_v22  ;;  %v4527_v48 = vmul.f32 %v4526_v28, %v9228_v22  ;;  %v4426_v37 = vand.u32 2147483648, %v9201_v38 }
 0x3da   : > { %v5582_v18 = vpop.eup %5581  ;;  %v4419_v50 = vadd.f32 %v9235_v32, %v4418_v24  ;;  %v4953_v19 = vadd.f32 1.0, %v5351_v30  ;;  %v4464_v28 = vand.u32 2147483647, %v9241_v59  ;;  %v4480_v15 = vmul.f32 %v4479_v40, %v9184_v63 }
 0x3db   : > { %v4492_v60 = vadd.f32 0.4994258, %v4491_v11  ;;  %v4517_v45 = vadd.f32 0.0036580483, %v4516_v34  ;;  %v4528_v31 = vadd.f32 0.014752088, %v4527_v48  ;;  %v4456_v10 = vmul.f32 %v5582_v18, %v9241_v59 }
 0x3dc   : > { %vm4461_vm13 = vweird.f32 %v5582_v18  ;;  %v4427_v34 = vor.u32 1.1754944e-38, %v4426_v37  ;;  %v4467_v48 = vor.u32 1.1754944e-38, %v4466_v1  ;;  %vm4465_vm3 = vcmp.eq.f32.partialorder %v4464_v28, 8.507059e+37 }
 0x3dd   : > { %v4493_v0 = vmul.f32 %v4492_v60, %v9184_v63  ;;  %v4457_v44 = vsub.f32 1.0, %v4456_v10  ;;  %v4529_v58 = vmul.f32 %v4528_v31, %v9228_v22  ;;  %v4518_v35 = vmul.f32 %v4517_v45, %v9228_v22  ;;  %vm9317_vm1 = vmor %vm4460_vm0, %vm4461_vm13 }
 0x3de   : > { %v4481_v23 = vadd.f32 0.18741608, %v4480_v15  ;;  %v4280_v7 = vmul.f32 0.5, %v9078_v2  ;;  %v9344_v37 = vmul.f32 %v4953_v19, %v9273_v12  ;;  %v4283_v60 = vmul.f32 0.5, %v9144_v20 }
 0x3df   : > { %v9267_v57 = vadd.f32 1.0, %v4493_v0  ;;  %v4458_v11 = vmul.f32 %v5582_v18, %v4457_v44  ;;  %v4530_v46 = vadd.f32 0.112945676, %v4529_v58  ;;  %v4519_v41 = vadd.f32 0.05243302, %v4518_v35 }
 0x3e0   : > { %v4443_v0 = vadd.f32 1.1283791, %v4442_v56  ;;  %v9350_v2 = vmul.f32 %v9276_v26, %v4280_v7 }
 0x3e1   : > { %5583 = vrcp.f32 %v9267_v57  ;;  %v4459_v62 = vadd.f32 %v5582_v18, %v4458_v11  ;;  %v4531_v17 = vmul.f32 %v4530_v46, %v9228_v22  ;;  %v4504_v46 = vand.u32 2147483647, %v9267_v57 }
 0x3e2   : > { %v4444_v44 = vmul.f32 %v4443_v0, %v9151_v53  ;;  %v4482_v53 = vmul.f32 %v4481_v23, %v9184_v63  ;;  %vm4500_vm2 = vweird.f32 %v9267_v57 }
 0x3e3   : > { %v4532_v38 = vadd.f32 0.4994258, %v4531_v17  ;;  %v4463_v36 = vsel %vm9317_vm1, %v5582_v18, %v4459_v62  ;;  %vm9365_vm4 = vcmp.eq.f32.partialorder %v4504_v46, 8.507059e+37 }
 0x3e4   : > { %v4468_v3 = vsel %vm4465_vm3, %v4467_v48, %v4463_v36  ;;  %v4285_v48 = vmul.f32 0.5, %v9190_v29 }
 0x3e5   : > { %v4533_v47 = vmul.f32 %v4532_v38, %v9228_v22  ;;  %v4469_v30 = vmul.f32 %v4468_v3, %v4444_v44 }
 0x3e7   : > { %v9298_v61 = vpop.eup %5583  ;;  %v9337_v10 = vadd.f32 1.0, %v4533_v47  ;;  %v5353_v1 = vclamps-f32 %v4469_v30, 1.0 }
 0x3e8   : > { %v4496_v13 = vmul.f32 %v9298_v61, %v9267_v57  ;;  %vm4501_vm5 = vweird.f32 %v9298_v61 }
 0x3e9   : > { %5585 = vrcp.f32 %v9337_v10  ;;  %v4955_v0 = vadd.f32 1.0, %v5353_v1  ;;  %vm9374_vm6 = vmor %vm4500_vm2, %vm4501_vm5  ;;  %v4546_v47 = vand.u32 2147483648, %v9337_v10  ;;  %vm4540_vm8 = vweird.f32 %v9337_v10 }
 0x3ea   : > { %v4497_v58 = vsub.f32 1.0, %v4496_v13 }
 0x3eb   : > { %v4255_v5 = vpop.f32.mrf.mxu2 }
 0x3ec   : > { %v9264_v25 = vadd.f32 %v9072_v39, %v4255_v5  ;;  %v4423_v5 = vsel %vm9308_vm15, %v9235_v32, %v4419_v50  ;;  %v4520_v32 = vmul.f32 %v4519_v41, %v9228_v22  ;;  %v4506_v50 = vand.u32 2147483648, %v9267_v57 }
 0x3ed   : > { %v4428_v45 = vsel %vm9300_vm14, %v4427_v34, %v4423_v5  ;;  %v4483_v34 = vadd.f32 1.1283791, %v4482_v53 }
 0x3ee   : > { %v9270_v43 = vmul.f32 0.70710677, %v9264_v25  ;;  %v4429_v35 = vmul.f32 %v4428_v45, %v4404_v52  ;;  %v4498_v52 = vmul.f32 %v9298_v61, %v4497_v58  ;;  %v4507_v38 = vor.u32 1.1754944e-38, %v4506_v50 }
 0x3ef   : > { %v5586_v19 = vpop.eup %5585  ;;  %v9390_v58 = vmul.f32 %v4955_v0, %v4283_v60  ;;  %v4484_v46 = vmul.f32 %v4483_v34, %v9174_v16 }
 0x3f0   : > { %v4552_v49 = vmul.f32 %v9270_v43, %v9270_v43  ;;  %v5352_v62 = vclamps-f32 %v4429_v35, 1.0  ;;  %v4536_v5 = vmul.f32 %v5586_v19, %v9337_v10  ;;  %vm4541_vm7 = vweird.f32 %v5586_v19 }
 0x3f1   : > { %vm4542_vm9 = vmor %vm4540_vm8, %vm4541_vm7 }
 0x3f2   : > { %v9292_v6 = vmin.f32 %v4552_v49, 16.0  ;;  %v4521_v49 = vadd.f32 0.18741608, %v4520_v32  ;;  %v4954_v15 = vadd.f32 1.0, %v5352_v62  ;;  %v4537_v57 = vsub.f32 1.0, %v4536_v5 }
 0x3f3   : > { %v4257_v55 = vpop.f32.mrf.mxu2  ;;  %v4544_v32 = vand.u32 2147483647, %v9337_v10  ;;  %v4547_v10 = vor.u32 1.1754944e-38, %v4546_v47 }
 0x3f4   : > { %v9296_v33 = vadd.f32 %v9072_v39, %v4257_v55  ;;  %v4565_v14 = vmul.f32 3.8918573e-05, %v9292_v6  ;;  %v4554_v31 = vmul.f32 2.1237322e-06, %v9292_v6  ;;  %v4282_v55 = vmul.f32 0.5, %v9127_v4 }
 0x3f5   : > { %v4522_v17 = vmul.f32 %v4521_v49, %v9228_v22  ;;  %v4499_v22 = vadd.f32 %v9298_v61, %v4498_v52  ;;  %vm4545_vm10 = vcmp.eq.f32.partialorder %v4544_v32, 8.507059e+37 }
 0x3f6   : > { %v4566_v54 = vadd.f32 0.001143296, %v4565_v14  ;;  %v9327_v59 = vmul.f32 0.70710677, %v9296_v33  ;;  %v4555_v56 = vadd.f32 0.00028619796, %v4554_v31  ;;  %v9384_v23 = vmul.f32 %v4954_v15, %v4282_v55 }
 0x3f7   : > { %v4523_v36 = vadd.f32 1.1283791, %v4522_v17  ;;  %v4503_v31 = vsel %vm9374_vm6, %v9298_v61, %v4499_v22 }
 0x3f8   : > { %v4567_v9 = vmul.f32 %v4566_v54, %v9292_v6  ;;  %v4592_v18 = vmul.f32 %v9327_v59, %v9327_v59  ;;  %v4556_v63 = vmul.f32 %v4555_v56, %v9292_v6  ;;  %v4508_v61 = vsel %vm9365_vm4, %v4507_v38, %v4503_v31 }
 0x3f9   : > { %v4524_v55 = vmul.f32 %v4523_v36, %v9204_v42  ;;  %v4509_v62 = vmul.f32 %v4508_v61, %v4484_v46  ;;  %v4284_v31 = vmul.f32 0.5, %v9167_v21 }
 0x3fa   : > { %v4568_v24 = vadd.f32 0.014752088, %v4567_v9  ;;  %v9341_v51 = vmin.f32 %v4592_v18, 16.0  ;;  %v4557_v13 = vadd.f32 0.0036580483, %v4556_v63  ;;  %v4538_v18 = vmul.f32 %v5586_v19, %v4537_v57 }
 0x3fb   : > { %v5354_v34 = vclamps-f32 %v4509_v62, 1.0 }
 0x3fc   : > { %v4569_v11 = vmul.f32 %v4568_v24, %v9292_v6  ;;  %v4594_v12 = vmul.f32 2.1237322e-06, %v9341_v51  ;;  %v4605_v4 = vmul.f32 3.8918573e-05, %v9341_v51  ;;  %v4539_v35 = vadd.f32 %v5586_v19, %v4538_v18 }
 0x3fd   : > { %v4558_v49 = vmul.f32 %v4557_v13, %v9292_v6  ;;  %v4956_v13 = vadd.f32 1.0, %v5354_v34 }
 0x3fe   : > { %v4570_v40 = vadd.f32 0.112945676, %v4569_v11  ;;  %v4595_v27 = vadd.f32 0.00028619796, %v4594_v12  ;;  %v4606_v14 = vadd.f32 0.001143296, %v4605_v4  ;;  %v4543_v56 = vsel %vm4542_vm9, %v5586_v19, %v4539_v35 }
 0x3ff   : > { %v4548_v12 = vsel %vm4545_vm10, %v4547_v10, %v4543_v56  ;;  %v9437_v29 = vmul.f32 %v4956_v13, %v4284_v31 }
 0x400   : > { %v4571_v41 = vmul.f32 %v4570_v40, %v9292_v6  ;;  %v4596_v8 = vmul.f32 %v4595_v27, %v9341_v51  ;;  %v4607_v20 = vmul.f32 %v4606_v14, %v9341_v51  ;;  %v4549_v50 = vmul.f32 %v4548_v12, %v4524_v55 }
 0x401   : > { %v4559_v40 = vadd.f32 0.05243302, %v4558_v49 }
 0x402   : > { %v4572_v54 = vadd.f32 0.4994258, %v4571_v41  ;;  %v4608_v45 = vadd.f32 0.014752088, %v4607_v20  ;;  %v4597_v3 = vadd.f32 0.0036580483, %v4596_v8 }
 0x403   : > { %v5355_v41 = vclamps-f32 %v4549_v50, 1.0  ;;  %v4560_v19 = vmul.f32 %v4559_v40, %v9292_v6 }
 0x404   : > { %v4573_v9 = vmul.f32 %v4572_v54, %v9292_v6  ;;  %v4609_v7 = vmul.f32 %v4608_v45, %v9341_v51  ;;  %v4598_v11 = vmul.f32 %v4597_v3, %v9341_v51 }
 0x405   : > { %v4260_v44 = vpop.f32.mrf.mxu2  ;;  %v4957_v38 = vadd.f32 1.0, %v5355_v41  ;;  %v4561_v0 = vadd.f32 0.18741608, %v4560_v19 }
 0x406   : > { %v9387_v24 = vadd.f32 1.0, %v4573_v9  ;;  %v9394_v30 = vadd.f32 %v9072_v39, %v4260_v44  ;;  %v4610_v53 = vadd.f32 0.112945676, %v4609_v7  ;;  %v4599_v27 = vadd.f32 0.05243302, %v4598_v11 }
 0x407   : > { %v9432_v18 = vmul.f32 %v4957_v38, %v4285_v48  ;;  %v4562_v3 = vmul.f32 %v4561_v0, %v9292_v6 }
 0x408   : > { %5587 = vrcp.f32 %v9387_v24  ;;  %v9403_v52 = vmul.f32 0.70710677, %v9394_v30  ;;  %v4611_v4 = vmul.f32 %v4610_v53, %v9341_v51  ;;  %v4600_v15 = vmul.f32 %v4599_v27, %v9341_v51 }
 0x409   : > { %v4584_v61 = vand.u32 2147483647, %v9387_v24  ;;  %v4586_v55 = vand.u32 2147483648, %v9387_v24  ;;  %vm4580_vm12 = vweird.f32 %v9387_v24  ;;  %v4987_v46 = vpack.c.bf16 %v9432_v18, %v9437_v29 }
 0x40a   : > { %v4632_v17 = vmul.f32 %v9403_v52, %v9403_v52  ;;  %v4612_v1 = vadd.f32 0.4994258, %v4611_v4  ;;  %v4601_v47 = vadd.f32 0.18741608, %v4600_v15  ;;  %v4563_v12 = vadd.f32 1.1283791, %v4562_v3 }
 0x40b   : > { %vm4585_vm14 = vcmp.eq.f32.partialorder %v4584_v61, 8.507059e+37  ;;  %v4587_v27 = vor.u32 1.1754944e-38, %v4586_v55 }
 0x40c   : > { %v9410_v16 = vmin.f32 %v4632_v17, 16.0  ;;  %v4613_v28 = vmul.f32 %v4612_v1, %v9341_v51  ;;  %v4602_v10 = vmul.f32 %v4601_v47, %v9341_v51 }
 0x40d   : > { %v4262_v14 = vpop.f32.mrf.mxu2 }
 0x40e   : > { %v5588_v63 = vpop.eup %5587  ;;  %v4645_v22 = vmul.f32 3.8918573e-05, %v9410_v16  ;;  %v9417_v5 = vadd.f32 %v9072_v39, %v4262_v14  ;;  %v9420_v54 = vadd.f32 1.0, %v4613_v28  ;;  %v4634_v36 = vmul.f32 2.1237322e-06, %v9410_v16 }
 0x40f   : > { %v4576_v60 = vmul.f32 %v5588_v63, %v9387_v24  ;;  %vm4581_vm11 = vweird.f32 %v5588_v63  ;;  %v4603_v1 = vadd.f32 1.1283791, %v4602_v10 }
 0x410   : > { %v4646_v20 = vadd.f32 0.001143296, %v4645_v22  ;;  %v9424_v57 = vmul.f32 0.70710677, %v9417_v5  ;;  %5589 = vrcp.f32 %v9420_v54  ;;  %v4635_v7 = vadd.f32 0.00028619796, %v4634_v36  ;;  %vm9448_vm13 = vmor %vm4580_vm12, %vm4581_vm11 }
 0x411   : > { %v4577_v8 = vsub.f32 1.0, %v4576_v60  ;;  %v4626_v14 = vand.u32 2147483648, %v9420_v54  ;;  %vm4620_vm0 = vweird.f32 %v9420_v54 }
 0x412   : > { %v4647_v9 = vmul.f32 %v4646_v20, %v9410_v16  ;;  %v4672_v45 = vmul.f32 %v9424_v57, %v9424_v57  ;;  %v4636_v40 = vmul.f32 %v4635_v7, %v9410_v16 }
 0x413   : > { %v4578_v32 = vmul.f32 %v5588_v63, %v4577_v8  ;;  %v4564_v8 = vmul.f32 %v4563_v12, %v9270_v43  ;;  %v4627_v48 = vor.u32 1.1754944e-38, %v4626_v14 }
 0x414   : > { %v4648_v44 = vadd.f32 0.014752088, %v4647_v9  ;;  %v9435_v35 = vmin.f32 %v4672_v45, 16.0  ;;  %v4637_v15 = vadd.f32 0.0036580483, %v4636_v40  ;;  %v4604_v45 = vmul.f32 %v4603_v1, %v9327_v59 }
 0x415   : > { %v4579_v49 = vadd.f32 %v5588_v63, %v4578_v32 }
 0x416   : > { %v4649_v21 = vmul.f32 %v4648_v44, %v9410_v16  ;;  %v4674_v56 = vmul.f32 2.1237322e-06, %v9435_v35  ;;  %v5590_v11 = vpop.eup %5589  ;;  %v4685_v6 = vmul.f32 3.8918573e-05, %v9435_v35  ;;  %v4638_v3 = vmul.f32 %v4637_v15, %v9410_v16 }
 0x417   : > { %v4616_v51 = vmul.f32 %v5590_v11, %v9420_v54  ;;  %v4583_v4 = vsel %vm9448_vm13, %v5588_v63, %v4579_v49  ;;  %vm4621_vm15 = vweird.f32 %v5590_v11  ;;  %v4624_v63 = vand.u32 2147483647, %v9420_v54 }
 0x418   : > { %v4650_v62 = vadd.f32 0.112945676, %v4649_v21  ;;  %v4675_v24 = vadd.f32 0.00028619796, %v4674_v56  ;;  %v4686_v17 = vadd.f32 0.001143296, %v4685_v6  ;;  %v4588_v28 = vsel %vm4585_vm14, %v4587_v27, %v4583_v4  ;;  %vm4622_vm1 = vmor %vm4620_vm0, %vm4621_vm15 }
 0x419   : > { %v4265_v53 = vpop.f32.mrf.mxu2  ;;  %v4617_v41 = vsub.f32 1.0, %v4616_v51  ;;  %v4589_v13 = vmul.f32 %v4588_v28, %v4564_v8  ;;  %vm4625_vm3 = vcmp.eq.f32.partialorder %v4624_v63, 8.507059e+37  ;;  %v4639_v21 = vadd.f32 0.05243302, %v4638_v3 }
 0x41a   : > { %v4651_v19 = vmul.f32 %v4650_v62, %v9410_v16  ;;  %v4676_v60 = vmul.f32 %v4675_v24, %v9435_v35  ;;  %v4687_v34 = vmul.f32 %v4686_v17, %v9435_v35  ;;  %v9472_v51 = vadd.f32 %v9072_v39, %v4265_v53 }
 0x41b   : > { %v4618_v22 = vmul.f32 %v5590_v11, %v4617_v41  ;;  %v5356_v61 = vclamps-f32 %v4589_v13, 1.0  ;;  %v4286_v62 = vmul.f32 0.5, %v9264_v25  ;;  %v4640_v17 = vmul.f32 %v4639_v21, %v9410_v16 }
 0x41c   : > { %v4652_v38 = vadd.f32 0.4994258, %v4651_v19  ;;  %v4688_v20 = vadd.f32 0.014752088, %v4687_v34  ;;  %v4677_v36 = vadd.f32 0.0036580483, %v4676_v60 }
 0x41d   : > { %v4619_v0 = vadd.f32 %v5590_v11, %v4618_v22  ;;  %v4958_v59 = vadd.f32 1.0, %v5356_v61  ;;  %v9488_v25 = vmul.f32 0.70710677, %v9472_v51  ;;  %v4641_v60 = vadd.f32 0.18741608, %v4640_v17 }
 0x41e   : > { %v4653_v32 = vmul.f32 %v4652_v38, %v9410_v16  ;;  %v4689_v47 = vmul.f32 %v4688_v20, %v9435_v35  ;;  %v4678_v54 = vmul.f32 %v4677_v36, %v9435_v35 }
 0x41f   : > { %v4623_v31 = vsel %vm4622_vm1, %v5590_v11, %v4619_v0  ;;  %v4287_v11 = vmul.f32 0.5, %v9296_v33  ;;  %v9479_v14 = vmul.f32 %v4958_v59, %v4286_v62  ;;  %v4712_v15 = vmul.f32 %v9488_v25, %v9488_v25 }
 0x420   : > { %v4628_v43 = vsel %vm4625_vm3, %v4627_v48, %v4623_v31  ;;  %v4654_v7 = vadd.f32 1.0, %v4653_v32  ;;  %v4690_v44 = vadd.f32 0.112945676, %v4689_v47  ;;  %v4679_v6 = vadd.f32 0.05243302, %v4678_v54 }
 0x421   : > { %v4267_v9 = vpop.f32.mrf.mxu2  ;;  %v4629_v49 = vmul.f32 %v4628_v43, %v4604_v45  ;;  %v4642_v38 = vmul.f32 %v4641_v60, %v9410_v16  ;;  %v9506_v31 = vmin.f32 %v4712_v15, 16.0 }
 0x422   : > { %5591 = vrcp.f32 %v4654_v7  ;;  %v4691_v10 = vmul.f32 %v4690_v44, %v9435_v35  ;;  %v4680_v1 = vmul.f32 %v4679_v6, %v9435_v35  ;;  %v9482_v33 = vadd.f32 %v9072_v39, %v4267_v9 }
 0x423   : > { %v5357_v55 = vclamps-f32 %v4629_v49, 1.0  ;;  %v4666_v20 = vand.u32 2147483648, %v4654_v7  ;;  %vm4660_vm4 = vweird.f32 %v4654_v7  ;;  %v4664_v45 = vand.u32 2147483647, %v4654_v7 }
 0x424   : > { %v4692_v12 = vadd.f32 0.4994258, %v4691_v10  ;;  %v4681_v22 = vadd.f32 0.18741608, %v4680_v1  ;;  %v9493_v63 = vmul.f32 0.70710677, %v9482_v33 }
 0x425   : > { %v4959_v56 = vadd.f32 1.0, %v5357_v55  ;;  %v4643_v43 = vadd.f32 1.1283791, %v4642_v38  ;;  %v4667_v16 = vor.u32 1.1754944e-38, %v4666_v20  ;;  %vm4665_vm7 = vcmp.eq.f32.partialorder %v4664_v45, 8.507059e+37 }
 0x426   : > { %v4693_v50 = vmul.f32 %v4692_v12, %v9435_v35  ;;  %v4682_v13 = vmul.f32 %v4681_v22, %v9435_v35  ;;  %v4752_v9 = vmul.f32 %v9493_v63, %v9493_v63  ;;  %v4725_v21 = vmul.f32 3.8918573e-05, %v9506_v31 }
 0x427   : > { %v9475_v24 = vmul.f32 %v4959_v56, %v4287_v11  ;;  %v4644_v12 = vmul.f32 %v4643_v43, %v9403_v52 }
 0x428   : > { %v5592_v4 = vpop.eup %5591  ;;  %v4694_v41 = vadd.f32 1.0, %v4693_v50  ;;  %v4683_v49 = vadd.f32 1.1283791, %v4682_v13  ;;  %v9510_v10 = vmin.f32 %v4752_v9, 16.0  ;;  %v4288_v9 = vmul.f32 0.5, %v9394_v30 }
 0x429   : > { %v4270_v40 = vpop.f32.mrf.mxu2  ;;  %v4656_v27 = vmul.f32 %v5592_v4, %v4654_v7  ;;  %v4988_v34 = vpack.c.bf16 %v9475_v24, %v9479_v14  ;;  %vm4661_vm2 = vweird.f32 %v5592_v4  ;;  %v4994_v24 = vstv %s4993_s22 }
 0x42a   : > { %v9485_v53 = vadd.f32 %v9072_v39, %v4270_v40  ;;  %5593 = vrcp.f32 %v4694_v41  ;;  %vm4662_vm5 = vmor %vm4660_vm4, %vm4661_vm2  ;;  %v4706_v54 = vand.u32 2147483648, %v4694_v41  ;;  %v4704_v55 = vand.u32 2147483647, %v4694_v41 }
 0x42b   : > { %v4657_v19 = vsub.f32 1.0, %v4656_v27  ;;  %vm4700_vm8 = vweird.f32 %v4694_v41  ;;  %v4684_v50 = vmul.f32 %v4683_v49, %v9424_v57  ;;  %v4726_v27 = vadd.f32 0.001143296, %v4725_v21 }
 0x42c   : > { %v9496_v8 = vmul.f32 0.70710677, %v9485_v53  ;;  %v4707_v59 = vor.u32 1.1754944e-38, %v4706_v54  ;;  %vm4705_vm10 = vcmp.eq.f32.partialorder %v4704_v55, 8.507059e+37 }
 0x42d   : > { %v4658_v28 = vmul.f32 %v5592_v4, %v4657_v19  ;;  %v4727_v57 = vmul.f32 %v4726_v27, %v9506_v31 }
 0x42e   : > { %v4792_v48 = vmul.f32 %v9496_v8, %v9496_v8 }
 0x42f   : > { %v4659_v36 = vadd.f32 %v5592_v4, %v4658_v28 }
 0x430   : > { %v5594_v0 = vpop.eup %5593  ;;  %v9508_v35 = vmin.f32 %v4792_v48, 16.0 }
 0x431   : > { %v4272_v32 = vpop.f32.mrf.mxu2  ;;  %v4696_v47 = vmul.f32 %v5594_v0, %v4694_v41  ;;  %v4663_v44 = vsel %vm4662_vm5, %v5592_v4, %v4659_v36  ;;  %vm4701_vm6 = vweird.f32 %v5594_v0  ;;  %v4765_v4 = vmul.f32 3.8918573e-05, %v9510_v10 }
 0x432   : > { %v9514_v7 = vadd.f32 %v9072_v39, %v4272_v32  ;;  %v4668_v56 = vsel %vm4665_vm7, %v4667_v16, %v4663_v44  ;;  %vm4702_vm9 = vmor %vm4700_vm8, %vm4701_vm6  ;;  %v4805_v11 = vmul.f32 3.8918573e-05, %v9508_v35  ;;  %v4289_v32 = vmul.f32 0.5, %v9417_v5 }
 0x433   : > { %v4697_v3 = vsub.f32 1.0, %v4696_v47  ;;  %v4669_v62 = vmul.f32 %v4668_v56, %v4644_v12  ;;  %v4766_v28 = vadd.f32 0.001143296, %v4765_v4  ;;  %v4728_v47 = vadd.f32 0.014752088, %v4727_v57 }
 0x434   : > { %v9521_v39 = vmul.f32 0.70710677, %v9514_v7  ;;  %v4806_v19 = vadd.f32 0.001143296, %v4805_v11  ;;  %v4714_v11 = vmul.f32 2.1237322e-06, %v9506_v31 }
 0x435   : > { %v4698_v61 = vmul.f32 %v5594_v0, %v4697_v3  ;;  %v5358_v22 = vclamps-f32 %v4669_v62, 1.0  ;;  %v4767_v13 = vmul.f32 %v4766_v28, %v9510_v10 }
 0x436   : > { %v4832_v52 = vmul.f32 %v9521_v39, %v9521_v39  ;;  %v4807_v38 = vmul.f32 %v4806_v19, %v9508_v35  ;;  %v4715_v19 = vadd.f32 0.00028619796, %v4714_v11 }
 0x437   : > { %v4699_v6 = vadd.f32 %v5594_v0, %v4698_v61  ;;  %v4960_v48 = vadd.f32 1.0, %v5358_v22  ;;  %v4768_v49 = vadd.f32 0.014752088, %v4767_v13  ;;  %v4729_v61 = vmul.f32 %v4728_v47, %v9506_v31 }
 0x438   : > { %v9527_v20 = vmin.f32 %v4832_v52, 16.0  ;;  %v4808_v43 = vadd.f32 0.014752088, %v4807_v38  ;;  %v4794_v22 = vmul.f32 2.1237322e-06, %v9508_v35 }
 0x439   : > { %v4703_v40 = vsel %vm4702_vm9, %v5594_v0, %v4699_v6  ;;  %v4275_v1 = vpop.f32.mrf.mxu2  ;;  %v5615_v0 = vld [vmem:[%s9813_s14] ss:$0 sm:$0xff]  ;;  %v9543_v54 = vmul.f32 %v4960_v48, %v4288_v9 }
 0x43a   : > { %v4708_v17 = vsel %vm4705_vm10, %v4707_v59, %v4703_v40  ;;  %v9532_v36 = vadd.f32 %v5615_v0, %v4275_v1  ;;  %v4845_v16 = vmul.f32 3.8918573e-05, %v9527_v20  ;;  %v4809_v30 = vmul.f32 %v4808_v43, %v9508_v35 }
 0x43b   : > { %v4709_v41 = vmul.f32 %v4708_v17, %v4684_v50  ;;  %v4769_v59 = vmul.f32 %v4768_v49, %v9510_v10  ;;  %v4730_v50 = vadd.f32 0.112945676, %v4729_v61  ;;  %v4834_v57 = vmul.f32 2.1237322e-06, %v9527_v20 }
 0x43c   : > { %v9541_v3 = vmul.f32 0.70710677, %v9532_v36  ;;  %v4846_v55 = vadd.f32 0.001143296, %v4845_v16  ;;  %v4810_v17 = vadd.f32 0.112945676, %v4809_v30 }
 0x43d   : > { %v5359_v60 = vclamps-f32 %v4709_v41, 1.0  ;;  %v4770_v27 = vadd.f32 0.112945676, %v4769_v59  ;;  %v4731_v52 = vmul.f32 %v4730_v50, %v9506_v31  ;;  %v4795_v61 = vadd.f32 0.00028619796, %v4794_v22 }
 0x43e   : > { %v4872_v5 = vmul.f32 %v9541_v3, %v9541_v3  ;;  %v4847_v56 = vmul.f32 %v4846_v55, %v9527_v20  ;;  %v4835_v55 = vadd.f32 0.00028619796, %v4834_v57 }
 0x43f   : > { %v4961_v15 = vadd.f32 1.0, %v5359_v60  ;;  %v4754_v60 = vmul.f32 2.1237322e-06, %v9510_v10  ;;  %v4771_v48 = vmul.f32 %v4770_v27, %v9510_v10  ;;  %v4732_v49 = vadd.f32 0.4994258, %v4731_v52 }
 0x440   : > { %v9552_v6 = vmin.f32 %v4872_v5, 16.0  ;;  %v4848_v40 = vadd.f32 0.014752088, %v4847_v56  ;;  %v4796_v52 = vmul.f32 %v4795_v61, %v9508_v35  ;;  %v4836_v22 = vmul.f32 %v4835_v55, %v9527_v20 }
 0x441   : > { %v9537_v45 = vmul.f32 %v4961_v15, %v4289_v32  ;;  %v4277_v44 = vpop.f32.mrf.mxu2  ;;  %v4755_v43 = vadd.f32 0.00028619796, %v4754_v60  ;;  %v4772_v11 = vadd.f32 0.4994258, %v4771_v48 }
 0x442   : > { %v9548_v21 = vadd.f32 %v5615_v0, %v4277_v44  ;;  %v4885_v4 = vmul.f32 3.8918573e-05, %v9552_v6  ;;  %v4849_v1 = vmul.f32 %v4848_v40, %v9527_v20  ;;  %v4874_v41 = vmul.f32 2.1237322e-06, %v9552_v6 }
 0x443   : > { %v4989_v12 = vpack.c.bf16 %v9537_v45, %v9543_v54  ;;  %v4811_v0 = vmul.f32 %v4810_v17, %v9508_v35  ;;  %v4716_v44 = vmul.f32 %v4715_v19, %v9506_v31  ;;  %v4733_v19 = vmul.f32 %v4732_v49, %v9506_v31 }
 0x444   : > { %v9560_v62 = vmul.f32 0.70710677, %v9548_v21  ;;  %v4886_v28 = vadd.f32 0.001143296, %v4885_v4  ;;  %v4850_v15 = vadd.f32 0.112945676, %v4849_v1  ;;  %v4756_v4 = vmul.f32 %v4755_v43, %v9510_v10 }
 0x445   : > { %v4875_v47 = vadd.f32 0.00028619796, %v4874_v41  ;;  %v4812_v5 = vadd.f32 0.4994258, %v4811_v0  ;;  %v4717_v41 = vadd.f32 0.0036580483, %v4716_v44 }
 0x446   : > { %v4912_v38 = vmul.f32 %v9560_v62, %v9560_v62  ;;  %v4887_v13 = vmul.f32 %v4886_v28, %v9552_v6  ;;  %v4851_v32 = vmul.f32 %v4850_v15, %v9527_v20  ;;  %v4773_v15 = vmul.f32 %v4772_v11, %v9510_v10 }
 0x447   : > { %v4876_v50 = vmul.f32 %v4875_v47, %v9552_v6  ;;  %v4813_v28 = vmul.f32 %v4812_v5, %v9508_v35  ;;  %v4757_v48 = vadd.f32 0.0036580483, %v4756_v4  ;;  %v4718_v47 = vmul.f32 %v4717_v41, %v9506_v31 }
 0x448   : > { %v9574_v9 = vmin.f32 %v4912_v38, 16.0  ;;  %v4888_v16 = vadd.f32 0.014752088, %v4887_v13  ;;  %v4852_v30 = vadd.f32 0.4994258, %v4851_v32  ;;  %v9594_v43 = vadd.f32 1.0, %v4733_v19 }
 0x449   : > { %v4877_v0 = vadd.f32 0.0036580483, %v4876_v50  ;;  %v9596_v49 = vadd.f32 1.0, %v4813_v28  ;;  %v4837_v61 = vadd.f32 0.0036580483, %v4836_v22  ;;  %v9598_v5 = vadd.f32 1.0, %v4773_v15 }
 0x44a   : > { %v4889_v56 = vmul.f32 %v4888_v16, %v9552_v6  ;;  %v4914_v59 = vmul.f32 2.1237322e-06, %v9574_v9  ;;  %v4925_v40 = vmul.f32 3.8918573e-05, %v9574_v9  ;;  %v4853_v17 = vmul.f32 %v4852_v30, %v9527_v20 }
 0x44b   : > { %v4797_v16 = vadd.f32 0.0036580483, %v4796_v52  ;;  %v4878_v30 = vmul.f32 %v4877_v0, %v9552_v6  ;;  %vm4820_vm13 = vweird.f32 %v9596_v49  ;;  %vm4780_vm5 = vweird.f32 %v9598_v5 }
 0x44c   : > { %v4890_v27 = vadd.f32 0.112945676, %v4889_v56  ;;  %v4915_v1 = vadd.f32 0.00028619796, %v4914_v59  ;;  %v4926_v60 = vadd.f32 0.001143296, %v4925_v40  ;;  %v4758_v59 = vmul.f32 %v4757_v48, %v9510_v10 }
 0x44d   : > { %v9589_v38 = vadd.f32 1.0, %v4853_v17  ;;  %v4719_v40 = vadd.f32 0.05243302, %v4718_v47  ;;  %v4798_v17 = vmul.f32 %v4797_v16, %v9508_v35  ;;  %v4879_v41 = vadd.f32 0.05243302, %v4878_v30 }
 0x44e   : > { %v4891_v57 = vmul.f32 %v4890_v27, %v9552_v6  ;;  %v4927_v13 = vmul.f32 %v4926_v60, %v9574_v9  ;;  %v4916_v32 = vmul.f32 %v4915_v1, %v9574_v9  ;;  %v4838_v27 = vmul.f32 %v4837_v61, %v9527_v20 }
 0x44f   : > { %5595 = vrcp.f32 %v9589_v38  ;;  %v4759_v19 = vadd.f32 0.05243302, %v4758_v59  ;;  %v4720_v28 = vmul.f32 %v4719_v40, %v9506_v31  ;;  %vm4860_vm2 = vweird.f32 %v9589_v38 }
 0x450   : > { %v4892_v44 = vadd.f32 0.4994258, %v4891_v57  ;;  %v4928_v55 = vadd.f32 0.014752088, %v4927_v13  ;;  %v4917_v11 = vadd.f32 0.0036580483, %v4916_v32  ;;  %5597 = vrcp.f32 %v9594_v43 }
 0x451   : > { %5599 = vrcp.f32 %v9596_v49  ;;  %v4799_v57 = vadd.f32 0.05243302, %v4798_v17  ;;  %v4839_v15 = vadd.f32 0.05243302, %v4838_v27  ;;  %v4880_v13 = vmul.f32 %v4879_v41, %v9552_v6 }
 0x452   : > { %v4893_v56 = vmul.f32 %v4892_v44, %v9552_v6  ;;  %v4929_v50 = vmul.f32 %v4928_v55, %v9574_v9  ;;  %5601 = vrcp.f32 %v9598_v5  ;;  %v4918_v52 = vmul.f32 %v4917_v11, %v9574_v9 }
 0x453   : > { %v4760_v47 = vmul.f32 %v4759_v19, %v9510_v10  ;;  %v4721_v55 = vadd.f32 0.18741608, %v4720_v28  ;;  %v4800_v11 = vmul.f32 %v4799_v57, %v9508_v35  ;;  %v4881_v17 = vadd.f32 0.18741608, %v4880_v13 }
 0x454   : > { %v9606_v4 = vadd.f32 1.0, %v4893_v56  ;;  %v4930_v1 = vadd.f32 0.112945676, %v4929_v50  ;;  %v4919_v44 = vadd.f32 0.05243302, %v4918_v52  ;;  %v4840_v50 = vmul.f32 %v4839_v15, %v9527_v20 }
 0x455   : > { %v9614_v60 = vpop.eup %5595  ;;  %v9640_v28 = vmul.f32 %v4721_v55, %v9506_v31 }
 0x456   : > { %5603 = vrcp.f32 %v9606_v4  ;;  %v4931_v22 = vmul.f32 %v4930_v1, %v9574_v9  ;;  %v9618_v0 = vpop.eup %5597  ;;  %v4856_v16 = vmul.f32 %v9614_v60, %v9589_v38  ;;  %v4761_v1 = vadd.f32 0.18741608, %v4760_v47 }
 0x457   : > { %v9621_v32 = vpop.eup %5599  ;;  %v4736_v59 = vmul.f32 %v9618_v0, %v9594_v43  ;;  %v4920_v19 = vmul.f32 %v4919_v44, %v9574_v9  ;;  %v4841_v26 = vadd.f32 0.18741608, %v4840_v50  ;;  %v4882_v47 = vmul.f32 %v4881_v17, %v9552_v6 }
 0x458   : > { %v4932_v48 = vadd.f32 0.4994258, %v4931_v22  ;;  %v9626_v61 = vpop.eup %5601  ;;  %v4816_v40 = vmul.f32 %v9621_v32, %v9596_v49  ;;  %v4857_v41 = vsub.f32 1.0, %v4856_v16  ;;  %v9647_v44 = vmul.f32 %v4761_v1, %v9510_v10 }
 0x459   : > { %v4776_v22 = vmul.f32 %v9626_v61, %v9598_v5  ;;  %v4737_v15 = vsub.f32 1.0, %v4736_v59  ;;  %v4906_v55 = vand.u32 2147483648, %v9606_v4  ;;  %vm4900_vm12 = vweird.f32 %v9606_v4 }
 0x45a   : > { %v4933_v30 = vmul.f32 %v4932_v48, %v9574_v9  ;;  %v4801_v48 = vadd.f32 0.18741608, %v4800_v11  ;;  %v4817_v13 = vsub.f32 1.0, %v4816_v40  ;;  %v4858_v31 = vmul.f32 %v9614_v60, %v4857_v41 }
 0x45b   : > { %v4777_v42 = vsub.f32 1.0, %v4776_v22  ;;  %v4904_v59 = vand.u32 2147483647, %v9606_v4  ;;  %v4738_v11 = vmul.f32 %v9618_v0, %v4737_v15  ;;  %v4824_v10 = vand.u32 2147483647, %v9596_v49 }
 0x45c   : > { %v5604_v56 = vpop.eup %5603  ;;  %v9637_v52 = vadd.f32 1.0, %v4933_v30  ;;  %v4921_v30 = vadd.f32 0.18741608, %v4920_v19  ;;  %v4802_v6 = vmul.f32 %v4801_v48, %v9508_v35  ;;  %v4818_v40 = vmul.f32 %v9621_v32, %v4817_v13 }
 0x45d   : > { %v4896_v27 = vmul.f32 %v5604_v56, %v9606_v4  ;;  %vm4901_vm11 = vweird.f32 %v5604_v56  ;;  %v4842_v17 = vmul.f32 %v4841_v26, %v9527_v20  ;;  %v4883_v1 = vadd.f32 1.1283791, %v4882_v47 }
 0x45e   : > { %5605 = vrcp.f32 %v9637_v52  ;;  %vm9657_vm14 = vmor %vm4900_vm12, %vm4901_vm11  ;;  %v4859_v19 = vadd.f32 %v9614_v60, %v4858_v31  ;;  %vm4861_vm15 = vweird.f32 %v9614_v60  ;;  %v4907_v35 = vor.u32 1.1754944e-38, %v4906_v55 }
 0x45f   : > { %v4897_v57 = vsub.f32 1.0, %v4896_v27  ;;  %v4922_v22 = vmul.f32 %v4921_v30, %v9574_v9  ;;  %vm4781_vm0 = vweird.f32 %v9626_v61  ;;  %v4826_v15 = vand.u32 2147483648, %v9596_v49  ;;  %vm9680_vm6 = vmor %vm4860_vm2, %vm4861_vm15 }
 0x460   : > { %vm4905_vm1 = vcmp.eq.f32.partialorder %v4904_v59, 8.507059e+37  ;;  %vm4821_vm3 = vweird.f32 %v9621_v32  ;;  %v4866_v20 = vand.u32 2147483648, %v9589_v38  ;;  %vm4741_vm4 = vweird.f32 %v9618_v0  ;;  %vm9724_vm15 = vmor %vm4780_vm5, %vm4781_vm0 }
 0x461   : > { %v4898_v16 = vmul.f32 %v5604_v56, %v4897_v57  ;;  %v4778_v57 = vmul.f32 %v9626_v61, %v4777_v42  ;;  %v4819_v42 = vadd.f32 %v9621_v32, %v4818_v40  ;;  %v4864_v48 = vand.u32 2147483647, %v9589_v38  ;;  %vm9695_vm8 = vmor %vm4820_vm13, %vm4821_vm3 }
 0x462   : > { %v4884_v13 = vmul.f32 %v4883_v1, %v9541_v3  ;;  %v4863_v31 = vsel %vm9680_vm6, %v9614_v60, %v4859_v19  ;;  %v4923_v55 = vadd.f32 1.1283791, %v4922_v22  ;;  %v4946_v30 = vand.u32 2147483648, %v9637_v52 }
 0x463   : > { %v4899_v27 = vadd.f32 %v5604_v56, %v4898_v16  ;;  %v4843_v16 = vadd.f32 1.1283791, %v4842_v17  ;;  %v4944_v50 = vand.u32 2147483647, %v9637_v52  ;;  %v4803_v40 = vadd.f32 1.1283791, %v4802_v6 }
 0x464   : > { %v5606_v41 = vpop.eup %5605  ;;  %vm9699_vm9 = vcmp.eq.f32.partialorder %v4824_v10, 8.507059e+37  ;;  %v4827_v60 = vor.u32 1.1754944e-38, %v4826_v15  ;;  %v4867_v17 = vor.u32 1.1754944e-38, %v4866_v20  ;;  %v4823_v1 = vsel %vm9695_vm8, %v9621_v32, %v4819_v42 }
 0x465   : > { %v4903_v4 = vsel %vm9657_vm14, %v5604_v56, %v4899_v27  ;;  %v4936_v26 = vmul.f32 %v5606_v41, %v9637_v52  ;;  %vm4941_vm7 = vweird.f32 %v5606_v41  ;;  %vm4865_vm10 = vcmp.eq.f32.partialorder %v4864_v48, 8.507059e+37 }
 0x466   : > { %v4908_v56 = vsel %vm4905_vm1, %v4907_v35, %v4903_v4  ;;  %vm4940_vm11 = vweird.f32 %v9637_v52  ;;  %v4779_v49 = vadd.f32 %v9626_v61, %v4778_v57  ;;  %v4844_v4 = vmul.f32 %v4843_v16, %v9521_v39 }
 0x467   : > { %v4937_v47 = vsub.f32 1.0, %v4936_v26  ;;  %v4909_v27 = vmul.f32 %v4908_v56, %v4884_v13  ;;  %v4868_v19 = vsel %vm4865_vm10, %v4867_v17, %v4863_v31  ;;  %vm4942_vm12 = vmor %vm4940_vm11, %vm4941_vm7  ;;  %v4947_v10 = vor.u32 1.1754944e-38, %v4946_v30 }
 0x468   : > { %v4924_v22 = vmul.f32 %v4923_v55, %v9560_v62  ;;  %vm4945_vm13 = vcmp.eq.f32.partialorder %v4944_v50, 8.507059e+37  ;;  %v4784_v26 = vand.u32 2147483647, %v9598_v5  ;;  %v4786_v32 = vand.u32 2147483648, %v9598_v5 }
 0x469   : > { %v4938_v59 = vmul.f32 %v5606_v41, %v4937_v47  ;;  %v5364_v35 = vclamps-f32 %v4909_v27, 1.0  ;;  %v4828_v20 = vsel %vm9699_vm9, %v4827_v60, %v4823_v1  ;;  %v4739_v57 = vadd.f32 %v9618_v0, %v4738_v11 }
 0x46a   : > { %v4804_v39 = vmul.f32 %v4803_v40, %v9496_v8  ;;  %v4869_v56 = vmul.f32 %v4868_v19, %v4844_v4  ;;  %vm4740_vm14 = vweird.f32 %v9594_v43  ;;  %v4744_v62 = vand.u32 2147483647, %v9594_v43 }
 0x46b   : > { %v4939_v6 = vadd.f32 %v5606_v41, %v4938_v59  ;;  %v4763_v9 = vadd.f32 1.1283791, %v9647_v44  ;;  %v4783_v8 = vsel %vm9724_vm15, %v9626_v61, %v4779_v49  ;;  %v4966_v13 = vadd.f32 1.0, %v5364_v35  ;;  %vm9734_vm1 = vmor %vm4740_vm14, %vm4741_vm4 }
 0x46c   : > { %v4829_v11 = vmul.f32 %v4828_v20, %v4804_v39  ;;  %v4723_v16 = vadd.f32 1.1283791, %v9640_v28  ;;  %vm4785_vm3 = vcmp.eq.f32.partialorder %v4784_v26, 8.507059e+37  ;;  %v4787_v5 = vor.u32 1.1754944e-38, %v4786_v32 }
 0x46d   : > { %v4943_v15 = vsel %vm4942_vm12, %v5606_v41, %v4939_v6  ;;  %v4746_v41 = vand.u32 2147483648, %v9594_v43  ;;  %v4294_v44 = vmul.f32 0.5, %v9532_v36  ;;  %v4743_v31 = vsel %vm9734_vm1, %v9618_v0, %v4739_v57 }
 0x46e   : > { %v4948_v52 = vsel %vm4945_vm13, %v4947_v10, %v4943_v15  ;;  %v5363_v61 = vclamps-f32 %v4869_v56, 1.0  ;;  %v4295_v55 = vmul.f32 0.5, %v9548_v21  ;;  %vm4745_vm0 = vcmp.eq.f32.partialorder %v4744_v62, 8.507059e+37 }
 0x46f   : > { %v4949_v42 = vmul.f32 %v4948_v52, %v4924_v22  ;;  %v4747_v28 = vor.u32 1.1754944e-38, %v4746_v41  ;;  %v4788_v27 = vsel %vm4785_vm3, %v4787_v5, %v4783_v8  ;;  %v4764_v59 = vmul.f32 %v4763_v9, %v9493_v63 }
 0x470   : > { %v5362_v50 = vclamps-f32 %v4829_v11, 1.0  ;;  %v4982_v40 = vmul.f32 %v4966_v13, %v4294_v44  ;;  %v4724_v60 = vmul.f32 %v4723_v16, %v9488_v25  ;;  %v4965_v17 = vadd.f32 1.0, %v5363_v61 }
 0x471   : > { %v5365_v47 = vclamps-f32 %v4949_v42, 1.0  ;;  %v4748_v38 = vsel %vm4745_vm0, %v4747_v28, %v4743_v31  ;;  %v4789_v36 = vmul.f32 %v4788_v27, %v4764_v59  ;;  %v4293_v49 = vmul.f32 0.5, %v9514_v7 }
 0x472   : > { %v4749_v6 = vmul.f32 %v4748_v38, %v4724_v60  ;;  %v4964_v0 = vadd.f32 1.0, %v5362_v50  ;;  %v4292_v4 = vmul.f32 0.5, %v9485_v53  ;;  %v4291_v26 = vmul.f32 0.5, %v9482_v33  ;;  %v4984_v53 = vld [vmem:[%s9814_s15] sm:$0x1] }
 0x473   : > { %v4967_v30 = vadd.f32 1.0, %v5365_v47  ;;  %v5361_v21 = vclamps-f32 %v4789_v36, 1.0  ;;  %v4981_v19 = vmul.f32 %v4965_v17, %v4293_v49  ;;  %v4290_v25 = vmul.f32 0.5, %v9472_v51 }
 0x474   : > { %v5360_v10 = vclamps-f32 %v4749_v6, 1.0  ;;  %v4980_v63 = vmul.f32 %v4964_v0, %v4292_v4  ;;  %v10044_v33 = vpack.c.bf16 %v9390_v58, %v9384_v23  ;;  %v10045_v51 = vpack.c.bf16 %v9344_v37, %v9350_v2 }
 0x475   : > { %v4983_v3 = vmul.f32 %v4967_v30, %v4295_v55  ;;  %v4963_v35 = vadd.f32 1.0, %v5361_v21 }
 0x476   : > { %v4991_v22 = vpack.c.bf16 %v4981_v19, %v4980_v63  ;;  %v4962_v15 = vadd.f32 1.0, %v5360_v10 }
 0x477   : > { %v4992_v1 = vpack.c.bf16 %v4983_v3, %v4982_v40  ;;  %v4979_v32 = vmul.f32 %v4963_v35, %v4291_v26 }
 0x478   : > { %v4978_v20 = vmul.f32 %v4962_v15, %v4290_v25 }
 0x479   : > { %4995 = vmatpush.bf16.xpose.msra.mxu3 %v4992_v1 }
 0x47a   : > { %v4990_v52 = vpack.c.bf16 %v4979_v32, %v4978_v20 }
 0x481   : > { %4996 = vmatpush.bf16.xpose.msra.mxu3 %v4991_v22 }
 0x489   : > { %4997 = vmatpush.bf16.xpose.msra.mxu3 %v4990_v52 }
 0x491   : > { %4998 = vmatpush.bf16.xpose.msra.mxu3 %v4989_v12 }
 0x499   : > { %4999 = vmatpush.bf16.xpose.msra.mxu3 %v4988_v34 }
 0x4a1   : > { %5000 = vmatpush.bf16.xpose.msra.mxu3 %v4987_v46 }
 0x4a9   : > { %5001 = vmatpush.bf16.xpose.msra.mxu3 %v10044_v33 }
 0x4b1   : > { %5002 = vmatpush.bf16.xpose.msra.mxu3 %v10045_v51 }
 0x4b8   : > { %5003 = vmatmul.bf16.vlgmr.msra.gmra.mxu3 %v4984_v53 }
 0x53b   : > { %v5004_v14 = vpop.f32.mrf.mxu3 }
 0x53c   : > { %v5005_v18 = vadd.f32 %v5004_v14, %v4994_v24 }
 0x53e   : > { %v5366_v29 = vmul.f32 -1.442695, %v5005_v18 }
 0x540   : > { %5607 = vpow2.f32 %v5366_v29 }
 0x543   : > { %v5006_v46 = vpop.f32.mrf.mxu3 }
 0x546   : > { %v5608_v23 = vpop.eup %5607 }
 0x547   : > { %v5011_v58 = vadd.f32 1.0, %v5608_v23 }
 0x549   : > { %5609 = vrcp.f32 %v5011_v58  ;;  %v5023_v7 = vand.u32 2147483648, %v5011_v58  ;;  %v5021_v54 = vand.u32 2147483647, %v5011_v58  ;;  %vm5017_vm4 = vweird.f32 %v5011_v58 }
 0x54b   : > { %v5024_v57 = vor.u32 1.1754944e-38, %v5023_v7  ;;  %vm5022_vm6 = vcmp.eq.f32.partialorder %v5021_v54, 8.507059e+37 }
 0x54f   : > { %v5610_v34 = vpop.eup %5609 }
 0x550   : > { %v5013_v37 = vmul.f32 %v5610_v34, %v5011_v58  ;;  %vm5018_vm2 = vweird.f32 %v5610_v34 }
 0x551   : > { %vm5019_vm5 = vmor %vm5017_vm4, %vm5018_vm2 }
 0x552   : > { %v5014_v2 = vsub.f32 1.0, %v5013_v37 }
 0x554   : > { %v5015_v45 = vmul.f32 %v5610_v34, %v5014_v2 }
 0x556   : > { %v5016_v12 = vadd.f32 %v5610_v34, %v5015_v45 }
 0x558   : > { %v5020_v39 = vsel %vm5019_vm5, %v5610_v34, %v5016_v12 }
 0x559   : > { %v5025_v56 = vsel %vm5022_vm6, %v5024_v57, %v5020_v39 }
 0x55a   : > { %5027 = vst [vmem:[%s574_s19] sm:$0x1] %v5025_v56 }
 0x55b   : > { %5643 = shalt.err (!%p5640_p3)
}
 0x55c   : > { %5403 = dma.vmem_to_hbm [thread:$0]  (%p5811_p5), %s5040_s23, 16, %s5042_s28, %s5029_s1  }
 0x55d PF: > { %p5409_p4 = scmp.ge.s32.totalorder %s5678_s29, 2  ;;  %s5053_s18 = sand.u32 1, %s5666_s26  }
 0x55e   : > { %s5054_s19 = scalar_lea.sflag [#allocation4], %s5053_s18 }
 0x55f   : > { %p5406_p7 = pnand %p5409_p4, %p5815_p6 }
 0x561   : > { %p5407_p8 = pneg %p5406_p7 }
 0x563   : > { %5661 = dma.done.wait (%p5407_p8), %s5054_s19, 16  }
 0x564   : > { %5663 = vsyncadd (%p5407_p8), %s5054_s19, 4294967280  ;;  %s10046_s29 = sld [smem:[#allocation7_spill]]  ;;  %s10049_s26 = smov %s5670_s27 }
 0x565   : > { %s10047_s16 = sld [smem:[#allocation6_spill]] }
 0x566   : > { %s10048_s28 = sld [smem:[#allocation8_spill]] }
 0x56a   : > { %p28_p9 = scmp.ge.s32.totalorder %s10046_s29, 4  }
 0x56b   : > { %s10050_s27 = smov %s10047_s16 }
 0x56c   :  { %30 = sbr.rel (!%p28_p9) target bundleno = 8 (0x8), region = 129 }
 0x571   :  { %5059 = vsyncpa [#allocation4], 1 }
 0x572   :  { %5061 = vsyncpa [#allocation4 + $0x1], 1 }

</bundles_post_ra>
